<compile_context>
chip_gen: v7x
topology: tpu7x:2x2x1
jax: 0.10.0
libtpu: 0.0.40
codegen_flags: <defaults>
</compile_context>

<pallas_src>
import functools

import jax
import jax.numpy as jnp
from jax import lax
from jax.experimental import pallas as pl
from jax.experimental.pallas import tpu as pltpu

_SQRT1_2 = 0.7071067811865476
_BN_EPS = 1e-5
_RES_SCALE = 1.0 / 1.414          # multiply, don't divide (exact forward semantics kept)
_LANES = 128


def _round_up(x, m):
    return ((x + m - 1) // m) * m


def _vmem_limit_bytes():
    # Raise the scoped-VMEM limit above the conservative defaults while staying well
    # under each generation's physical VMEM (128 MiB v5e/v6e, 64 MiB per-TC v7x).
    try:
        cap = pltpu.get_tpu_info().vmem_capacity_bytes
        return min(int(cap * 3 // 4), 96 * 1024 * 1024)
    except Exception:
        return None


def _pick_bt(n, per_image_bytes, budget=16 * 1024 * 1024):
    """Largest divisor of n whose per-step footprint fits a conservative VMEM budget."""
    bt = max(1, min(n, budget // max(int(per_image_bytes), 1)))
    while n % bt:
        bt -= 1
    return bt


# ----------------------------------------------------------------------------- kernels

def _conv_stats_kernel(xs_ref, w_ref, z_ref, sum_ref, ssq_ref):
    """3x3 conv (kx pre-shifted onto channels) + per-channel batch-stat accumulation.

    xs_ref : (BT, H+2, W, K3p)   kx-shift-packed, lane-padded input (bf16 or f32)
    w_ref  : (3, K3p, cout_p)    weights, tap ky stacked on axis 0 (resident)
    z_ref  : (BT, H, W, cout_p)  pre-BN conv output (f32)
    sum_ref/ssq_ref : (1, cout_p) per-channel sum / sum-of-squares, accumulated across
                      the whole (sequential) batch grid into constant-index out blocks.
    """
    bt, h, w, cout_p = z_ref.shape
    k3p = xs_ref.shape[-1]
    step = pl.program_id(0)

    @pl.when(step == 0)
    def _init():
        sum_ref[...] = jnp.zeros_like(sum_ref)
        ssq_ref[...] = jnp.zeros_like(ssq_ref)

    for b in range(bt):                     # static unroll, BT kept small
        acc = jnp.zeros((h * w, cout_p), jnp.float32)
        for ky in range(3):                 # only major-axis slices -> no retiling
            tap = xs_ref[b, ky:ky + h, :, :].reshape(h * w, k3p)
            acc = acc + jnp.dot(tap, w_ref[ky], preferred_element_type=jnp.float32)
        z_ref[b] = acc.reshape(h, w, cout_p).astype(z_ref.dtype)
        # NOTE: E[z^2] - E[z]^2 in f32; clamped later.  Fine for conv activations with
        # |mean| ~ std; a two-pass variance would need another sweep over z.
        sum_ref[...] += jnp.sum(acc, axis=0, keepdims=True)
        ssq_ref[...] += jnp.sum(acc * acc, axis=0, keepdims=True)


def _norm_gelu_kernel(z_ref, a_ref, c_ref, out_ref):
    cout_p = a_ref.shape[-1]
    a = a_ref[...].reshape(1, 1, 1, cout_p)
    c = c_ref[...].reshape(1, 1, 1, cout_p)
    y = z_ref[...] * a + c                                   # folded BN affine
    h = 0.5 * y * (1.0 + lax.erf(y * _SQRT1_2))              # exact GELU (nn.GELU default)
    out_ref[...] = h.astype(out_ref.dtype)


def _norm_gelu_res_kernel(z_ref, a_ref, c_ref, res_ref, out_ref):
    cout_p = a_ref.shape[-1]
    a = a_ref[...].reshape(1, 1, 1, cout_p)
    c = c_ref[...].reshape(1, 1, 1, cout_p)
    y = z_ref[...] * a + c
    h = 0.5 * y * (1.0 + lax.erf(y * _SQRT1_2))
    out_ref[...] = ((res_ref[...].astype(jnp.float32) + h) * _RES_SCALE).astype(out_ref.dtype)


# ----------------------------------------------------------------------------- pallas wrappers

def _conv_stats(xs, wp, h, w, cout_p, vmem_limit):
    """conv3x3 (+ batch-stat accumulation) over the whole batch.  Returns z, sum, sumsq."""
    n = xs.shape[0]
    k3p = xs.shape[-1]
    per_img = 2 * ((h + 2) * w * k3p * xs.dtype.itemsize + h * w * cout_p * 4)
    bt = _pick_bt(n, per_img)

    return pl.pallas_call(
        _conv_stats_kernel,
        out_shape=(jax.ShapeDtypeStruct((n, h, w, cout_p), jnp.float32),
                   jax.ShapeDtypeStruct((1, cout_p), jnp.float32),
                   jax.ShapeDtypeStruct((1, cout_p), jnp.float32)),
        grid=(n // bt,),
        in_specs=[
            pl.BlockSpec((bt, h + 2, w, k3p), lambda i: (i, 0, 0, 0)),
            pl.BlockSpec((3, k3p, cout_p), lambda i: (0, 0, 0)),        # resident weights
        ],
        out_specs=(
            pl.BlockSpec((bt, h, w, cout_p), lambda i: (i, 0, 0, 0)),
            pl.BlockSpec((1, cout_p), lambda i: (0, 0)),                # stats accumulator
            pl.BlockSpec((1, cout_p), lambda i: (0, 0)),
        ),
        compiler_params=pltpu.CompilerParams(
            dimension_semantics=("arbitrary",),       # batch axis carries the BN stats
            vmem_limit_bytes=vmem_limit),
    )(xs, wp)


def _norm_gelu(z, a, c, res, out_dtype, vmem_limit):
    """Pure-VPU normalize + GELU (+ residual) pass; batch axis fully parallel."""
    n, h, w, cout_p = z.shape
    res_bytes = res.dtype.itemsize if res is not None else 0
    per_img = 2 * h * w * cout_p * (4 + res_bytes + jnp.dtype(out_dtype).itemsize)
    bt = _pick_bt(n, per_img)
    with_res = res is not None

    in_specs = [
        pl.BlockSpec((bt, h, w, cout_p), lambda i: (i, 0, 0, 0)),
        pl.BlockSpec((1, cout_p), lambda i: (0, 0)),
        pl.BlockSpec((1, cout_p), lambda i: (0, 0)),
    ]
    args = [z, a, c]
    if with_res:
        in_specs.append(pl.BlockSpec((bt, h, w, cout_p), lambda i: (i, 0, 0, 0)))
        args.append(res)

    return pl.pallas_call(
        _norm_gelu_res_kernel if with_res else _norm_gelu_kernel,
        out_shape=jax.ShapeDtypeStruct((n, h, w, cout_p), out_dtype),
        grid=(n // bt,),
        in_specs=in_specs,
        out_specs=pl.BlockSpec((bt, h, w, cout_p), lambda i: (i, 0, 0, 0)),
        compiler_params=pltpu.CompilerParams(
            dimension_semantics=("parallel",),         # independent per image -> megacore
            vmem_limit_bytes=vmem_limit),
    )(*args)


# ----------------------------------------------------------------------------- packing glue (XLA)

def _shift_pack(x_nhwc, cin):
    """Spatially pad and stack the 3 kx-shifted copies on the channel axis.

    (N, H, W, cin) -> (N, H+2, W, K3p) with xs[..., kx*cin + ci] = xpad[n, h, w+kx, ci],
    K3p = round_up(3*cin, 128).  The kernel then only slices along ky (major axis).
    """
    n, h, w, _ = x_nhwc.shape
    xp = jnp.pad(x_nhwc, ((0, 0), (1, 1), (1, 1), (0, 0)))
    xs = jnp.concatenate([xp[:, :, kx:kx + w, :] for kx in range(3)], axis=-1)
    k3 = 3 * cin
    k3p = _round_up(k3, _LANES)
    xs = jnp.pad(xs, ((0, 0), (0, 0), (0, 0), (0, k3p - k3)))
    return xs, k3p


def _pack_w(w_hwio, cin, cout, k3p, cout_p, dtype):
    """(3,3,cin,cout) HWIO -> (3, K3p, cout_p): tap ky on axis 0, (kx, ci) flattened on K."""
    w = w_hwio.astype(jnp.float32).reshape(3, 3 * cin, cout)     # index [ky, kx*cin+ci, co]
    wp = jnp.zeros((3, k3p, cout_p), dtype)
    return wp.at[:, :3 * cin, :cout].set(w.astype(dtype))


def _bn_fold(s, q, gamma, beta, cout, cout_p, count):
    """Fold train-mode batch stats + BN affine into per-channel a, c:  y = z*a + c."""
    mean = s[0] * (1.0 / count)
    var = jnp.maximum(q[0] * (1.0 / count) - mean * mean, 0.0)
    g = jnp.zeros((cout_p,), jnp.float32).at[:cout].set(gamma.astype(jnp.float32))
    b = jnp.zeros((cout_p,), jnp.float32).at[:cout].set(beta.astype(jnp.float32))
    a = g * lax.rsqrt(var + _BN_EPS)
    c = b - mean * a
    return a.reshape(1, cout_p), c.reshape(1, cout_p)


# ----------------------------------------------------------------------------- forward

@functools.partial(jax.jit, static_argnames=("is_res", "use_bf16"))
def residual_conv_block(x_nchw, params, is_res, use_bf16=True):
    """Forward of ResidualConvBlock. x_nchw: (N, Ci, H, W) -> (N, Co, H, W)."""
    w1, b1, g1, be1, w2, b2, g2, be2 = params
    del b1, b2   # conv bias is exactly cancelled by the following train-mode BatchNorm
    n, ci, h, w = x_nchw.shape
    co = w1.shape[-1]
    same_channels = ci == co
    cout_p = _round_up(co, _LANES)
    cdt = jnp.bfloat16 if use_bf16 else jnp.float32   # MXU operand dtype (f32 accumulate)
    vmem_limit = _vmem_limit_bytes()
    count = float(n * h * w)

    x = jnp.transpose(x_nchw, (0, 2, 3, 1)).astype(jnp.float32)          # NHWC

    # ---- stage 1: conv3x3 + BN(batch stats) + GELU
    xs1, k3p1 = _shift_pack(x, ci)
    w1p = _pack_w(w1, ci, co, k3p1, cout_p, cdt)
    z1, s1, q1 = _conv_stats(xs1.astype(cdt), w1p, h, w, cout_p, vmem_limit)
    a1, c1 = _bn_fold(s1, q1, g1, be1, co, cout_p, count)
    h1 = _norm_gelu(z1, a1, c1, None, cdt, vmem_limit)                   # (N, H, W, cout_p)

    # ---- stage 2: conv3x3 + BN(batch stats) + GELU (+ residual * 1/1.414)
    xs2, k3p2 = _shift_pack(h1[..., :co], co)
    w2p = _pack_w(w2, co, co, k3p2, cout_p, cdt)
    z2, s2, q2 = _conv_stats(xs2.astype(cdt), w2p, h, w, cout_p, vmem_limit)
    a2, c2 = _bn_fold(s2, q2, g2, be2, co, cout_p, count)

    res = None
    if is_res:
        res = jnp.pad(x, ((0, 0), (0, 0), (0, 0), (0, cout_p - ci))) if same_channels else h1
    out = _norm_gelu(z2, a2, c2, res, jnp.float32, vmem_limit)

    out = out[..., :co]                                # drop lane padding
    return jnp.transpose(out, (0, 3, 1, 2))            # back to NCHW


# ----------------------------------------------------------------------------- reference / test

def init_params(key, cin, cout):
    ks = jax.random.split(key, 8)
    w1 = jax.random.normal(ks[0], (3, 3, cin, cout), jnp.float32) * 0.2
    b1 = jax.random.normal(ks[1], (cout,), jnp.float32) * 0.1
    g1 = 1.0 + 0.1 * jax.random.normal(ks[2], (cout,), jnp.float32)
    be1 = 0.05 * jax.random.normal(ks[3], (cout,), jnp.float32)
    w2 = jax.random.normal(ks[4], (3, 3, cout, cout), jnp.float32) * 0.2
    b2 = jax.random.normal(ks[5], (cout,), jnp.float32) * 0.1
    g2 = 1.0 + 0.1 * jax.random.normal(ks[6], (cout,), jnp.float32)
    be2 = 0.05 * jax.random.normal(ks[7], (cout,), jnp.float32)
    return (w1, b1, g1, be1, w2, b2, g2, be2)


def ref_forward(x_nchw, params, is_res):
    """Pure-JAX reference (XLA conv, conv bias included) for correctness checking."""
    w1, b1, g1, be1, w2, b2, g2, be2 = params
    ci = x_nchw.shape[1]
    co = w1.shape[-1]
    x = jnp.transpose(x_nchw, (0, 2, 3, 1)).astype(jnp.float32)

    def conv(x, w, b):
        y = lax.conv_general_dilated(x, w, (1, 1), "SAME",
                                     dimension_numbers=("NHWC", "HWIO", "NHWC"))
        return y + b.reshape(1, 1, 1, -1)

    def bn_gelu(z, g, be):
        mean = z.mean(axis=(0, 1, 2), keepdims=True)
        var = ((z - mean) ** 2).mean(axis=(0, 1, 2), keepdims=True)
        y = (z - mean) / jnp.sqrt(var + _BN_EPS)
        y = y * g.reshape(1, 1, 1, -1) + be.reshape(1, 1, 1, -1)
        return 0.5 * y * (1.0 + lax.erf(y * _SQRT1_2))

    x1 = bn_gelu(conv(x, w1, b1), g1, be1)
    x2 = bn_gelu(conv(x1, w2, b2), g2, be2)
    if is_res:
        out = ((x if ci == co else x1) + x2) / 1.414
    else:
        out = x2
    return jnp.transpose(out, (0, 3, 1, 2))


if __name__ == "__main__":
    key = jax.random.PRNGKey(0)
    kx, kp1, kp2 = jax.random.split(key, 3)

    x = jax.random.normal(kx, (2, 4, 16, 16), jnp.float32)   # NCHW, small
    p1 = init_params(kp1, 4, 4)    # in == out channels
    p2 = init_params(kp2, 4, 8)    # in != out channels

    # f32 MXU path: tight tolerance against the pure-JAX reference.
    for params, is_res, co in ((p1, True, 4), (p2, False, 8), (p2, True, 8)):
        out = jax.block_until_ready(residual_conv_block(x, params, is_res=is_res,
                                                        use_bf16=False))
        ref = ref_forward(x, params, is_res)
        assert out.shape == (2, co, 16, 16)
        err = float(jnp.max(jnp.abs(out - ref)))
        assert jnp.allclose(out, ref, rtol=1e-3, atol=1e-3), err

    # bf16 MXU operands (perf default): f32 accumulation + f32 BN/GELU, looser tolerance.
    out_bf = jax.block_until_ready(residual_conv_block(x, p1, is_res=True, use_bf16=True))
    ref_bf = ref_forward(x, p1, True)
    err_bf = float(jnp.max(jnp.abs(out_bf - ref_bf)))
    assert jnp.allclose(out_bf, ref_bf, rtol=5e-2, atol=5e-2), err_bf

    print("KERNEL_OK")
</pallas_src>

<mosaic_0001>
module attributes {stable_mosaic.version = 11 : i64} {
  func.func @_conv_stats_kernel(%arg0: i32, %arg1: memref<2x18x16x128xf32, #tpu.memory_space<vmem>>, %arg2: memref<3x128x128xf32, #tpu.memory_space<vmem>>, %arg3: memref<2x16x16x128xf32, #tpu.memory_space<vmem>>, %arg4: memref<1x128xf32, #tpu.memory_space<vmem>>, %arg5: memref<1x128xf32, #tpu.memory_space<vmem>>) attributes {dimension_semantics = [#tpu.dimension_semantics<arbitrary>], iteration_bounds = array<i64: 1>, scalar_prefetch = 0 : i64, scratch_operands = 0 : i64, tpu.core_type = #tpu.core_type<tc>, window_params = [{transform_indices = @transform_0, window_bounds = array<i64: 2, 18, 16, 128>}, {pipeline_mode = #tpu.pipeline_mode<synchronous>, transform_indices = @transform_1, window_bounds = array<i64: 3, 128, 128>}, {transform_indices = @transform_2, window_bounds = array<i64: 2, 16, 16, 128>}, {pipeline_mode = #tpu.pipeline_mode<synchronous>, transform_indices = @transform_3, window_bounds = array<i64: 1, 128>}, {pipeline_mode = #tpu.pipeline_mode<synchronous>, transform_indices = @transform_4, window_bounds = array<i64: 1, 128>}]} {
    %c0_i32 = arith.constant 0 : i32
    %0 = arith.cmpi eq, %arg0, %c0_i32 : i32
    %1 = arith.extui %0 : i1 to i32
    %c0_i32_0 = arith.constant 0 : i32
    %2 = arith.cmpi ne, %1, %c0_i32_0 : i32
    scf.if %2 {
      %cst_75 = arith.constant 0.000000e+00 : f32
      %77 = vector.broadcast %cst_75 : f32 to vector<1x128xf32>
      %c0_76 = arith.constant 0 : index
      %c0_77 = arith.constant 0 : index
      %78 = vector.load %arg4[%c0_76, %c0_77] : memref<1x128xf32, #tpu.memory_space<vmem>>, vector<1x128xf32>
      tpu.vector_store %arg4[%c0_76, %c0_77], %77 {strides = array<i32>} : memref<1x128xf32, #tpu.memory_space<vmem>>, vector<1x128xf32>,
      %cst_78 = arith.constant 0.000000e+00 : f32
      %79 = vector.broadcast %cst_78 : f32 to vector<1x128xf32>
      %c0_79 = arith.constant 0 : index
      %c0_80 = arith.constant 0 : index
      %80 = vector.load %arg5[%c0_79, %c0_80] : memref<1x128xf32, #tpu.memory_space<vmem>>, vector<1x128xf32>
      tpu.vector_store %arg5[%c0_79, %c0_80], %79 {strides = array<i32>} : memref<1x128xf32, #tpu.memory_space<vmem>>, vector<1x128xf32>,
    } else {
    }
    %cst = arith.constant 0.000000e+00 : f32
    %3 = vector.broadcast %cst : f32 to vector<256x128xf32>
    %c0 = arith.constant 0 : index
    %c0_1 = arith.constant 0 : index
    %c0_2 = arith.constant 0 : index
    %c0_3 = arith.constant 0 : index
    %4 = vector.load %arg1[%c0, %c0_1, %c0_2, %c0_3] : memref<2x18x16x128xf32, #tpu.memory_space<vmem>>, vector<1x16x16x128xf32>
    %5 = vector.shape_cast %4 : vector<1x16x16x128xf32> to vector<16x16x128xf32>
    %6 = vector.shape_cast %5 : vector<16x16x128xf32> to vector<256x128xf32>
    %c0_4 = arith.constant 0 : index
    %c0_5 = arith.constant 0 : index
    %c0_6 = arith.constant 0 : index
    %7 = vector.load %arg2[%c0_4, %c0_5, %c0_6] : memref<3x128x128xf32, #tpu.memory_space<vmem>>, vector<1x128x128xf32>
    %8 = vector.shape_cast %7 : vector<1x128x128xf32> to vector<128x128xf32>
    %cst_7 = arith.constant dense<0.000000e+00> : vector<256x128xf32>
    %9 = tpu.matmul %6, %8, %cst_7 {dimension_numbers = #tpu.dot_dimension_numbers<[1], [0], [0], [1], [0, 0, 1, 1], [], []>} : vector<256x128xf32>, vector<128x128xf32>, vector<256x128xf32> -> vector<256x128xf32>
    %10 = arith.addf %3, %9 : vector<256x128xf32>
    %c0_8 = arith.constant 0 : index
    %c1 = arith.constant 1 : index
    %c0_9 = arith.constant 0 : index
    %c0_10 = arith.constant 0 : index
    %11 = vector.load %arg1[%c0_8, %c1, %c0_9, %c0_10] : memref<2x18x16x128xf32, #tpu.memory_space<vmem>>, vector<1x16x16x128xf32>
    %12 = vector.shape_cast %11 : vector<1x16x16x128xf32> to vector<16x16x128xf32>
    %13 = vector.shape_cast %12 : vector<16x16x128xf32> to vector<256x128xf32>
    %c1_11 = arith.constant 1 : index
    %c0_12 = arith.constant 0 : index
    %c0_13 = arith.constant 0 : index
    %14 = vector.load %arg2[%c1_11, %c0_12, %c0_13] : memref<3x128x128xf32, #tpu.memory_space<vmem>>, vector<1x128x128xf32>
    %15 = vector.shape_cast %14 : vector<1x128x128xf32> to vector<128x128xf32>
    %cst_14 = arith.constant dense<0.000000e+00> : vector<256x128xf32>
    %16 = tpu.matmul %13, %15, %cst_14 {dimension_numbers = #tpu.dot_dimension_numbers<[1], [0], [0], [1], [0, 0, 1, 1], [], []>} : vector<256x128xf32>, vector<128x128xf32>, vector<256x128xf32> -> vector<256x128xf32>
    %17 = arith.addf %10, %16 : vector<256x128xf32>
    %c0_15 = arith.constant 0 : index
    %c2 = arith.constant 2 : index
    %c0_16 = arith.constant 0 : index
    %c0_17 = arith.constant 0 : index
    %18 = vector.load %arg1[%c0_15, %c2, %c0_16, %c0_17] : memref<2x18x16x128xf32, #tpu.memory_space<vmem>>, vector<1x16x16x128xf32>
    %19 = vector.shape_cast %18 : vector<1x16x16x128xf32> to vector<16x16x128xf32>
    %20 = vector.shape_cast %19 : vector<16x16x128xf32> to vector<256x128xf32>
    %c2_18 = arith.constant 2 : index
    %c0_19 = arith.constant 0 : index
    %c0_20 = arith.constant 0 : index
    %21 = vector.load %arg2[%c2_18, %c0_19, %c0_20] : memref<3x128x128xf32, #tpu.memory_space<vmem>>, vector<1x128x128xf32>
    %22 = vector.shape_cast %21 : vector<1x128x128xf32> to vector<128x128xf32>
    %cst_21 = arith.constant dense<0.000000e+00> : vector<256x128xf32>
    %23 = tpu.matmul %20, %22, %cst_21 {dimension_numbers = #tpu.dot_dimension_numbers<[1], [0], [0], [1], [0, 0, 1, 1], [], []>} : vector<256x128xf32>, vector<128x128xf32>, vector<256x128xf32> -> vector<256x128xf32>
    %24 = arith.addf %17, %23 : vector<256x128xf32>
    %25 = vector.shape_cast %24 : vector<256x128xf32> to vector<16x16x128xf32>
    %c0_22 = arith.constant 0 : index
    %c0_23 = arith.constant 0 : index
    %c0_24 = arith.constant 0 : index
    %c0_25 = arith.constant 0 : index
    %26 = vector.load %arg3[%c0_22, %c0_23, %c0_24, %c0_25] : memref<2x16x16x128xf32, #tpu.memory_space<vmem>>, vector<1x16x16x128xf32>
    %27 = vector.shape_cast %26 : vector<1x16x16x128xf32> to vector<16x16x128xf32>
    %28 = vector.shape_cast %25 : vector<16x16x128xf32> to vector<1x16x16x128xf32>
    tpu.vector_store %arg3[%c0_22, %c0_23, %c0_24, %c0_25], %28 {strides = array<i32>} : memref<2x16x16x128xf32, #tpu.memory_space<vmem>>, vector<1x16x16x128xf32>,
    %c0_26 = arith.constant 0 : index
    %c0_27 = arith.constant 0 : index
    %29 = vector.load %arg4[%c0_26, %c0_27] : memref<1x128xf32, #tpu.memory_space<vmem>>, vector<1x128xf32>
    %cst_28 = arith.constant dense<0.000000e+00> : vector<128xf32>
    %30 = vector.multi_reduction <add>, %24, %cst_28 [0] : vector<256x128xf32> to vector<128xf32>
    %31 = vector.shape_cast %30 : vector<128xf32> to vector<1x128xf32>
    %32 = arith.addf %29, %31 : vector<1x128xf32>
    %c0_29 = arith.constant 0 : index
    %c0_30 = arith.constant 0 : index
    %33 = vector.load %arg4[%c0_29, %c0_30] : memref<1x128xf32, #tpu.memory_space<vmem>>, vector<1x128xf32>
    tpu.vector_store %arg4[%c0_29, %c0_30], %32 {strides = array<i32>} : memref<1x128xf32, #tpu.memory_space<vmem>>, vector<1x128xf32>,
    %c0_31 = arith.constant 0 : index
    %c0_32 = arith.constant 0 : index
    %34 = vector.load %arg5[%c0_31, %c0_32] : memref<1x128xf32, #tpu.memory_space<vmem>>, vector<1x128xf32>
    %35 = arith.mulf %24, %24 : vector<256x128xf32>
    %cst_33 = arith.constant dense<0.000000e+00> : vector<128xf32>
    %36 = vector.multi_reduction <add>, %35, %cst_33 [0] : vector<256x128xf32> to vector<128xf32>
    %37 = vector.shape_cast %36 : vector<128xf32> to vector<1x128xf32>
    %38 = arith.addf %34, %37 : vector<1x128xf32>
    %c0_34 = arith.constant 0 : index
    %c0_35 = arith.constant 0 : index
    %39 = vector.load %arg5[%c0_34, %c0_35] : memref<1x128xf32, #tpu.memory_space<vmem>>, vector<1x128xf32>
    tpu.vector_store %arg5[%c0_34, %c0_35], %38 {strides = array<i32>} : memref<1x128xf32, #tpu.memory_space<vmem>>, vector<1x128xf32>,
    %cst_36 = arith.constant 0.000000e+00 : f32
    %40 = vector.broadcast %cst_36 : f32 to vector<256x128xf32>
    %c1_37 = arith.constant 1 : index
    %c0_38 = arith.constant 0 : index
    %c0_39 = arith.constant 0 : index
    %c0_40 = arith.constant 0 : index
    %41 = vector.load %arg1[%c1_37, %c0_38, %c0_39, %c0_40] : memref<2x18x16x128xf32, #tpu.memory_space<vmem>>, vector<1x16x16x128xf32>
    %42 = vector.shape_cast %41 : vector<1x16x16x128xf32> to vector<16x16x128xf32>
    %43 = vector.shape_cast %42 : vector<16x16x128xf32> to vector<256x128xf32>
    %c0_41 = arith.constant 0 : index
    %c0_42 = arith.constant 0 : index
    %c0_43 = arith.constant 0 : index
    %44 = vector.load %arg2[%c0_41, %c0_42, %c0_43] : memref<3x128x128xf32, #tpu.memory_space<vmem>>, vector<1x128x128xf32>
    %45 = vector.shape_cast %44 : vector<1x128x128xf32> to vector<128x128xf32>
    %cst_44 = arith.constant dense<0.000000e+00> : vector<256x128xf32>
    %46 = tpu.matmul %43, %45, %cst_44 {dimension_numbers = #tpu.dot_dimension_numbers<[1], [0], [0], [1], [0, 0, 1, 1], [], []>} : vector<256x128xf32>, vector<128x128xf32>, vector<256x128xf32> -> vector<256x128xf32>
    %47 = arith.addf %40, %46 : vector<256x128xf32>
    %c1_45 = arith.constant 1 : index
    %c1_46 = arith.constant 1 : index
    %c0_47 = arith.constant 0 : index
    %c0_48 = arith.constant 0 : index
    %48 = vector.load %arg1[%c1_45, %c1_46, %c0_47, %c0_48] : memref<2x18x16x128xf32, #tpu.memory_space<vmem>>, vector<1x16x16x128xf32>
    %49 = vector.shape_cast %48 : vector<1x16x16x128xf32> to vector<16x16x128xf32>
    %50 = vector.shape_cast %49 : vector<16x16x128xf32> to vector<256x128xf32>
    %c1_49 = arith.constant 1 : index
    %c0_50 = arith.constant 0 : index
    %c0_51 = arith.constant 0 : index
    %51 = vector.load %arg2[%c1_49, %c0_50, %c0_51] : memref<3x128x128xf32, #tpu.memory_space<vmem>>, vector<1x128x128xf32>
    %52 = vector.shape_cast %51 : vector<1x128x128xf32> to vector<128x128xf32>
    %cst_52 = arith.constant dense<0.000000e+00> : vector<256x128xf32>
    %53 = tpu.matmul %50, %52, %cst_52 {dimension_numbers = #tpu.dot_dimension_numbers<[1], [0], [0], [1], [0, 0, 1, 1], [], []>} : vector<256x128xf32>, vector<128x128xf32>, vector<256x128xf32> -> vector<256x128xf32>
    %54 = arith.addf %47, %53 : vector<256x128xf32>
    %c1_53 = arith.constant 1 : index
    %c2_54 = arith.constant 2 : index
    %c0_55 = arith.constant 0 : index
    %c0_56 = arith.constant 0 : index
    %55 = vector.load %arg1[%c1_53, %c2_54, %c0_55, %c0_56] : memref<2x18x16x128xf32, #tpu.memory_space<vmem>>, vector<1x16x16x128xf32>
    %56 = vector.shape_cast %55 : vector<1x16x16x128xf32> to vector<16x16x128xf32>
    %57 = vector.shape_cast %56 : vector<16x16x128xf32> to vector<256x128xf32>
    %c2_57 = arith.constant 2 : index
    %c0_58 = arith.constant 0 : index
    %c0_59 = arith.constant 0 : index
    %58 = vector.load %arg2[%c2_57, %c0_58, %c0_59] : memref<3x128x128xf32, #tpu.memory_space<vmem>>, vector<1x128x128xf32>
    %59 = vector.shape_cast %58 : vector<1x128x128xf32> to vector<128x128xf32>
    %cst_60 = arith.constant dense<0.000000e+00> : vector<256x128xf32>
    %60 = tpu.matmul %57, %59, %cst_60 {dimension_numbers = #tpu.dot_dimension_numbers<[1], [0], [0], [1], [0, 0, 1, 1], [], []>} : vector<256x128xf32>, vector<128x128xf32>, vector<256x128xf32> -> vector<256x128xf32>
    %61 = arith.addf %54, %60 : vector<256x128xf32>
    %62 = vector.shape_cast %61 : vector<256x128xf32> to vector<16x16x128xf32>
    %c1_61 = arith.constant 1 : index
    %c0_62 = arith.constant 0 : index
    %c0_63 = arith.constant 0 : index
    %c0_64 = arith.constant 0 : index
    %63 = vector.load %arg3[%c1_61, %c0_62, %c0_63, %c0_64] : memref<2x16x16x128xf32, #tpu.memory_space<vmem>>, vector<1x16x16x128xf32>
    %64 = vector.shape_cast %63 : vector<1x16x16x128xf32> to vector<16x16x128xf32>
    %65 = vector.shape_cast %62 : vector<16x16x128xf32> to vector<1x16x16x128xf32>
    tpu.vector_store %arg3[%c1_61, %c0_62, %c0_63, %c0_64], %65 {strides = array<i32>} : memref<2x16x16x128xf32, #tpu.memory_space<vmem>>, vector<1x16x16x128xf32>,
    %c0_65 = arith.constant 0 : index
    %c0_66 = arith.constant 0 : index
    %66 = vector.load %arg4[%c0_65, %c0_66] : memref<1x128xf32, #tpu.memory_space<vmem>>, vector<1x128xf32>
    %cst_67 = arith.constant dense<0.000000e+00> : vector<128xf32>
    %67 = vector.multi_reduction <add>, %61, %cst_67 [0] : vector<256x128xf32> to vector<128xf32>
    %68 = vector.shape_cast %67 : vector<128xf32> to vector<1x128xf32>
    %69 = arith.addf %66, %68 : vector<1x128xf32>
    %c0_68 = arith.constant 0 : index
    %c0_69 = arith.constant 0 : index
    %70 = vector.load %arg4[%c0_68, %c0_69] : memref<1x128xf32, #tpu.memory_space<vmem>>, vector<1x128xf32>
    tpu.vector_store %arg4[%c0_68, %c0_69], %69 {strides = array<i32>} : memref<1x128xf32, #tpu.memory_space<vmem>>, vector<1x128xf32>,
    %c0_70 = arith.constant 0 : index
    %c0_71 = arith.constant 0 : index
    %71 = vector.load %arg5[%c0_70, %c0_71] : memref<1x128xf32, #tpu.memory_space<vmem>>, vector<1x128xf32>
    %72 = arith.mulf %61, %61 : vector<256x128xf32>
    %cst_72 = arith.constant dense<0.000000e+00> : vector<128xf32>
    %73 = vector.multi_reduction <add>, %72, %cst_72 [0] : vector<256x128xf32> to vector<128xf32>
    %74 = vector.shape_cast %73 : vector<128xf32> to vector<1x128xf32>
    %75 = arith.addf %71, %74 : vector<1x128xf32>
    %c0_73 = arith.constant 0 : index
    %c0_74 = arith.constant 0 : index
    %76 = vector.load %arg5[%c0_73, %c0_74] : memref<1x128xf32, #tpu.memory_space<vmem>>, vector<1x128xf32>
    tpu.vector_store %arg5[%c0_73, %c0_74], %75 {strides = array<i32>} : memref<1x128xf32, #tpu.memory_space<vmem>>, vector<1x128xf32>,
    return
  }
  func.func @transform_0(%arg0: i32) -> (i32, i32, i32, i32) {
    %c0_i32 = arith.constant 0 : i32
    %c0_i32_0 = arith.constant 0 : i32
    %c0_i32_1 = arith.constant 0 : i32
    %c0_i32_2 = arith.constant 0 : i32
    return %arg0, %c0_i32, %c0_i32_0, %c0_i32_1 : i32, i32, i32, i32
  }
  func.func @transform_1(%arg0: i32) -> (i32, i32, i32) {
    %c0_i32 = arith.constant 0 : i32
    %c0_i32_0 = arith.constant 0 : i32
    %c0_i32_1 = arith.constant 0 : i32
    %c0_i32_2 = arith.constant 0 : i32
    return %c0_i32, %c0_i32_0, %c0_i32_1 : i32, i32, i32
  }
  func.func @transform_2(%arg0: i32) -> (i32, i32, i32, i32) {
    %c0_i32 = arith.constant 0 : i32
    %c0_i32_0 = arith.constant 0 : i32
    %c0_i32_1 = arith.constant 0 : i32
    %c0_i32_2 = arith.constant 0 : i32
    return %arg0, %c0_i32, %c0_i32_0, %c0_i32_1 : i32, i32, i32, i32
  }
  func.func @transform_3(%arg0: i32) -> (i32, i32) {
    %c0_i32 = arith.constant 0 : i32
    %c0_i32_0 = arith.constant 0 : i32
    %c0_i32_1 = arith.constant 0 : i32
    return %c0_i32, %c0_i32_0 : i32, i32
  }
  func.func @transform_4(%arg0: i32) -> (i32, i32) {
    %c0_i32 = arith.constant 0 : i32
    %c0_i32_0 = arith.constant 0 : i32
    %c0_i32_1 = arith.constant 0 : i32
    return %c0_i32, %c0_i32_0 : i32, i32
  }
}

module attributes {stable_mosaic.version = 11 : i64} {
  func.func @_norm_gelu_kernel(%arg0: i32, %arg1: memref<2x16x16x128xf32, #tpu.memory_space<vmem>>, %arg2: memref<1x128xf32, #tpu.memory_space<vmem>>, %arg3: memref<1x128xf32, #tpu.memory_space<vmem>>, %arg4: memref<2x16x16x128xf32, #tpu.memory_space<vmem>>) attributes {dimension_semantics = [#tpu.dimension_semantics<parallel>], iteration_bounds = array<i64: 1>, scalar_prefetch = 0 : i64, scratch_operands = 0 : i64, tpu.core_type = #tpu.core_type<tc>, window_params = [{transform_indices = @transform_0, window_bounds = array<i64: 2, 16, 16, 128>}, {pipeline_mode = #tpu.pipeline_mode<synchronous>, transform_indices = @transform_1, window_bounds = array<i64: 1, 128>}, {pipeline_mode = #tpu.pipeline_mode<synchronous>, transform_indices = @transform_2, window_bounds = array<i64: 1, 128>}, {transform_indices = @transform_3, window_bounds = array<i64: 2, 16, 16, 128>}]} {
    %c0 = arith.constant 0 : index
    %c0_0 = arith.constant 0 : index
    %0 = vector.load %arg2[%c0, %c0_0] : memref<1x128xf32, #tpu.memory_space<vmem>>, vector<1x128xf32>
    %1 = vector.shape_cast %0 : vector<1x128xf32> to vector<1x1x1x128xf32>
    %c0_1 = arith.constant 0 : index
    %c0_2 = arith.constant 0 : index
    %2 = vector.load %arg3[%c0_1, %c0_2] : memref<1x128xf32, #tpu.memory_space<vmem>>, vector<1x128xf32>
    %3 = vector.shape_cast %2 : vector<1x128xf32> to vector<1x1x1x128xf32>
    %c0_3 = arith.constant 0 : index
    %c0_4 = arith.constant 0 : index
    %c0_5 = arith.constant 0 : index
    %c0_6 = arith.constant 0 : index
    %4 = vector.load %arg1[%c0_3, %c0_4, %c0_5, %c0_6] : memref<2x16x16x128xf32, #tpu.memory_space<vmem>>, vector<2x16x16x128xf32>
    %5 = vector.broadcast %1 : vector<1x1x1x128xf32> to vector<2x16x16x128xf32>
    %6 = arith.mulf %4, %5 : vector<2x16x16x128xf32>
    %7 = vector.broadcast %3 : vector<1x1x1x128xf32> to vector<2x16x16x128xf32>
    %8 = arith.addf %6, %7 : vector<2x16x16x128xf32>
    %cst = arith.constant 5.000000e-01 : f32
    %9 = vector.broadcast %cst : f32 to vector<2x16x16x128xf32>
    %10 = arith.mulf %9, %8 : vector<2x16x16x128xf32>
    %cst_7 = arith.constant 0.707106769 : f32
    %11 = vector.broadcast %cst_7 : f32 to vector<2x16x16x128xf32>
    %12 = arith.mulf %8, %11 : vector<2x16x16x128xf32>
    %13 = math.erf %12 : vector<2x16x16x128xf32>
    %cst_8 = arith.constant 1.000000e+00 : f32
    %14 = vector.broadcast %cst_8 : f32 to vector<2x16x16x128xf32>
    %15 = arith.addf %14, %13 : vector<2x16x16x128xf32>
    %16 = arith.mulf %10, %15 : vector<2x16x16x128xf32>
    %c0_9 = arith.constant 0 : index
    %c0_10 = arith.constant 0 : index
    %c0_11 = arith.constant 0 : index
    %c0_12 = arith.constant 0 : index
    %17 = vector.load %arg4[%c0_9, %c0_10, %c0_11, %c0_12] : memref<2x16x16x128xf32, #tpu.memory_space<vmem>>, vector<2x16x16x128xf32>
    tpu.vector_store %arg4[%c0_9, %c0_10, %c0_11, %c0_12], %16 {strides = array<i32>} : memref<2x16x16x128xf32, #tpu.memory_space<vmem>>, vector<2x16x16x128xf32>,
    return
  }
  func.func @transform_0(%arg0: i32) -> (i32, i32, i32, i32) {
    %c0_i32 = arith.constant 0 : i32
    %c0_i32_0 = arith.constant 0 : i32
    %c0_i32_1 = arith.constant 0 : i32
    %c0_i32_2 = arith.constant 0 : i32
    return %arg0, %c0_i32, %c0_i32_0, %c0_i32_1 : i32, i32, i32, i32
  }
  func.func @transform_1(%arg0: i32) -> (i32, i32) {
    %c0_i32 = arith.constant 0 : i32
    %c0_i32_0 = arith.constant 0 : i32
    %c0_i32_1 = arith.constant 0 : i32
    return %c0_i32, %c0_i32_0 : i32, i32
  }
  func.func @transform_2(%arg0: i32) -> (i32, i32) {
    %c0_i32 = arith.constant 0 : i32
    %c0_i32_0 = arith.constant 0 : i32
    %c0_i32_1 = arith.constant 0 : i32
    return %c0_i32, %c0_i32_0 : i32, i32
  }
  func.func @transform_3(%arg0: i32) -> (i32, i32, i32, i32) {
    %c0_i32 = arith.constant 0 : i32
    %c0_i32_0 = arith.constant 0 : i32
    %c0_i32_1 = arith.constant 0 : i32
    %c0_i32_2 = arith.constant 0 : i32
    return %arg0, %c0_i32, %c0_i32_0, %c0_i32_1 : i32, i32, i32, i32
  }
}

module attributes {stable_mosaic.version = 11 : i64} {
  func.func @_norm_gelu_res_kernel(%arg0: i32, %arg1: memref<2x16x16x128xf32, #tpu.memory_space<vmem>>, %arg2: memref<1x128xf32, #tpu.memory_space<vmem>>, %arg3: memref<1x128xf32, #tpu.memory_space<vmem>>, %arg4: memref<2x16x16x128xf32, #tpu.memory_space<vmem>>, %arg5: memref<2x16x16x128xf32, #tpu.memory_space<vmem>>) attributes {dimension_semantics = [#tpu.dimension_semantics<parallel>], iteration_bounds = array<i64: 1>, scalar_prefetch = 0 : i64, scratch_operands = 0 : i64, tpu.core_type = #tpu.core_type<tc>, window_params = [{transform_indices = @transform_0, window_bounds = array<i64: 2, 16, 16, 128>}, {pipeline_mode = #tpu.pipeline_mode<synchronous>, transform_indices = @transform_1, window_bounds = array<i64: 1, 128>}, {pipeline_mode = #tpu.pipeline_mode<synchronous>, transform_indices = @transform_2, window_bounds = array<i64: 1, 128>}, {transform_indices = @transform_3, window_bounds = array<i64: 2, 16, 16, 128>}, {transform_indices = @transform_4, window_bounds = array<i64: 2, 16, 16, 128>}]} {
    %c0 = arith.constant 0 : index
    %c0_0 = arith.constant 0 : index
    %0 = vector.load %arg2[%c0, %c0_0] : memref<1x128xf32, #tpu.memory_space<vmem>>, vector<1x128xf32>
    %1 = vector.shape_cast %0 : vector<1x128xf32> to vector<1x1x1x128xf32>
    %c0_1 = arith.constant 0 : index
    %c0_2 = arith.constant 0 : index
    %2 = vector.load %arg3[%c0_1, %c0_2] : memref<1x128xf32, #tpu.memory_space<vmem>>, vector<1x128xf32>
    %3 = vector.shape_cast %2 : vector<1x128xf32> to vector<1x1x1x128xf32>
    %c0_3 = arith.constant 0 : index
    %c0_4 = arith.constant 0 : index
    %c0_5 = arith.constant 0 : index
    %c0_6 = arith.constant 0 : index
    %4 = vector.load %arg1[%c0_3, %c0_4, %c0_5, %c0_6] : memref<2x16x16x128xf32, #tpu.memory_space<vmem>>, vector<2x16x16x128xf32>
    %5 = vector.broadcast %1 : vector<1x1x1x128xf32> to vector<2x16x16x128xf32>
    %6 = arith.mulf %4, %5 : vector<2x16x16x128xf32>
    %7 = vector.broadcast %3 : vector<1x1x1x128xf32> to vector<2x16x16x128xf32>
    %8 = arith.addf %6, %7 : vector<2x16x16x128xf32>
    %cst = arith.constant 5.000000e-01 : f32
    %9 = vector.broadcast %cst : f32 to vector<2x16x16x128xf32>
    %10 = arith.mulf %9, %8 : vector<2x16x16x128xf32>
    %cst_7 = arith.constant 0.707106769 : f32
    %11 = vector.broadcast %cst_7 : f32 to vector<2x16x16x128xf32>
    %12 = arith.mulf %8, %11 : vector<2x16x16x128xf32>
    %13 = math.erf %12 : vector<2x16x16x128xf32>
    %cst_8 = arith.constant 1.000000e+00 : f32
    %14 = vector.broadcast %cst_8 : f32 to vector<2x16x16x128xf32>
    %15 = arith.addf %14, %13 : vector<2x16x16x128xf32>
    %16 = arith.mulf %10, %15 : vector<2x16x16x128xf32>
    %c0_9 = arith.constant 0 : index
    %c0_10 = arith.constant 0 : index
    %c0_11 = arith.constant 0 : index
    %c0_12 = arith.constant 0 : index
    %17 = vector.load %arg4[%c0_9, %c0_10, %c0_11, %c0_12] : memref<2x16x16x128xf32, #tpu.memory_space<vmem>>, vector<2x16x16x128xf32>
    %18 = arith.addf %17, %16 : vector<2x16x16x128xf32>
    %cst_13 = arith.constant 0.70721358 : f32
    %19 = vector.broadcast %cst_13 : f32 to vector<2x16x16x128xf32>
    %20 = arith.mulf %18, %19 : vector<2x16x16x128xf32>
    %c0_14 = arith.constant 0 : index
    %c0_15 = arith.constant 0 : index
    %c0_16 = arith.constant 0 : index
    %c0_17 = arith.constant 0 : index
    %21 = vector.load %arg5[%c0_14, %c0_15, %c0_16, %c0_17] : memref<2x16x16x128xf32, #tpu.memory_space<vmem>>, vector<2x16x16x128xf32>
    tpu.vector_store %arg5[%c0_14, %c0_15, %c0_16, %c0_17], %20 {strides = array<i32>} : memref<2x16x16x128xf32, #tpu.memory_space<vmem>>, vector<2x16x16x128xf32>,
    return
  }
  func.func @transform_0(%arg0: i32) -> (i32, i32, i32, i32) {
    %c0_i32 = arith.constant 0 : i32
    %c0_i32_0 = arith.constant 0 : i32
    %c0_i32_1 = arith.constant 0 : i32
    %c0_i32_2 = arith.constant 0 : i32
    return %arg0, %c0_i32, %c0_i32_0, %c0_i32_1 : i32, i32, i32, i32
  }
  func.func @transform_1(%arg0: i32) -> (i32, i32) {
    %c0_i32 = arith.constant 0 : i32
    %c0_i32_0 = arith.constant 0 : i32
    %c0_i32_1 = arith.constant 0 : i32
    return %c0_i32, %c0_i32_0 : i32, i32
  }
  func.func @transform_2(%arg0: i32) -> (i32, i32) {
    %c0_i32 = arith.constant 0 : i32
    %c0_i32_0 = arith.constant 0 : i32
    %c0_i32_1 = arith.constant 0 : i32
    return %c0_i32, %c0_i32_0 : i32, i32
  }
  func.func @transform_3(%arg0: i32) -> (i32, i32, i32, i32) {
    %c0_i32 = arith.constant 0 : i32
    %c0_i32_0 = arith.constant 0 : i32
    %c0_i32_1 = arith.constant 0 : i32
    %c0_i32_2 = arith.constant 0 : i32
    return %arg0, %c0_i32, %c0_i32_0, %c0_i32_1 : i32, i32, i32, i32
  }
  func.func @transform_4(%arg0: i32) -> (i32, i32, i32, i32) {
    %c0_i32 = arith.constant 0 : i32
    %c0_i32_0 = arith.constant 0 : i32
    %c0_i32_1 = arith.constant 0 : i32
    %c0_i32_2 = arith.constant 0 : i32
    return %arg0, %c0_i32, %c0_i32_0, %c0_i32_1 : i32, i32, i32, i32
  }
}

</mosaic_0001>

<bundles_post_ra>
// kernel: residual_conv_block.5
= control target key start
LH: loop header
LB: loop body
LE: loop exit
PB: predicated region body
PF: predicated region fallthrough
CT: control target
= control target key end

     0   :  { %s1458_s0 = inlined_call_operand.vmem [shape: f32[2,16,16,128], index: 0, kind: input, shape index: {}]   ;;  %s1459_s1 = inlined_call_operand.vmem [shape: f32[1,128], index: 1, kind: input, shape index: {}]   ;;  %s1460_s2 = inlined_call_operand.vmem [shape: f32[1,128], index: 2, kind: input, shape index: {}]   ;;  %s1461_s3 = inlined_call_operand.vmem [shape: f32[2,16,16,128], index: 3, kind: output, shape index: {}]  }
   0x1   :  { %v763_v0 = vld [vmem:[%s1459_s1] ss:$0 sm:$0xff]  ;;  %v17_v4 = vld [vmem:[%s1458_s0 + $0x8] sm:$0xff]  ;;  %v18_v5 = vld [vmem:[%s1458_s0 + $0x10] sm:$0xff] }
   0x2   :  { %v768_v1 = vld [vmem:[%s1460_s2] ss:$0 sm:$0xff]  ;;  %v19_v6 = vld [vmem:[%s1458_s0 + $0x18] sm:$0xff]  ;;  %v87_v7 = vmul.f32 %v763_v0, %v17_v4  ;;  %v88_v8 = vmul.f32 %v763_v0, %v18_v5  ;;  %v21_v11 = vld [vmem:[%s1458_s0 + $0x28] sm:$0xff] }
   0x3   :  { %v16_v2 = vld [vmem:[%s1458_s0] sm:$0xff]  ;;  %v89_v9 = vmul.f32 %v763_v0, %v19_v6  ;;  %v22_v12 = vld [vmem:[%s1458_s0 + $0x30] sm:$0xff]  ;;  %v91_v15 = vmul.f32 %v763_v0, %v21_v11  ;;  %v23_v16 = vld [vmem:[%s1458_s0 + $0x38] sm:$0xff] }
   0x4   :  { %v86_v3 = vmul.f32 %v763_v0, %v16_v2  ;;  %v20_v10 = vld [vmem:[%s1458_s0 + $0x20] sm:$0xff]  ;;  %v157_v17 = vadd.f32 %v768_v1, %v87_v7  ;;  %v158_v18 = vadd.f32 %v768_v1, %v88_v8  ;;  %v92_v20 = vmul.f32 %v763_v0, %v22_v12  ;;  %v25_v30 = vld [vmem:[%s1458_s0 + $0x48] sm:$0xff]  ;;  %v26_v31 = vld [vmem:[%s1458_s0 + $0x50] sm:$0xff] }
   0x5   :  { %v90_v14 = vmul.f32 %v763_v0, %v20_v10  ;;  %v159_v19 = vadd.f32 %v768_v1, %v89_v9  ;;  %v161_v23 = vadd.f32 %v768_v1, %v91_v15  ;;  %v93_v24 = vmul.f32 %v763_v0, %v23_v16  ;;  %v24_v27 = vld [vmem:[%s1458_s0 + $0x40] sm:$0xff]  ;;  %v27_v32 = vld [vmem:[%s1458_s0 + $0x58] sm:$0xff]  ;;  %v29_v52 = vld [vmem:[%s1458_s0 + $0x68] sm:$0xff] }
   0x6   :  { %v156_v13 = vadd.f32 %v768_v1, %v86_v3  ;;  %v285_v25 = vmul.f32 0.70710677, %v157_v17  ;;  %v286_v26 = vmul.f32 0.70710677, %v158_v18  ;;  %v822_v33 = vmul.f32 0.5, %v157_v17  ;;  %v28_v42 = vld [vmem:[%s1458_s0 + $0x60] sm:$0xff] }
   0x7   :  { %v160_v22 = vadd.f32 %v768_v1, %v90_v14  ;;  %v287_v29 = vmul.f32 0.70710677, %v159_v19  ;;  %v289_v35 = vmul.f32 0.70710677, %v161_v23  ;;  %v162_v36 = vadd.f32 %v768_v1, %v92_v20  ;;  %v30_v56 = vld [vmem:[%s1458_s0 + $0x70] sm:$0xff]  ;;  %v31_v57 = vld [vmem:[%s1458_s0 + $0x78] sm:$0xff] }
   0x8   :  { %v284_v21 = vmul.f32 0.70710677, %v156_v13  ;;  %v811_v28 = vmul.f32 0.5, %v156_v13  ;;  %v163_v37 = vadd.f32 %v768_v1, %v93_v24  ;;  %v94_v38 = vmul.f32 %v763_v0, %v24_v27  ;;  %v32_v11 = vld [vmem:[%s1458_s0 + $0x80] sm:$0xff] }
   0x9   :  { %v288_v34 = vmul.f32 0.70710677, %v160_v22  ;;  %v95_v39 = vmul.f32 %v763_v0, %v25_v30  ;;  %v96_v40 = vmul.f32 %v763_v0, %v26_v31  ;;  %v97_v41 = vmul.f32 %v763_v0, %v27_v32  ;;  %v33_v30 = vld [vmem:[%s1458_s0 + $0x88] sm:$0xff] }
   0xa   :  { %610 = verf.f32 %v284_v21  ;;  %v222_v43 = vmul.f32 0.5, %v158_v18  ;;  %v223_v44 = vmul.f32 0.5, %v159_v19  ;;  %v290_v45 = vmul.f32 0.70710677, %v162_v36 }
   0xb   :  { %612 = verf.f32 %v285_v25  ;;  %v291_v46 = vmul.f32 0.70710677, %v163_v37  ;;  %v164_v47 = vadd.f32 %v768_v1, %v94_v38  ;;  %v165_v48 = vadd.f32 %v768_v1, %v95_v39 }
   0xc   :  { %614 = verf.f32 %v286_v26  ;;  %v166_v49 = vadd.f32 %v768_v1, %v96_v40  ;;  %v167_v50 = vadd.f32 %v768_v1, %v97_v41  ;;  %v98_v51 = vmul.f32 %v763_v0, %v28_v42 }
   0xd   :  { %616 = verf.f32 %v287_v29  ;;  %v224_v53 = vmul.f32 0.5, %v160_v22  ;;  %v225_v54 = vmul.f32 0.5, %v161_v23  ;;  %v292_v55 = vmul.f32 0.70710677, %v164_v47 }
   0xe   :  { %618 = verf.f32 %v288_v34  ;;  %v847_v58 = vmul.f32 0.5, %v162_v36  ;;  %v849_v59 = vmul.f32 0.5, %v163_v37  ;;  %v293_v60 = vmul.f32 0.70710677, %v165_v48  ;;  %v35_v36 = vld [vmem:[%s1458_s0 + $0x98] sm:$0xff] }
   0xf   :  { %620 = verf.f32 %v289_v35  ;;  %v294_v61 = vmul.f32 0.70710677, %v166_v49  ;;  %v295_v62 = vmul.f32 0.70710677, %v167_v50  ;;  %v852_v63 = vadd.f32 %v768_v1, %v98_v51  ;;  %v34_v35 = vld [vmem:[%s1458_s0 + $0x90] sm:$0xff] }
  0x10   :  { %622 = verf.f32 %v290_v45  ;;  %v99_v2 = vmul.f32 %v763_v0, %v29_v52  ;;  %v855_v4 = vmul.f32 0.5, %v164_v47  ;;  %v100_v5 = vmul.f32 %v763_v0, %v30_v56 }
  0x11   :  { %624 = verf.f32 %v291_v46  ;;  %v101_v6 = vmul.f32 %v763_v0, %v31_v57  ;;  %v859_v9 = vmul.f32 0.5, %v165_v48  ;;  %v296_v10 = vmul.f32 0.70710677, %v852_v63 }
  0x12   :  { %626 = verf.f32 %v292_v55  ;;  %v866_v14 = vadd.f32 %v768_v1, %v99_v2  ;;  %v869_v15 = vadd.f32 %v768_v1, %v100_v5  ;;  %v102_v24 = vmul.f32 %v763_v0, %v32_v11 }
  0x13   :  { %628 = verf.f32 %v293_v60  ;;  %v873_v19 = vadd.f32 %v768_v1, %v101_v6  ;;  %v231_v34 = vmul.f32 0.5, %v167_v50  ;;  %v104_v47 = vmul.f32 %v763_v0, %v34_v35  ;;  %v41_v35 = vld [vmem:[%s1458_s0 + $0xc8] sm:$0xff] }
  0x14   :  { %v611_v3 = vpop.eup %610  ;;  %630 = verf.f32 %v294_v61  ;;  %v297_v23 = vmul.f32 0.70710677, %v866_v14  ;;  %v298_v29 = vmul.f32 0.70710677, %v869_v15  ;;  %v105_v48 = vmul.f32 %v763_v0, %v35_v36 }
  0x15   :  { %v613_v7 = vpop.eup %612  ;;  %v412_v8 = vadd.f32 1.0, %v611_v3  ;;  %632 = verf.f32 %v295_v62  ;;  %v299_v40 = vmul.f32 0.70710677, %v873_v19 }
  0x16   :  { %v615_v12 = vpop.eup %614  ;;  %v413_v13 = vadd.f32 1.0, %v613_v7  ;;  %634 = verf.f32 %v296_v10  ;;  %v928_v60 = vadd.f32 %v768_v1, %v105_v48  ;;  %v37_v7 = vld [vmem:[%s1458_s0 + $0xa8] sm:$0xff]  ;;  %v111_v48 = vmul.f32 %v763_v0, %v41_v35 }
  0x17   :  { %v617_v16 = vpop.eup %616  ;;  %v476_v17 = vmul.f32 %v412_v8, %v811_v28  ;;  %v414_v18 = vadd.f32 1.0, %v615_v12  ;;  %v230_v28 = vmul.f32 0.5, %v166_v49  ;;  %636 = verf.f32 %v297_v23  ;;  %v36_v49 = vld [vmem:[%s1458_s0 + $0xa0] sm:$0xff]  ;;  %v39_v12 = vld [vmem:[%s1458_s0 + $0xb8] sm:$0xff] }
  0x18   :  { %v619_v20 = vpop.eup %618  ;;  %v477_v21 = vmul.f32 %v413_v13, %v822_v33  ;;  %v415_v22 = vadd.f32 1.0, %v617_v16  ;;  %638 = verf.f32 %v298_v29  ;;  %v234_v16 = vmul.f32 0.5, %v869_v15 }
  0x19   :  { %v621_v25 = vpop.eup %620  ;;  %540 = vst [vmem:[%s1461_s3] sm:$0xff] %v476_v17  ;;  %v478_v26 = vmul.f32 %v414_v18, %v222_v43  ;;  %v416_v27 = vadd.f32 1.0, %v619_v20  ;;  %v902_v43 = vadd.f32 %v768_v1, %v102_v24  ;;  %640 = verf.f32 %v299_v40 }
  0x1a   :  { %v623_v31 = vpop.eup %622  ;;  %541 = vst [vmem:[%s1461_s3 + $0x8] sm:$0xff] %v477_v21  ;;  %v479_v32 = vmul.f32 %v415_v22, %v223_v44  ;;  %v417_v33 = vadd.f32 1.0, %v621_v25  ;;  %v103_v44 = vmul.f32 %v763_v0, %v33_v30  ;;  %v107_v21 = vmul.f32 %v763_v0, %v37_v7  ;;  %v40_v22 = vld [vmem:[%s1458_s0 + $0xc0] sm:$0xff] }
  0x1b   :  { %v625_v37 = vpop.eup %624  ;;  %542 = vst [vmem:[%s1461_s3 + $0x10] sm:$0xff] %v478_v26  ;;  %v480_v38 = vmul.f32 %v416_v27, %v224_v53  ;;  %v418_v39 = vadd.f32 1.0, %v623_v31  ;;  %v232_v53 = vmul.f32 0.5, %v852_v63  ;;  %v106_v63 = vmul.f32 %v763_v0, %v36_v49 }
  0x1c   :  { %543 = vst [vmem:[%s1461_s3 + $0x18] sm:$0xff] %v479_v32  ;;  %v481_v41 = vmul.f32 %v417_v33, %v225_v54  ;;  %v419_v42 = vadd.f32 1.0, %v625_v37  ;;  %v627_v45 = vpop.eup %626  ;;  %v300_v54 = vmul.f32 0.70710677, %v902_v43  ;;  %v173_v57 = vadd.f32 %v768_v1, %v103_v44 }
  0x1d   :  { %544 = vst [vmem:[%s1461_s3 + $0x20] sm:$0xff] %v480_v38  ;;  %v482_v46 = vmul.f32 %v418_v39, %v847_v58  ;;  %v629_v50 = vpop.eup %628  ;;  %v420_v52 = vadd.f32 1.0, %v627_v45  ;;  %v925_v58 = vadd.f32 %v768_v1, %v104_v47  ;;  %v176_v20 = vadd.f32 %v768_v1, %v106_v63  ;;  %v43_v38 = vld [vmem:[%s1458_s0 + $0xd8] sm:$0xff] }
  0x1e   :  { %545 = vst [vmem:[%s1461_s3 + $0x28] sm:$0xff] %v481_v41  ;;  %v483_v51 = vmul.f32 %v419_v42, %v849_v59  ;;  %v631_v55 = vpop.eup %630  ;;  %v421_v56 = vadd.f32 1.0, %v629_v50  ;;  %642 = verf.f32 %v300_v54  ;;  %v301_v6 = vmul.f32 0.70710677, %v173_v57 }
  0x1f   :  { %546 = vst [vmem:[%s1461_s3 + $0x30] sm:$0xff] %v482_v46  ;;  %v633_v59 = vpop.eup %632  ;;  %v484_v61 = vmul.f32 %v420_v52, %v855_v4  ;;  %v422_v62 = vadd.f32 1.0, %v631_v55  ;;  %v233_v4 = vmul.f32 0.5, %v866_v14  ;;  %v302_v11 = vmul.f32 0.70710677, %v925_v58 }
  0x20   :  { %547 = vst [vmem:[%s1461_s3 + $0x38] sm:$0xff] %v483_v51  ;;  %v635_v2 = vpop.eup %634  ;;  %v485_v3 = vmul.f32 %v421_v56, %v859_v9  ;;  %v423_v5 = vadd.f32 1.0, %v633_v59  ;;  %v38_v9 = vld [vmem:[%s1458_s0 + $0xb0] sm:$0xff]  ;;  %644 = verf.f32 %v301_v6  ;;  %v303_v14 = vmul.f32 0.70710677, %v928_v60  ;;  %v44_v59 = vld [vmem:[%s1458_s0 + $0xe0] sm:$0xff] }
  0x21   :  { %548 = vst [vmem:[%s1461_s3 + $0x40] sm:$0xff] %v484_v61  ;;  %v486_v8 = vmul.f32 %v422_v62, %v230_v28  ;;  %v424_v10 = vadd.f32 1.0, %v635_v2  ;;  %v637_v17 = vpop.eup %636  ;;  %646 = verf.f32 %v302_v11  ;;  %v108_v24 = vmul.f32 %v763_v0, %v38_v9  ;;  %v45_v2 = vld [vmem:[%s1458_s0 + $0xe8] sm:$0xff] }
  0x22   :  { %549 = vst [vmem:[%s1461_s3 + $0x48] sm:$0xff] %v485_v3  ;;  %v487_v13 = vmul.f32 %v423_v5, %v231_v34  ;;  %v639_v23 = vpop.eup %638  ;;  %v425_v15 = vadd.f32 1.0, %v637_v17  ;;  %648 = verf.f32 %v303_v14  ;;  %v109_v25 = vmul.f32 %v763_v0, %v39_v12  ;;  %v46_v3 = vld [vmem:[%s1458_s0 + $0xf0] sm:$0xff]  ;;  %v48_v14 = vld [vmem:[%s1458_s0 + $0x100] sm:$0xff] }
  0x23   :  { %550 = vst [vmem:[%s1461_s3 + $0x50] sm:$0xff] %v486_v8  ;;  %v488_v18 = vmul.f32 %v424_v10, %v232_v53  ;;  %v426_v26 = vadd.f32 1.0, %v639_v23  ;;  %v235_v27 = vmul.f32 0.5, %v873_v19  ;;  %v304_v28 = vmul.f32 0.70710677, %v176_v20  ;;  %v641_v30 = vpop.eup %640  ;;  %v42_v19 = vld [vmem:[%s1458_s0 + $0xd0] sm:$0xff] }
  0x24   :  { %551 = vst [vmem:[%s1461_s3 + $0x58] sm:$0xff] %v487_v13  ;;  %v177_v29 = vadd.f32 %v768_v1, %v107_v21  ;;  %v489_v31 = vmul.f32 %v425_v15, %v233_v4  ;;  %v974_v32 = vadd.f32 %v768_v1, %v108_v24  ;;  %v977_v33 = vadd.f32 %v768_v1, %v109_v25  ;;  %v47_v10 = vld [vmem:[%s1458_s0 + $0xf8] sm:$0xff] }
  0x25   :  { %552 = vst [vmem:[%s1461_s3 + $0x60] sm:$0xff] %v488_v18  ;;  %v110_v34 = vmul.f32 %v763_v0, %v40_v22  ;;  %v490_v36 = vmul.f32 %v426_v26, %v234_v16  ;;  %v427_v37 = vadd.f32 1.0, %v641_v30  ;;  %650 = verf.f32 %v304_v28  ;;  %v49_v22 = vld [vmem:[%s1458_s0 + $0x108] sm:$0xff]  ;;  %v50_v30 = vld [vmem:[%s1458_s0 + $0x110] sm:$0xff] }
  0x26   :  { %553 = vst [vmem:[%s1461_s3 + $0x68] sm:$0xff] %v489_v31  ;;  %v236_v39 = vmul.f32 0.5, %v902_v43  ;;  %v237_v40 = vmul.f32 0.5, %v173_v57  ;;  %v305_v41 = vmul.f32 0.70710677, %v177_v29  ;;  %v112_v43 = vmul.f32 %v763_v0, %v42_v19 }
  0x27   :  { %v306_v42 = vmul.f32 0.70710677, %v974_v32  ;;  %554 = vst [vmem:[%s1461_s3 + $0x70] sm:$0xff] %v490_v36  ;;  %v491_v45 = vmul.f32 %v427_v37, %v235_v27  ;;  %v307_v46 = vmul.f32 0.70710677, %v977_v33  ;;  %v180_v47 = vadd.f32 %v768_v1, %v110_v34 }
  0x28   :  { %v643_v44 = vpop.eup %642  ;;  %652 = verf.f32 %v305_v41  ;;  %v113_v50 = vmul.f32 %v763_v0, %v43_v38  ;;  %v238_v51 = vmul.f32 0.5, %v925_v58  ;;  %v181_v53 = vadd.f32 %v768_v1, %v111_v48 }
  0x29   :  { %v428_v49 = vadd.f32 1.0, %v643_v44  ;;  %555 = vst [vmem:[%s1461_s3 + $0x78] sm:$0xff] %v491_v45  ;;  %654 = verf.f32 %v306_v42  ;;  %v308_v52 = vmul.f32 0.70710677, %v180_v47  ;;  %v1008_v56 = vadd.f32 %v768_v1, %v112_v43 }
  0x2a   :  { %v645_v54 = vpop.eup %644  ;;  %656 = verf.f32 %v307_v46  ;;  %v1011_v57 = vadd.f32 %v768_v1, %v113_v50  ;;  %v239_v58 = vmul.f32 0.5, %v928_v60  ;;  %v309_v63 = vmul.f32 0.70710677, %v181_v53 }
  0x2b   :  { %v492_v55 = vmul.f32 %v428_v49, %v236_v39  ;;  %v647_v61 = vpop.eup %646  ;;  %v429_v62 = vadd.f32 1.0, %v645_v54  ;;  %658 = verf.f32 %v308_v52  ;;  %v240_v7 = vmul.f32 0.5, %v176_v20 }
  0x2c   :  { %v649_v5 = vpop.eup %648  ;;  %v430_v6 = vadd.f32 1.0, %v647_v61  ;;  %v241_v8 = vmul.f32 0.5, %v177_v29  ;;  %v310_v60 = vmul.f32 0.70710677, %v1008_v56  ;;  %660 = verf.f32 %v309_v63 }
  0x2d   :  { %556 = vst [vmem:[%s1461_s3 + $0x80] sm:$0xff] %v492_v55  ;;  %v493_v4 = vmul.f32 %v429_v62, %v237_v40  ;;  %v431_v11 = vadd.f32 1.0, %v649_v5  ;;  %v311_v9 = vmul.f32 0.70710677, %v1011_v57  ;;  %v114_v13 = vmul.f32 %v763_v0, %v44_v59  ;;  %v52_v59 = vld [vmem:[%s1458_s0 + $0x120] sm:$0xff] }
  0x2e   :  { %v494_v12 = vmul.f32 %v430_v6, %v238_v51  ;;  %662 = verf.f32 %v310_v60  ;;  %v115_v16 = vmul.f32 %v763_v0, %v45_v2  ;;  %v116_v20 = vmul.f32 %v763_v0, %v46_v3  ;;  %v51_v51 = vld [vmem:[%s1458_s0 + $0x118] sm:$0xff] }
  0x2f   :  { %v651_v17 = vpop.eup %650  ;;  %557 = vst [vmem:[%s1461_s3 + $0x88] sm:$0xff] %v493_v4  ;;  %v495_v18 = vmul.f32 %v431_v11, %v239_v58  ;;  %664 = verf.f32 %v311_v9  ;;  %v117_v21 = vmul.f32 %v763_v0, %v47_v10  ;;  %v242_v15 = vmul.f32 0.5, %v974_v32  ;;  %v55_v4 = vld [vmem:[%s1458_s0 + $0x138] sm:$0xff] }
  0x30   :  { %558 = vst [vmem:[%s1461_s3 + $0x90] sm:$0xff] %v494_v12  ;;  %v432_v23 = vadd.f32 1.0, %v651_v17  ;;  %v184_v24 = vadd.f32 %v768_v1, %v114_v13  ;;  %v1050_v25 = vadd.f32 %v768_v1, %v115_v16  ;;  %v243_v26 = vmul.f32 0.5, %v977_v33 }
  0x31   :  { %559 = vst [vmem:[%s1461_s3 + $0x98] sm:$0xff] %v495_v18  ;;  %v1057_v27 = vadd.f32 %v768_v1, %v116_v20  ;;  %v1060_v28 = vadd.f32 %v768_v1, %v117_v21  ;;  %v118_v29 = vmul.f32 %v763_v0, %v48_v14  ;;  %v244_v34 = vmul.f32 0.5, %v180_v47  ;;  %v56_v20 = vld [vmem:[%s1458_s0 + $0x140] sm:$0xff] }
  0x32   :  { %v653_v31 = vpop.eup %652  ;;  %v496_v32 = vmul.f32 %v432_v23, %v240_v7  ;;  %v312_v35 = vmul.f32 0.70710677, %v184_v24  ;;  %v119_v36 = vmul.f32 %v763_v0, %v49_v22  ;;  %v245_v19 = vmul.f32 0.5, %v181_v53  ;;  %v53_v7 = vld [vmem:[%s1458_s0 + $0x128] sm:$0xff] }
  0x33   :  { %v655_v37 = vpop.eup %654  ;;  %v433_v33 = vadd.f32 1.0, %v653_v31  ;;  %v313_v38 = vmul.f32 0.70710677, %v1050_v25  ;;  %v314_v39 = vmul.f32 0.70710677, %v1057_v27  ;;  %v120_v44 = vmul.f32 %v763_v0, %v50_v30 }
  0x34   :  { %v657_v40 = vpop.eup %656  ;;  %560 = vst [vmem:[%s1461_s3 + $0xa0] sm:$0xff] %v496_v32  ;;  %v434_v41 = vadd.f32 1.0, %v655_v37  ;;  %666 = verf.f32 %v312_v35  ;;  %v315_v42 = vmul.f32 0.70710677, %v1060_v28  ;;  %v1075_v48 = vadd.f32 %v768_v1, %v118_v29 }
  0x35   :  { %v659_v45 = vpop.eup %658  ;;  %v497_v46 = vmul.f32 %v433_v33, %v241_v8  ;;  %v435_v47 = vadd.f32 1.0, %v657_v40  ;;  %668 = verf.f32 %v313_v38  ;;  %v1078_v50 = vadd.f32 %v768_v1, %v119_v36 }
  0x36   :  { %v498_v49 = vmul.f32 %v434_v41, %v242_v15  ;;  %v436_v43 = vadd.f32 1.0, %v659_v45  ;;  %670 = verf.f32 %v314_v39  ;;  %v661_v52 = vpop.eup %660  ;;  %v246_v54 = vmul.f32 0.5, %v1008_v56  ;;  %v57_v41 = vld [vmem:[%s1458_s0 + $0x148] sm:$0xff] }
  0x37   :  { %561 = vst [vmem:[%s1461_s3 + $0xa8] sm:$0xff] %v497_v46  ;;  %v499_v53 = vmul.f32 %v435_v47, %v243_v26  ;;  %672 = verf.f32 %v315_v42  ;;  %v316_v55 = vmul.f32 0.70710677, %v1075_v48  ;;  %v437_v58 = vadd.f32 1.0, %v661_v52  ;;  %v58_v42 = vld [vmem:[%s1458_s0 + $0x150] sm:$0xff] }
  0x38   :  { %v663_v61 = vpop.eup %662  ;;  %562 = vst [vmem:[%s1461_s3 + $0xb0] sm:$0xff] %v498_v49  ;;  %v500_v62 = vmul.f32 %v436_v43, %v244_v34  ;;  %v247_v63 = vmul.f32 0.5, %v1011_v57  ;;  %v317_v2 = vmul.f32 0.70710677, %v1078_v50  ;;  %v1100_v5 = vadd.f32 %v768_v1, %v120_v44  ;;  %v54_v57 = vld [vmem:[%s1458_s0 + $0x130] sm:$0xff]  ;;  %v59_v43 = vld [vmem:[%s1458_s0 + $0x158] sm:$0xff] }
  0x39   :  { %v665_v3 = vpop.eup %664  ;;  %563 = vst [vmem:[%s1461_s3 + $0xb8] sm:$0xff] %v499_v53  ;;  %v438_v56 = vadd.f32 1.0, %v663_v61  ;;  %674 = verf.f32 %v316_v55  ;;  %v121_v6 = vmul.f32 %v763_v0, %v51_v51  ;;  %v501_v8 = vmul.f32 %v437_v58, %v245_v19  ;;  %v60_v55 = vld [vmem:[%s1458_s0 + $0x160] sm:$0xff] }
  0x3a   :  { %564 = vst [vmem:[%s1461_s3 + $0xc0] sm:$0xff] %v500_v62  ;;  %v439_v60 = vadd.f32 1.0, %v665_v3  ;;  %676 = verf.f32 %v317_v2  ;;  %v122_v10 = vmul.f32 %v763_v0, %v52_v59  ;;  %v248_v9 = vmul.f32 0.5, %v184_v24  ;;  %v61_v59 = vld [vmem:[%s1458_s0 + $0x168] sm:$0xff] }
  0x3b   :  { %v502_v11 = vmul.f32 %v438_v56, %v246_v54  ;;  %v318_v12 = vmul.f32 0.70710677, %v1100_v5  ;;  %v1118_v13 = vadd.f32 %v768_v1, %v121_v6  ;;  %565 = vst [vmem:[%s1461_s3 + $0xc8] sm:$0xff] %v501_v8  ;;  %v123_v17 = vmul.f32 %v763_v0, %v53_v7  ;;  %v62_v8 = vld [vmem:[%s1458_s0 + $0x170] sm:$0xff] }
  0x3c   :  { %v503_v16 = vmul.f32 %v439_v60, %v247_v63  ;;  %v1124_v14 = vadd.f32 %v768_v1, %v122_v10  ;;  %v124_v18 = vmul.f32 %v763_v0, %v54_v57  ;;  %v249_v21 = vmul.f32 0.5, %v1050_v25 }
  0x3d   :  { %566 = vst [vmem:[%s1461_s3 + $0xd0] sm:$0xff] %v502_v11  ;;  %678 = verf.f32 %v318_v12  ;;  %v319_v22 = vmul.f32 0.70710677, %v1118_v13  ;;  %v125_v23 = vmul.f32 %v763_v0, %v55_v4  ;;  %v250_v24 = vmul.f32 0.5, %v1057_v27 }
  0x3e   :  { %v667_v15 = vpop.eup %666  ;;  %567 = vst [vmem:[%s1461_s3 + $0xd8] sm:$0xff] %v503_v16  ;;  %v320_v26 = vmul.f32 0.70710677, %v1124_v14  ;;  %v1143_v29 = vadd.f32 %v768_v1, %v123_v17  ;;  %v1146_v30 = vadd.f32 %v768_v1, %v124_v18  ;;  %v126_v34 = vmul.f32 %v763_v0, %v56_v20 }
  0x3f   :  { %v669_v25 = vpop.eup %668  ;;  %v440_v31 = vadd.f32 1.0, %v667_v15  ;;  %680 = verf.f32 %v319_v22  ;;  %v1149_v32 = vadd.f32 %v768_v1, %v125_v23  ;;  %v251_v27 = vmul.f32 0.5, %v1060_v28 }
  0x40   :  { %v671_v35 = vpop.eup %670  ;;  %v441_v36 = vadd.f32 1.0, %v669_v25  ;;  %682 = verf.f32 %v320_v26  ;;  %v321_v37 = vmul.f32 0.70710677, %v1143_v29  ;;  %v252_v39 = vmul.f32 0.5, %v1075_v48 }
  0x41   :  { %v673_v33 = vpop.eup %672  ;;  %v504_v19 = vmul.f32 %v440_v31, %v248_v9  ;;  %v442_v38 = vadd.f32 1.0, %v671_v35  ;;  %v322_v40 = vmul.f32 0.70710677, %v1146_v30  ;;  %v253_v45 = vmul.f32 0.5, %v1078_v50 }
  0x42   :  { %v505_v44 = vmul.f32 %v441_v36, %v249_v21  ;;  %v443_v28 = vadd.f32 1.0, %v673_v33  ;;  %684 = verf.f32 %v321_v37  ;;  %v323_v48 = vmul.f32 0.70710677, %v1149_v32  ;;  %v65_v36 = vld [vmem:[%s1458_s0 + $0x188] sm:$0xff] }
  0x43   :  { %v675_v46 = vpop.eup %674  ;;  %568 = vst [vmem:[%s1461_s3 + $0xe0] sm:$0xff] %v504_v19  ;;  %v506_v47 = vmul.f32 %v442_v38, %v250_v24  ;;  %686 = verf.f32 %v322_v40  ;;  %v1168_v49 = vadd.f32 %v768_v1, %v126_v34  ;;  %v127_v53 = vmul.f32 %v763_v0, %v57_v41  ;;  %v63_v24 = vld [vmem:[%s1458_s0 + $0x178] sm:$0xff] }
  0x44   :  { %v677_v51 = vpop.eup %676  ;;  %569 = vst [vmem:[%s1461_s3 + $0xe8] sm:$0xff] %v505_v44  ;;  %v507_v50 = vmul.f32 %v443_v28, %v251_v27  ;;  %v444_v52 = vadd.f32 1.0, %v675_v46  ;;  %v128_v54 = vmul.f32 %v763_v0, %v58_v42  ;;  %v254_v62 = vmul.f32 0.5, %v1100_v5  ;;  %v67_v28 = vld [vmem:[%s1458_s0 + $0x198] sm:$0xff] }
  0x45   :  { %570 = vst [vmem:[%s1461_s3 + $0xf0] sm:$0xff] %v506_v47  ;;  %v445_v61 = vadd.f32 1.0, %v677_v51  ;;  %688 = verf.f32 %v323_v48  ;;  %v324_v58 = vmul.f32 0.70710677, %v1168_v49  ;;  %v1193_v2 = vadd.f32 %v768_v1, %v127_v53 }
  0x46   :  { %571 = vst [vmem:[%s1461_s3 + $0xf8] sm:$0xff] %v507_v50  ;;  %v508_v63 = vmul.f32 %v444_v52, %v252_v39  ;;  %v1196_v3 = vadd.f32 %v768_v1, %v128_v54  ;;  %v129_v56 = vmul.f32 %v763_v0, %v59_v43  ;;  %v130_v5 = vmul.f32 %v763_v0, %v60_v55  ;;  %v66_v39 = vld [vmem:[%s1458_s0 + $0x190] sm:$0xff] }
  0x47   :  { %v679_v6 = vpop.eup %678  ;;  %v509_v7 = vmul.f32 %v445_v61, %v253_v45  ;;  %690 = verf.f32 %v324_v58  ;;  %v131_v57 = vmul.f32 %v763_v0, %v61_v59  ;;  %v255_v10 = vmul.f32 0.5, %v1118_v13  ;;  %v68_v59 = vld [vmem:[%s1458_s0 + $0x1a0] sm:$0xff] }
  0x48   :  { %572 = vst [vmem:[%s1461_s3 + $0x100] sm:$0xff] %v508_v63  ;;  %v446_v60 = vadd.f32 1.0, %v679_v6  ;;  %v256_v4 = vmul.f32 0.5, %v1124_v14  ;;  %v325_v11 = vmul.f32 0.70710677, %v1193_v2  ;;  %v199_v16 = vadd.f32 %v768_v1, %v129_v56 }
  0x49   :  { %v681_v9 = vpop.eup %680  ;;  %573 = vst [vmem:[%s1461_s3 + $0x108] sm:$0xff] %v509_v7  ;;  %v326_v12 = vmul.f32 0.70710677, %v1196_v3  ;;  %v1216_v17 = vadd.f32 %v768_v1, %v130_v5  ;;  %v1219_v18 = vadd.f32 %v768_v1, %v131_v57  ;;  %v132_v21 = vmul.f32 %v763_v0, %v62_v8 }
  0x4a   :  { %v683_v13 = vpop.eup %682  ;;  %v510_v20 = vmul.f32 %v446_v60, %v254_v62  ;;  %v447_v14 = vadd.f32 1.0, %v681_v9  ;;  %692 = verf.f32 %v325_v11  ;;  %v257_v23 = vmul.f32 0.5, %v1143_v29  ;;  %v64_v29 = vld [vmem:[%s1458_s0 + $0x180] sm:$0xff]  ;;  %v69_v9 = vld [vmem:[%s1458_s0 + $0x1a8] sm:$0xff] }
  0x4b   :  { %v448_v22 = vadd.f32 1.0, %v683_v13  ;;  %694 = verf.f32 %v326_v12  ;;  %v327_v15 = vmul.f32 0.70710677, %v199_v16  ;;  %v258_v31 = vmul.f32 0.5, %v1146_v30  ;;  %v70_v12 = vld [vmem:[%s1458_s0 + $0x1b0] sm:$0xff] }
  0x4c   :  { %v685_v26 = vpop.eup %684  ;;  %574 = vst [vmem:[%s1461_s3 + $0x110] sm:$0xff] %v510_v20  ;;  %v511_v25 = vmul.f32 %v447_v14, %v255_v10  ;;  %v259_v34 = vmul.f32 0.5, %v1149_v32  ;;  %v328_v35 = vmul.f32 0.70710677, %v1216_v17  ;;  %v329_v19 = vmul.f32 0.70710677, %v1219_v18 }
  0x4d   :  { %v687_v27 = vpop.eup %686  ;;  %v512_v37 = vmul.f32 %v448_v22, %v256_v4  ;;  %v449_v33 = vadd.f32 1.0, %v685_v26  ;;  %696 = verf.f32 %v327_v15  ;;  %v1243_v32 = vadd.f32 %v768_v1, %v132_v21  ;;  %v71_v15 = vld [vmem:[%s1458_s0 + $0x1b8] sm:$0xff] }
  0x4e   :  { %575 = vst [vmem:[%s1461_s3 + $0x118] sm:$0xff] %v511_v25  ;;  %v450_v30 = vadd.f32 1.0, %v687_v27  ;;  %698 = verf.f32 %v328_v35  ;;  %v133_v38 = vmul.f32 %v763_v0, %v63_v24  ;;  %v134_v42 = vmul.f32 %v763_v0, %v64_v29 }
  0x4f   :  { %v689_v40 = vpop.eup %688  ;;  %576 = vst [vmem:[%s1461_s3 + $0x120] sm:$0xff] %v512_v37  ;;  %v513_v41 = vmul.f32 %v449_v33, %v257_v23  ;;  %700 = verf.f32 %v329_v19  ;;  %v135_v44 = vmul.f32 %v763_v0, %v65_v36  ;;  %v260_v47 = vmul.f32 0.5, %v1168_v49 }
  0x50   :  { %v514_v45 = vmul.f32 %v450_v30, %v258_v31  ;;  %v451_v46 = vadd.f32 1.0, %v689_v40  ;;  %v330_v48 = vmul.f32 0.70710677, %v1243_v32  ;;  %v1263_v51 = vadd.f32 %v768_v1, %v133_v38  ;;  %v72_v31 = vld [vmem:[%s1458_s0 + $0x1c0] sm:$0xff] }
  0x51   :  { %v691_v43 = vpop.eup %690  ;;  %577 = vst [vmem:[%s1461_s3 + $0x128] sm:$0xff] %v513_v41  ;;  %v1266_v50 = vadd.f32 %v768_v1, %v134_v42  ;;  %v1269_v52 = vadd.f32 %v768_v1, %v135_v44  ;;  %v136_v53 = vmul.f32 %v763_v0, %v66_v39  ;;  %v137_v55 = vmul.f32 %v763_v0, %v67_v28  ;;  %v74_v41 = vld [vmem:[%s1458_s0 + $0x1d0] sm:$0xff] }
  0x52   :  { %578 = vst [vmem:[%s1461_s3 + $0x130] sm:$0xff] %v514_v45  ;;  %v515_v49 = vmul.f32 %v451_v46, %v259_v34  ;;  %v452_v54 = vadd.f32 1.0, %v691_v43  ;;  %702 = verf.f32 %v330_v48  ;;  %v261_v61 = vmul.f32 0.5, %v1193_v2  ;;  %v73_v34 = vld [vmem:[%s1458_s0 + $0x1c8] sm:$0xff]  ;;  %v75_v45 = vld [vmem:[%s1458_s0 + $0x1d8] sm:$0xff] }
  0x53   :  { %v262_v62 = vmul.f32 0.5, %v1196_v3  ;;  %v331_v58 = vmul.f32 0.70710677, %v1263_v51  ;;  %v332_v63 = vmul.f32 0.70710677, %v1266_v50  ;;  %v263_v7 = vmul.f32 0.5, %v199_v16 }
  0x54   :  { %v693_v56 = vpop.eup %692  ;;  %579 = vst [vmem:[%s1461_s3 + $0x138] sm:$0xff] %v515_v49  ;;  %v516_v6 = vmul.f32 %v452_v54, %v260_v47  ;;  %v333_v5 = vmul.f32 0.70710677, %v1269_v52  ;;  %v1288_v57 = vadd.f32 %v768_v1, %v136_v53  ;;  %v1291_v3 = vadd.f32 %v768_v1, %v137_v55  ;;  %v1360_v46 = vld [vmem:[%s1460_s2] ss:$0 sm:$0xff] }
  0x55   :  { %v695_v8 = vpop.eup %694  ;;  %v453_v2 = vadd.f32 1.0, %v693_v56  ;;  %704 = verf.f32 %v331_v58  ;;  %v138_v60 = vmul.f32 %v763_v0, %v68_v59  ;;  %v264_v4 = vmul.f32 0.5, %v1216_v17  ;;  %v739_v49 = vld [vmem:[%s1459_s1] ss:$0 sm:$0xff] }
  0x56   :  { %580 = vst [vmem:[%s1461_s3 + $0x140] sm:$0xff] %v516_v6  ;;  %v454_v10 = vadd.f32 1.0, %v695_v8  ;;  %706 = verf.f32 %v332_v63  ;;  %v334_v11 = vmul.f32 0.70710677, %v1288_v57  ;;  %v265_v20 = vmul.f32 0.5, %v1219_v18 }
  0x57   :  { %v697_v16 = vpop.eup %696  ;;  %v517_v13 = vmul.f32 %v453_v2, %v261_v61  ;;  %708 = verf.f32 %v333_v5  ;;  %v335_v14 = vmul.f32 0.70710677, %v1291_v3  ;;  %v1308_v23 = vadd.f32 %v768_v1, %v138_v60  ;;  %v76_v60 = vld [vmem:[%s1458_s0 + $0x1e0] sm:$0xff] }
  0x58   :  { %v699_v21 = vpop.eup %698  ;;  %v518_v17 = vmul.f32 %v454_v10, %v262_v62  ;;  %v455_v22 = vadd.f32 1.0, %v697_v16  ;;  %710 = verf.f32 %v334_v11  ;;  %v139_v26 = vmul.f32 %v763_v0, %v69_v9 }
  0x59   :  { %v701_v24 = vpop.eup %700  ;;  %581 = vst [vmem:[%s1461_s3 + $0x148] sm:$0xff] %v517_v13  ;;  %v456_v18 = vadd.f32 1.0, %v699_v21  ;;  %712 = verf.f32 %v335_v14  ;;  %v140_v25 = vmul.f32 %v763_v0, %v70_v12  ;;  %v266_v36 = vmul.f32 0.5, %v1243_v32  ;;  %v78_v13 = vld [vmem:[%s1458_s0 + $0x1f0] sm:$0xff] }
  0x5a   :  { %582 = vst [vmem:[%s1461_s3 + $0x150] sm:$0xff] %v518_v17  ;;  %v519_v35 = vmul.f32 %v455_v22, %v263_v7  ;;  %v457_v29 = vadd.f32 1.0, %v701_v24  ;;  %v336_v27 = vmul.f32 0.70710677, %v1308_v23  ;;  %v1330_v33 = vadd.f32 %v768_v1, %v139_v26  ;;  %v79_v22 = vld [vmem:[%s1458_s0 + $0x1f8] sm:$0xff] }
  0x5b   :  { %v520_v37 = vmul.f32 %v456_v18, %v264_v4  ;;  %v1333_v19 = vadd.f32 %v768_v1, %v140_v25  ;;  %v141_v30 = vmul.f32 %v763_v0, %v71_v15  ;;  %v142_v32 = vmul.f32 %v763_v0, %v72_v31 }
  0x5c   :  { %v703_v38 = vpop.eup %702  ;;  %583 = vst [vmem:[%s1461_s3 + $0x158] sm:$0xff] %v519_v35  ;;  %v521_v39 = vmul.f32 %v457_v29, %v265_v20  ;;  %714 = verf.f32 %v336_v27  ;;  %v143_v40 = vmul.f32 %v763_v0, %v73_v34  ;;  %v267_v42 = vmul.f32 0.5, %v1263_v51 }
  0x5d   :  { %584 = vst [vmem:[%s1461_s3 + $0x160] sm:$0xff] %v520_v37  ;;  %v458_v1 = vadd.f32 1.0, %v703_v38  ;;  %v268_v44 = vmul.f32 0.5, %v1266_v50  ;;  %v337_v28 = vmul.f32 0.70710677, %v1330_v33  ;;  %v1363_v47 = vadd.f32 %v1360_v46, %v141_v30 }
  0x5e   :  { %585 = vst [vmem:[%s1461_s3 + $0x168] sm:$0xff] %v521_v39  ;;  %v338_v0 = vmul.f32 0.70710677, %v1333_v19  ;;  %v1366_v48 = vadd.f32 %v1360_v46, %v142_v32  ;;  %v1369_v43 = vadd.f32 %v1360_v46, %v143_v40  ;;  %v269_v53 = vmul.f32 0.5, %v1269_v52 }
  0x5f   :  { %v705_v51 = vpop.eup %704  ;;  %v522_v50 = vmul.f32 %v458_v1, %v266_v36  ;;  %716 = verf.f32 %v337_v28  ;;  %v144_v54 = vmul.f32 %v739_v49, %v74_v41  ;;  %v339_v61 = vmul.f32 0.70710677, %v1363_v47 }
  0x60   :  { %v707_v55 = vpop.eup %706  ;;  %v459_v59 = vadd.f32 1.0, %v705_v51  ;;  %718 = verf.f32 %v338_v0  ;;  %v145_v62 = vmul.f32 %v739_v49, %v75_v45  ;;  %v270_v52 = vmul.f32 0.5, %v1288_v57 }
  0x61   :  { %v709_v58 = vpop.eup %708  ;;  %586 = vst [vmem:[%s1461_s3 + $0x170] sm:$0xff] %v522_v50  ;;  %v460_v63 = vadd.f32 1.0, %v707_v55  ;;  %v271_v56 = vmul.f32 0.5, %v1291_v3  ;;  %v340_v6 = vmul.f32 0.70710677, %v1366_v48  ;;  %720 = verf.f32 %v339_v61  ;;  %v77_v3 = vld [vmem:[%s1458_s0 + $0x1e8] sm:$0xff] }
  0x62   :  { %v711_v7 = vpop.eup %710  ;;  %v523_v5 = vmul.f32 %v459_v59, %v267_v42  ;;  %v461_v8 = vadd.f32 1.0, %v709_v58  ;;  %v341_v2 = vmul.f32 0.70710677, %v1369_v43  ;;  %v214_v57 = vadd.f32 %v1360_v46, %v144_v54 }
  0x63   :  { %v713_v10 = vpop.eup %712  ;;  %v524_v4 = vmul.f32 %v460_v63, %v268_v44  ;;  %v462_v11 = vadd.f32 1.0, %v711_v7  ;;  %722 = verf.f32 %v340_v6  ;;  %v215_v16 = vadd.f32 %v1360_v46, %v145_v62 }
  0x64   :  { %587 = vst [vmem:[%s1461_s3 + $0x178] sm:$0xff] %v523_v5  ;;  %v525_v9 = vmul.f32 %v461_v8, %v269_v53  ;;  %v463_v12 = vadd.f32 1.0, %v713_v10  ;;  %724 = verf.f32 %v341_v2  ;;  %v272_v14 = vmul.f32 0.5, %v1308_v23 }
  0x65   :  { %588 = vst [vmem:[%s1461_s3 + $0x180] sm:$0xff] %v524_v4  ;;  %v526_v20 = vmul.f32 %v462_v11, %v270_v52  ;;  %v342_v21 = vmul.f32 0.70710677, %v214_v57  ;;  %v146_v17 = vmul.f32 %v739_v49, %v76_v60  ;;  %v343_v18 = vmul.f32 0.70710677, %v215_v16 }
  0x66   :  { %v715_v15 = vpop.eup %714  ;;  %589 = vst [vmem:[%s1461_s3 + $0x188] sm:$0xff] %v525_v9  ;;  %v527_v24 = vmul.f32 %v463_v12, %v271_v56  ;;  %v147_v26 = vmul.f32 %v739_v49, %v77_v3  ;;  %v148_v31 = vmul.f32 %v739_v49, %v78_v13  ;;  %v273_v34 = vmul.f32 0.5, %v1330_v33 }
  0x67   :  { %590 = vst [vmem:[%s1461_s3 + $0x190] sm:$0xff] %v526_v20  ;;  %v464_v25 = vadd.f32 1.0, %v715_v15  ;;  %726 = verf.f32 %v342_v21  ;;  %v216_v23 = vadd.f32 %v1360_v46, %v146_v17  ;;  %v149_v29 = vmul.f32 %v739_v49, %v79_v22 }
  0x68   :  { %591 = vst [vmem:[%s1461_s3 + $0x198] sm:$0xff] %v527_v24  ;;  %728 = verf.f32 %v343_v18  ;;  %v217_v35 = vadd.f32 %v1360_v46, %v147_v26  ;;  %v274_v37 = vmul.f32 0.5, %v1333_v19  ;;  %v218_v38 = vadd.f32 %v1360_v46, %v148_v31 }
  0x69   :  { %v717_v36 = vpop.eup %716  ;;  %v528_v27 = vmul.f32 %v464_v25, %v272_v14  ;;  %v344_v30 = vmul.f32 0.70710677, %v216_v23  ;;  %v219_v41 = vadd.f32 %v1360_v46, %v149_v29  ;;  %v275_v1 = vmul.f32 0.5, %v1363_v47 }
  0x6a   :  { %v719_v39 = vpop.eup %718  ;;  %v465_v32 = vadd.f32 1.0, %v717_v36  ;;  %v345_v40 = vmul.f32 0.70710677, %v217_v35  ;;  %v346_v42 = vmul.f32 0.70710677, %v218_v38  ;;  %v276_v19 = vmul.f32 0.5, %v1366_v48 }
  0x6b   :  { %592 = vst [vmem:[%s1461_s3 + $0x1a0] sm:$0xff] %v528_v27  ;;  %v466_v33 = vadd.f32 1.0, %v719_v39  ;;  %730 = verf.f32 %v344_v30  ;;  %v721_v44 = vpop.eup %720  ;;  %v347_v45 = vmul.f32 0.70710677, %v219_v41  ;;  %v277_v46 = vmul.f32 0.5, %v1369_v43 }
  0x6c   :  { %v529_v28 = vmul.f32 %v465_v32, %v273_v34  ;;  %732 = verf.f32 %v345_v40  ;;  %v467_v50 = vadd.f32 1.0, %v721_v44  ;;  %v278_v55 = vmul.f32 0.5, %v214_v57 }
  0x6d   :  { %v723_v0 = vpop.eup %722  ;;  %v530_v51 = vmul.f32 %v466_v33, %v274_v37  ;;  %734 = verf.f32 %v346_v42  ;;  %v279_v61 = vmul.f32 0.5, %v215_v16  ;;  %v280_v56 = vmul.f32 0.5, %v216_v23 }
  0x6e   :  { %v725_v53 = vpop.eup %724  ;;  %593 = vst [vmem:[%s1461_s3 + $0x1a8] sm:$0xff] %v529_v28  ;;  %v468_v47 = vadd.f32 1.0, %v723_v0  ;;  %736 = verf.f32 %v347_v45  ;;  %v531_v48 = vmul.f32 %v467_v50, %v275_v1  ;;  %v281_v5 = vmul.f32 0.5, %v217_v35 }
  0x6f   :  { %594 = vst [vmem:[%s1461_s3 + $0x1b0] sm:$0xff] %v530_v51  ;;  %v469_v49 = vadd.f32 1.0, %v725_v53  ;;  %v282_v60 = vmul.f32 0.5, %v218_v38  ;;  %v283_v11 = vmul.f32 0.5, %v219_v41 }
  0x70   :  { %v532_v54 = vmul.f32 %v468_v47, %v276_v19  ;;  %595 = vst [vmem:[%s1461_s3 + $0x1b8] sm:$0xff] %v531_v48 }
  0x71   :  { %v727_v59 = vpop.eup %726  ;;  %v533_v43 = vmul.f32 %v469_v49, %v277_v46 }
  0x72   :  { %v729_v62 = vpop.eup %728  ;;  %596 = vst [vmem:[%s1461_s3 + $0x1c0] sm:$0xff] %v532_v54  ;;  %v470_v58 = vadd.f32 1.0, %v727_v59 }
  0x73   :  { %597 = vst [vmem:[%s1461_s3 + $0x1c8] sm:$0xff] %v533_v43  ;;  %v471_v63 = vadd.f32 1.0, %v729_v62 }
  0x74   :  { %v534_v52 = vmul.f32 %v470_v58, %v278_v55 }
  0x75   :  { %v731_v6 = vpop.eup %730  ;;  %v535_v7 = vmul.f32 %v471_v63, %v279_v61 }
  0x76   :  { %v733_v8 = vpop.eup %732  ;;  %598 = vst [vmem:[%s1461_s3 + $0x1d0] sm:$0xff] %v534_v52  ;;  %v472_v2 = vadd.f32 1.0, %v731_v6 }
  0x77   :  { %v735_v10 = vpop.eup %734  ;;  %599 = vst [vmem:[%s1461_s3 + $0x1d8] sm:$0xff] %v535_v7  ;;  %v473_v4 = vadd.f32 1.0, %v733_v8 }
  0x78   :  { %v737_v57 = vpop.eup %736  ;;  %v536_v3 = vmul.f32 %v472_v2, %v280_v56  ;;  %v474_v9 = vadd.f32 1.0, %v735_v10 }
  0x79   :  { %v537_v12 = vmul.f32 %v473_v4, %v281_v5  ;;  %v475_v16 = vadd.f32 1.0, %v737_v57 }
  0x7a   :  { %600 = vst [vmem:[%s1461_s3 + $0x1e0] sm:$0xff] %v536_v3  ;;  %v538_v13 = vmul.f32 %v474_v9, %v282_v60 }
  0x7b   :  { %601 = vst [vmem:[%s1461_s3 + $0x1e8] sm:$0xff] %v537_v12  ;;  %v539_v20 = vmul.f32 %v475_v16, %v283_v11 }
  0x7c   :  { %602 = vst [vmem:[%s1461_s3 + $0x1f0] sm:$0xff] %v538_v13 }
  0x7d   :  { %603 = vst [vmem:[%s1461_s3 + $0x1f8] sm:$0xff] %v539_v20 }

// kernel: residual_conv_block.7
= control target key start
LH: loop header
LB: loop body
LE: loop exit
PB: predicated region body
PF: predicated region fallthrough
CT: control target
= control target key end

     0   :  { %s1811_s0 = inlined_call_operand.vmem [shape: f32[2,16,16,128], index: 0, kind: input, shape index: {}]   ;;  %s1812_s1 = inlined_call_operand.vmem [shape: f32[1,128], index: 1, kind: input, shape index: {}]   ;;  %s1813_s2 = inlined_call_operand.vmem [shape: f32[1,128], index: 2, kind: input, shape index: {}]   ;;  %s1814_s3 = inlined_call_operand.vmem [shape: f32[2,16,16,128], index: 3, kind: input, shape index: {}]   ;;  %s1815_s4 = inlined_call_operand.vmem [shape: f32[2,16,16,128], index: 4, kind: output, shape index: {}]  }
   0x1   :  { %v963_v0 = vld [vmem:[%s1812_s1] ss:$0 sm:$0xff]  ;;  %v20_v4 = vld [vmem:[%s1811_s0 + $0x8] sm:$0xff]  ;;  %v21_v6 = vld [vmem:[%s1811_s0 + $0x10] sm:$0xff] }
   0x2   :  { %v968_v1 = vld [vmem:[%s1813_s2] ss:$0 sm:$0xff]  ;;  %v90_v5 = vmul.f32 %v963_v0, %v20_v4  ;;  %v22_v7 = vld [vmem:[%s1811_s0 + $0x18] sm:$0xff]  ;;  %v91_v9 = vmul.f32 %v963_v0, %v21_v6  ;;  %v24_v14 = vld [vmem:[%s1811_s0 + $0x28] sm:$0xff] }
   0x3   :  { %v19_v2 = vld [vmem:[%s1811_s0] sm:$0xff]  ;;  %v92_v10 = vmul.f32 %v963_v0, %v22_v7  ;;  %v94_v21 = vmul.f32 %v963_v0, %v24_v14  ;;  %v25_v22 = vld [vmem:[%s1811_s0 + $0x30] sm:$0xff]  ;;  %v26_v23 = vld [vmem:[%s1811_s0 + $0x38] sm:$0xff] }
   0x4   :  { %v89_v3 = vmul.f32 %v963_v0, %v19_v2  ;;  %v23_v11 = vld [vmem:[%s1811_s0 + $0x20] sm:$0xff]  ;;  %v160_v12 = vadd.f32 %v968_v1, %v90_v5  ;;  %v161_v16 = vadd.f32 %v968_v1, %v91_v9  ;;  %v28_v27 = vld [vmem:[%s1811_s0 + $0x48] sm:$0xff]  ;;  %v29_v28 = vld [vmem:[%s1811_s0 + $0x50] sm:$0xff]  ;;  %v95_v33 = vmul.f32 %v963_v0, %v25_v22 }
   0x5   :  { %v93_v13 = vmul.f32 %v963_v0, %v23_v11  ;;  %v162_v17 = vadd.f32 %v968_v1, %v92_v10  ;;  %v27_v26 = vld [vmem:[%s1811_s0 + $0x40] sm:$0xff]  ;;  %v164_v32 = vadd.f32 %v968_v1, %v94_v21  ;;  %v96_v34 = vmul.f32 %v963_v0, %v26_v23  ;;  %v30_v38 = vld [vmem:[%s1811_s0 + $0x58] sm:$0xff]  ;;  %v32_v50 = vld [vmem:[%s1811_s0 + $0x68] sm:$0xff] }
   0x6   :  { %v159_v8 = vadd.f32 %v968_v1, %v89_v3  ;;  %v288_v19 = vmul.f32 0.70710677, %v160_v12  ;;  %v1007_v24 = vmul.f32 0.5, %v160_v12  ;;  %v289_v25 = vmul.f32 0.70710677, %v161_v16  ;;  %v31_v49 = vld [vmem:[%s1811_s0 + $0x60] sm:$0xff] }
   0x7   :  { %v163_v20 = vadd.f32 %v968_v1, %v93_v13  ;;  %v1018_v29 = vmul.f32 0.5, %v161_v16  ;;  %v290_v30 = vmul.f32 0.70710677, %v162_v17  ;;  %v97_v35 = vmul.f32 %v963_v0, %v27_v26  ;;  %v33_v58 = vld [vmem:[%s1811_s0 + $0x70] sm:$0xff]  ;;  %v34_v4 = vld [vmem:[%s1811_s0 + $0x78] sm:$0xff]  ;;  %v543_v10 = vld [vmem:[%s1814_s3] sm:$0xff] }
   0x8   :  { %v287_v15 = vmul.f32 0.70710677, %v159_v8  ;;  %v997_v18 = vmul.f32 0.5, %v159_v8  ;;  %v98_v36 = vmul.f32 %v963_v0, %v28_v27  ;;  %v99_v37 = vmul.f32 %v963_v0, %v29_v28  ;;  %v544_v16 = vld [vmem:[%s1814_s3 + $0x8] sm:$0xff]  ;;  %v545_v22 = vld [vmem:[%s1814_s3 + $0x10] sm:$0xff]  ;;  %v546_v28 = vld [vmem:[%s1814_s3 + $0x18] sm:$0xff] }
   0x9   :  { %v291_v31 = vmul.f32 0.70710677, %v163_v20  ;;  %v1029_v39 = vmul.f32 0.5, %v162_v17  ;;  %v292_v40 = vmul.f32 0.70710677, %v164_v32  ;;  %v165_v41 = vadd.f32 %v968_v1, %v95_v33 }
   0xa   :  { %805 = verf.f32 %v287_v15  ;;  %v166_v42 = vadd.f32 %v968_v1, %v96_v34  ;;  %v167_v43 = vadd.f32 %v968_v1, %v97_v35  ;;  %v168_v44 = vadd.f32 %v968_v1, %v98_v36  ;;  %v547_v34 = vld [vmem:[%s1814_s3 + $0x20] sm:$0xff] }
   0xb   :  { %807 = verf.f32 %v288_v19  ;;  %v169_v45 = vadd.f32 %v968_v1, %v99_v37  ;;  %v1036_v46 = vmul.f32 0.5, %v163_v20  ;;  %v293_v47 = vmul.f32 0.70710677, %v165_v41 }
   0xc   :  { %809 = verf.f32 %v289_v25  ;;  %v100_v48 = vmul.f32 %v963_v0, %v30_v38  ;;  %v1045_v51 = vmul.f32 0.5, %v164_v32  ;;  %v1047_v52 = vmul.f32 0.5, %v165_v41 }
   0xd   :  { %811 = verf.f32 %v290_v30  ;;  %v294_v53 = vmul.f32 0.70710677, %v166_v42  ;;  %v295_v54 = vmul.f32 0.70710677, %v167_v43  ;;  %v1049_v55 = vmul.f32 0.5, %v166_v42 }
   0xe   :  { %813 = verf.f32 %v291_v31  ;;  %v1051_v56 = vmul.f32 0.5, %v167_v43  ;;  %v296_v57 = vmul.f32 0.70710677, %v168_v44  ;;  %v297_v59 = vmul.f32 0.70710677, %v169_v45  ;;  %v548_v43 = vld [vmem:[%s1814_s3 + $0x28] sm:$0xff] }
   0xf   :  { %815 = verf.f32 %v292_v40  ;;  %v170_v60 = vadd.f32 %v968_v1, %v100_v48  ;;  %v101_v61 = vmul.f32 %v963_v0, %v31_v49  ;;  %v1058_v63 = vmul.f32 0.5, %v168_v44 }
  0x10   :  { %817 = verf.f32 %v293_v47  ;;  %v1060_v2 = vmul.f32 0.5, %v169_v45  ;;  %v102_v3 = vmul.f32 %v963_v0, %v32_v50  ;;  %v103_v8 = vmul.f32 %v963_v0, %v33_v58 }
  0x11   :  { %819 = verf.f32 %v294_v53  ;;  %v298_v7 = vmul.f32 0.70710677, %v170_v60  ;;  %v171_v12 = vadd.f32 %v968_v1, %v101_v61  ;;  %v104_v19 = vmul.f32 %v963_v0, %v34_v4  ;;  %v549_v53 = vld [vmem:[%s1814_s3 + $0x30] sm:$0xff] }
  0x12   :  { %821 = verf.f32 %v295_v54  ;;  %v172_v13 = vadd.f32 %v968_v1, %v102_v3  ;;  %v1081_v25 = vmul.f32 0.5, %v170_v60  ;;  %v1088_v31 = vadd.f32 %v968_v1, %v103_v8 }
  0x13   :  { %823 = verf.f32 %v296_v57  ;;  %v299_v26 = vmul.f32 0.70710677, %v171_v12  ;;  %v1098_v44 = vmul.f32 0.5, %v171_v12  ;;  %v1112_v58 = vadd.f32 %v968_v1, %v104_v19  ;;  %v552_v12 = vld [vmem:[%s1814_s3 + $0x48] sm:$0xff] }
  0x14   :  { %v806_v62 = vpop.eup %805  ;;  %825 = verf.f32 %v297_v59  ;;  %v300_v35 = vmul.f32 0.70710677, %v172_v13  ;;  %v301_v57 = vmul.f32 0.70710677, %v1088_v31  ;;  %v236_v8 = vmul.f32 0.5, %v172_v13 }
  0x15   :  { %v808_v5 = vpop.eup %807  ;;  %v415_v6 = vadd.f32 1.0, %v806_v62  ;;  %827 = verf.f32 %v298_v7  ;;  %v550_v62 = vld [vmem:[%s1814_s3 + $0x38] sm:$0xff]  ;;  %v302_v19 = vmul.f32 0.70710677, %v1112_v58 }
  0x16   :  { %v810_v9 = vpop.eup %809  ;;  %v416_v11 = vadd.f32 1.0, %v808_v5  ;;  %829 = verf.f32 %v299_v26  ;;  %v37_v26 = vld [vmem:[%s1811_s0 + $0x90] sm:$0xff] }
  0x17   :  { %v812_v14 = vpop.eup %811  ;;  %v479_v15 = vmul.f32 %v415_v6, %v997_v18  ;;  %v417_v17 = vadd.f32 1.0, %v810_v9  ;;  %831 = verf.f32 %v300_v35  ;;  %v551_v6 = vld [vmem:[%s1814_s3 + $0x40] sm:$0xff] }
  0x18   :  { %v814_v20 = vpop.eup %813  ;;  %v480_v21 = vmul.f32 %v416_v11, %v1007_v24  ;;  %v418_v23 = vadd.f32 1.0, %v812_v14  ;;  %833 = verf.f32 %v301_v57 }
  0x19   :  { %v607_v18 = vadd.f32 %v543_v10, %v479_v15  ;;  %v481_v27 = vmul.f32 %v417_v17, %v1018_v29  ;;  %v419_v30 = vadd.f32 1.0, %v814_v20  ;;  %v816_v24 = vpop.eup %815  ;;  %835 = verf.f32 %v302_v19 }
  0x1a   :  { %v608_v32 = vadd.f32 %v544_v16, %v480_v21  ;;  %v482_v33 = vmul.f32 %v418_v23, %v1029_v39  ;;  %v420_v38 = vadd.f32 1.0, %v816_v24  ;;  %v818_v40 = vpop.eup %817  ;;  %v553_v16 = vld [vmem:[%s1814_s3 + $0x50] sm:$0xff]  ;;  %v36_v23 = vld [vmem:[%s1811_s0 + $0x88] sm:$0xff] }
  0x1b   :  { %v671_v36 = vmul.f32 0.7072136, %v607_v18  ;;  %v609_v29 = vadd.f32 %v545_v22, %v481_v27  ;;  %v483_v37 = vmul.f32 %v419_v30, %v1036_v46  ;;  %v820_v39 = vpop.eup %819  ;;  %v421_v48 = vadd.f32 1.0, %v818_v40  ;;  %v554_v22 = vld [vmem:[%s1814_s3 + $0x58] sm:$0xff]  ;;  %v39_v40 = vld [vmem:[%s1811_s0 + $0xa0] sm:$0xff] }
  0x1c   :  { %v672_v41 = vmul.f32 0.7072136, %v608_v32  ;;  %v610_v42 = vadd.f32 %v546_v28, %v482_v33  ;;  %v484_v46 = vmul.f32 %v420_v38, %v1045_v51  ;;  %v822_v49 = vpop.eup %821  ;;  %v422_v54 = vadd.f32 1.0, %v820_v39  ;;  %v38_v38 = vld [vmem:[%s1811_s0 + $0x98] sm:$0xff] }
  0x1d   :  { %735 = vst [vmem:[%s1815_s4] sm:$0xff] %v671_v36  ;;  %v673_v45 = vmul.f32 0.7072136, %v609_v29  ;;  %v611_v47 = vadd.f32 %v547_v34, %v483_v37  ;;  %v824_v59 = vpop.eup %823  ;;  %v485_v61 = vmul.f32 %v421_v48, %v1047_v52  ;;  %v423_v3 = vadd.f32 1.0, %v822_v49  ;;  %v35_v52 = vld [vmem:[%s1811_s0 + $0x80] sm:$0xff] }
  0x1e   :  { %736 = vst [vmem:[%s1815_s4 + $0x8] sm:$0xff] %v672_v41  ;;  %v674_v50 = vmul.f32 0.7072136, %v610_v42  ;;  %v612_v60 = vadd.f32 %v548_v43, %v484_v46  ;;  %v826_v4 = vpop.eup %825  ;;  %v486_v5 = vmul.f32 %v422_v54, %v1049_v55  ;;  %v424_v7 = vadd.f32 1.0, %v824_v59  ;;  %v40_v54 = vld [vmem:[%s1811_s0 + $0xa8] sm:$0xff] }
  0x1f   :  { %737 = vst [vmem:[%s1815_s4 + $0x10] sm:$0xff] %v673_v45  ;;  %v675_v51 = vmul.f32 0.7072136, %v611_v47  ;;  %v828_v9 = vpop.eup %827  ;;  %v613_v11 = vadd.f32 %v549_v53, %v485_v61  ;;  %v487_v55 = vmul.f32 %v423_v3, %v1051_v56  ;;  %v425_v14 = vadd.f32 1.0, %v826_v4  ;;  %v556_v47 = vld [vmem:[%s1814_s3 + $0x68] sm:$0xff] }
  0x20   :  { %738 = vst [vmem:[%s1815_s4 + $0x18] sm:$0xff] %v674_v50  ;;  %v676_v10 = vmul.f32 0.7072136, %v612_v60  ;;  %v614_v13 = vadd.f32 %v550_v62, %v486_v5  ;;  %v488_v15 = vmul.f32 %v424_v7, %v1058_v63  ;;  %v426_v17 = vadd.f32 1.0, %v828_v9  ;;  %v830_v18 = vpop.eup %829  ;;  %v41_v60 = vld [vmem:[%s1811_s0 + $0xb0] sm:$0xff] }
  0x21   :  { %739 = vst [vmem:[%s1815_s4 + $0x20] sm:$0xff] %v675_v51  ;;  %v677_v56 = vmul.f32 0.7072136, %v613_v11  ;;  %v615_v20 = vadd.f32 %v551_v6, %v487_v55  ;;  %v489_v21 = vmul.f32 %v425_v14, %v1060_v2  ;;  %v105_v63 = vmul.f32 %v963_v0, %v35_v52  ;;  %v832_v34 = vpop.eup %831  ;;  %v557_v5 = vld [vmem:[%s1814_s3 + $0x70] sm:$0xff]  ;;  %v43_v11 = vld [vmem:[%s1811_s0 + $0xc0] sm:$0xff]  ;;  %v44_v55 = vld [vmem:[%s1811_s0 + $0xc8] sm:$0xff] }
  0x22   :  { %740 = vst [vmem:[%s1815_s4 + $0x28] sm:$0xff] %v676_v10  ;;  %v678_v27 = vmul.f32 0.7072136, %v614_v13  ;;  %v616_v28 = vadd.f32 %v552_v12, %v488_v15  ;;  %v490_v30 = vmul.f32 %v426_v17, %v1081_v25  ;;  %v427_v32 = vadd.f32 1.0, %v830_v18  ;;  %v555_v25 = vld [vmem:[%s1814_s3 + $0x60] sm:$0xff]  ;;  %v834_v57 = vpop.eup %833  ;;  %v42_v10 = vld [vmem:[%s1811_s0 + $0xb8] sm:$0xff] }
  0x23   :  { %741 = vst [vmem:[%s1815_s4 + $0x30] sm:$0xff] %v677_v56  ;;  %v679_v2 = vmul.f32 0.7072136, %v615_v20  ;;  %v617_v24 = vadd.f32 %v553_v16, %v489_v21  ;;  %v175_v33 = vadd.f32 %v968_v1, %v105_v63  ;;  %v106_v29 = vmul.f32 %v963_v0, %v36_v23  ;;  %v836_v12 = vpop.eup %835  ;;  %v558_v21 = vld [vmem:[%s1814_s3 + $0x78] sm:$0xff] }
  0x24   :  { %742 = vst [vmem:[%s1815_s4 + $0x38] sm:$0xff] %v678_v27  ;;  %v680_v35 = vmul.f32 0.7072136, %v616_v28  ;;  %v618_v36 = vadd.f32 %v554_v22, %v490_v30  ;;  %v107_v37 = vmul.f32 %v963_v0, %v37_v26  ;;  %v491_v42 = vmul.f32 %v427_v32, %v1098_v44  ;;  %v45_v26 = vld [vmem:[%s1811_s0 + $0xd0] sm:$0xff]  ;;  %v46_v30 = vld [vmem:[%s1811_s0 + $0xd8] sm:$0xff] }
  0x25   :  { %743 = vst [vmem:[%s1815_s4 + $0x40] sm:$0xff] %v679_v2  ;;  %v681_v41 = vmul.f32 0.7072136, %v617_v24  ;;  %v428_v43 = vadd.f32 1.0, %v832_v34  ;;  %v237_v39 = vmul.f32 0.5, %v1088_v31  ;;  %v176_v48 = vadd.f32 %v968_v1, %v106_v29 }
  0x26   :  { %744 = vst [vmem:[%s1815_s4 + $0x48] sm:$0xff] %v680_v35  ;;  %v682_v45 = vmul.f32 0.7072136, %v618_v36  ;;  %v303_v46 = vmul.f32 0.70710677, %v175_v33  ;;  %v177_v49 = vadd.f32 %v968_v1, %v107_v37  ;;  %v619_v44 = vadd.f32 %v555_v25, %v491_v42 }
  0x27   :  { %745 = vst [vmem:[%s1815_s4 + $0x50] sm:$0xff] %v681_v41  ;;  %v492_v31 = vmul.f32 %v428_v43, %v236_v8  ;;  %v108_v50 = vmul.f32 %v963_v0, %v38_v38  ;;  %v109_v53 = vmul.f32 %v963_v0, %v39_v40  ;;  %v238_v59 = vmul.f32 0.5, %v1112_v58 }
  0x28   :  { %746 = vst [vmem:[%s1815_s4 + $0x58] sm:$0xff] %v682_v45  ;;  %837 = verf.f32 %v303_v46  ;;  %v304_v51 = vmul.f32 0.70710677, %v176_v48  ;;  %v683_v61 = vmul.f32 0.7072136, %v619_v44  ;;  %v429_v3 = vadd.f32 1.0, %v834_v57 }
  0x29   :  { %v620_v62 = vadd.f32 %v556_v47, %v492_v31  ;;  %v305_v4 = vmul.f32 0.70710677, %v177_v49  ;;  %v178_v6 = vadd.f32 %v968_v1, %v108_v50  ;;  %v179_v7 = vadd.f32 %v968_v1, %v109_v53  ;;  %v48_v45 = vld [vmem:[%s1811_s0 + $0xe8] sm:$0xff]  ;;  %v559_v46 = vld [vmem:[%s1814_s3 + $0x80] sm:$0xff] }
  0x2a   :  { %839 = verf.f32 %v304_v51  ;;  %v110_v58 = vmul.f32 %v963_v0, %v40_v54  ;;  %747 = vst [vmem:[%s1815_s4 + $0x60] sm:$0xff] %v683_v61  ;;  %v493_v52 = vmul.f32 %v429_v3, %v237_v39  ;;  %v111_v9 = vmul.f32 %v963_v0, %v41_v60  ;;  %v47_v39 = vld [vmem:[%s1811_s0 + $0xe0] sm:$0xff] }
  0x2b   :  { %v684_v8 = vmul.f32 0.7072136, %v620_v62  ;;  %841 = verf.f32 %v305_v4  ;;  %v239_v14 = vmul.f32 0.5, %v175_v33  ;;  %v240_v13 = vmul.f32 0.5, %v176_v48  ;;  %v561_v4 = vld [vmem:[%s1814_s3 + $0x90] sm:$0xff] }
  0x2c   :  { %v306_v15 = vmul.f32 0.70710677, %v178_v6  ;;  %v307_v16 = vmul.f32 0.70710677, %v179_v7  ;;  %v621_v17 = vadd.f32 %v557_v5, %v493_v52  ;;  %v430_v19 = vadd.f32 1.0, %v836_v12 }
  0x2d   :  { %748 = vst [vmem:[%s1815_s4 + $0x68] sm:$0xff] %v684_v8  ;;  %v180_v56 = vadd.f32 %v968_v1, %v110_v58  ;;  %v181_v20 = vadd.f32 %v968_v1, %v111_v9  ;;  %v112_v22 = vmul.f32 %v963_v0, %v42_v10  ;;  %v113_v63 = vmul.f32 %v963_v0, %v43_v11 }
  0x2e   :  { %843 = verf.f32 %v306_v15  ;;  %v114_v23 = vmul.f32 %v963_v0, %v44_v55  ;;  %v685_v18 = vmul.f32 0.7072136, %v621_v17  ;;  %v494_v27 = vmul.f32 %v430_v19, %v238_v59  ;;  %v560_v59 = vld [vmem:[%s1814_s3 + $0x88] sm:$0xff]  ;;  %v49_v17 = vld [vmem:[%s1811_s0 + $0xf0] sm:$0xff] }
  0x2f   :  { %v241_v28 = vmul.f32 0.5, %v177_v49  ;;  %845 = verf.f32 %v307_v16  ;;  %v242_v2 = vmul.f32 0.5, %v178_v6  ;;  %v308_v24 = vmul.f32 0.70710677, %v180_v56 }
  0x30   :  { %v309_v32 = vmul.f32 0.70710677, %v181_v20  ;;  %v182_v33 = vadd.f32 %v968_v1, %v112_v22  ;;  %749 = vst [vmem:[%s1815_s4 + $0x70] sm:$0xff] %v685_v18  ;;  %v622_v34 = vadd.f32 %v558_v21, %v494_v27  ;;  %v183_v35 = vadd.f32 %v968_v1, %v113_v63  ;;  %v50_v22 = vld [vmem:[%s1811_s0 + $0xf8] sm:$0xff] }
  0x31   :  { %v184_v36 = vadd.f32 %v968_v1, %v114_v23  ;;  %v115_v25 = vmul.f32 %v963_v0, %v45_v26  ;;  %v243_v37 = vmul.f32 0.5, %v179_v7  ;;  %847 = verf.f32 %v308_v24 }
  0x32   :  { %v838_v29 = vpop.eup %837  ;;  %v310_v38 = vmul.f32 0.70710677, %v182_v33  ;;  %v116_v40 = vmul.f32 %v963_v0, %v46_v30  ;;  %v686_v41 = vmul.f32 0.7072136, %v622_v34  ;;  %v1248_v43 = vmul.f32 0.5, %v180_v56 }
  0x33   :  { %v431_v42 = vadd.f32 1.0, %v838_v29  ;;  %849 = verf.f32 %v309_v32  ;;  %v1259_v48 = vmul.f32 0.5, %v181_v20  ;;  %v311_v49 = vmul.f32 0.70710677, %v183_v35  ;;  %v563_v20 = vld [vmem:[%s1814_s3 + $0xa0] sm:$0xff] }
  0x34   :  { %v840_v47 = vpop.eup %839  ;;  %851 = verf.f32 %v310_v38  ;;  %v312_v44 = vmul.f32 0.70710677, %v184_v36  ;;  %750 = vst [vmem:[%s1815_s4 + $0x78] sm:$0xff] %v686_v41  ;;  %v185_v54 = vadd.f32 %v968_v1, %v115_v25  ;;  %v1266_v57 = vadd.f32 %v968_v1, %v116_v40  ;;  %v51_v29 = vld [vmem:[%s1811_s0 + $0x100] sm:$0xff]  ;;  %v565_v40 = vld [vmem:[%s1814_s3 + $0xb0] sm:$0xff] }
  0x35   :  { %v842_v31 = vpop.eup %841  ;;  %v495_v50 = vmul.f32 %v431_v42, %v239_v14  ;;  %v432_v53 = vadd.f32 1.0, %v840_v47  ;;  %853 = verf.f32 %v311_v49  ;;  %v117_v60 = vmul.f32 %v963_v0, %v47_v39  ;;  %v566_v47 = vld [vmem:[%s1814_s3 + $0xb8] sm:$0xff] }
  0x36   :  { %v433_v51 = vadd.f32 1.0, %v842_v31  ;;  %v118_v61 = vmul.f32 %v963_v0, %v48_v45  ;;  %v246_v5 = vmul.f32 0.5, %v182_v33  ;;  %855 = verf.f32 %v312_v44 }
  0x37   :  { %v623_v62 = vadd.f32 %v559_v46, %v495_v50  ;;  %v496_v3 = vmul.f32 %v432_v53, %v240_v13  ;;  %v1276_v58 = vmul.f32 0.5, %v183_v35  ;;  %v313_v8 = vmul.f32 0.70710677, %v185_v54  ;;  %v562_v13 = vld [vmem:[%s1814_s3 + $0x98] sm:$0xff]  ;;  %v564_v35 = vld [vmem:[%s1814_s3 + $0xa8] sm:$0xff] }
  0x38   :  { %v844_v6 = vpop.eup %843  ;;  %v497_v7 = vmul.f32 %v433_v51, %v241_v28  ;;  %v314_v52 = vmul.f32 0.70710677, %v1266_v57  ;;  %v187_v12 = vadd.f32 %v968_v1, %v117_v60  ;;  %v1284_v16 = vadd.f32 %v968_v1, %v118_v61 }
  0x39   :  { %v846_v9 = vpop.eup %845  ;;  %v687_v10 = vmul.f32 0.7072136, %v623_v62  ;;  %v624_v11 = vadd.f32 %v560_v59, %v496_v3  ;;  %v434_v55 = vadd.f32 1.0, %v844_v6  ;;  %857 = verf.f32 %v313_v8  ;;  %v52_v6 = vld [vmem:[%s1811_s0 + $0x108] sm:$0xff] }
  0x3a   :  { %v625_v14 = vadd.f32 %v561_v4, %v497_v7  ;;  %v435_v15 = vadd.f32 1.0, %v846_v9  ;;  %v248_v21 = vmul.f32 0.5, %v184_v36  ;;  %859 = verf.f32 %v314_v52  ;;  %v568_v4 = vld [vmem:[%s1814_s3 + $0xc8] sm:$0xff] }
  0x3b   :  { %751 = vst [vmem:[%s1815_s4 + $0x80] sm:$0xff] %v687_v10  ;;  %v688_v19 = vmul.f32 0.7072136, %v624_v11  ;;  %v498_v56 = vmul.f32 %v434_v55, %v242_v2  ;;  %v848_v63 = vpop.eup %847  ;;  %v1298_v18 = vmul.f32 0.5, %v185_v54  ;;  %v315_v27 = vmul.f32 0.70710677, %v187_v12 }
  0x3c   :  { %v689_v23 = vmul.f32 0.7072136, %v625_v14  ;;  %v499_v26 = vmul.f32 %v435_v15, %v243_v37  ;;  %v436_v2 = vadd.f32 1.0, %v848_v63  ;;  %v316_v24 = vmul.f32 0.70710677, %v1284_v16  ;;  %v567_v54 = vld [vmem:[%s1814_s3 + $0xc0] sm:$0xff] }
  0x3d   :  { %v850_v28 = vpop.eup %849  ;;  %752 = vst [vmem:[%s1815_s4 + $0x88] sm:$0xff] %v688_v19  ;;  %v626_v30 = vadd.f32 %v562_v13, %v498_v56  ;;  %v119_v32 = vmul.f32 %v963_v0, %v49_v17  ;;  %861 = verf.f32 %v315_v27  ;;  %v120_v25 = vmul.f32 %v963_v0, %v50_v22  ;;  %v569_v13 = vld [vmem:[%s1814_s3 + $0xd0] sm:$0xff]  ;;  %v54_v19 = vld [vmem:[%s1811_s0 + $0x118] sm:$0xff] }
  0x3e   :  { %v852_v33 = vpop.eup %851  ;;  %753 = vst [vmem:[%s1815_s4 + $0x90] sm:$0xff] %v689_v23  ;;  %v627_v34 = vadd.f32 %v563_v20, %v499_v26  ;;  %v437_v36 = vadd.f32 1.0, %v850_v28  ;;  %v500_v38 = vmul.f32 %v436_v2, %v1248_v43  ;;  %863 = verf.f32 %v316_v24 }
  0x3f   :  { %v690_v37 = vmul.f32 0.7072136, %v626_v30  ;;  %v438_v41 = vadd.f32 1.0, %v852_v33  ;;  %v854_v42 = vpop.eup %853  ;;  %v1324_v46 = vadd.f32 %v968_v1, %v119_v32  ;;  %v1327_v49 = vadd.f32 %v968_v1, %v120_v25 }
  0x40   :  { %v691_v39 = vmul.f32 0.7072136, %v627_v34  ;;  %v501_v45 = vmul.f32 %v437_v36, %v1259_v48  ;;  %v856_v43 = vpop.eup %855  ;;  %v628_v44 = vadd.f32 %v564_v35, %v500_v38  ;;  %v439_v50 = vadd.f32 1.0, %v854_v42  ;;  %v571_v34 = vld [vmem:[%s1814_s3 + $0xe0] sm:$0xff] }
  0x41   :  { %754 = vst [vmem:[%s1815_s4 + $0x98] sm:$0xff] %v690_v37  ;;  %v502_v31 = vmul.f32 %v438_v41, %v246_v5  ;;  %v121_v48 = vmul.f32 %v963_v0, %v51_v29  ;;  %v440_v59 = vadd.f32 1.0, %v856_v43  ;;  %v250_v51 = vmul.f32 0.5, %v1266_v57  ;;  %v572_v37 = vld [vmem:[%s1814_s3 + $0xe8] sm:$0xff] }
  0x42   :  { %755 = vst [vmem:[%s1815_s4 + $0xa0] sm:$0xff] %v691_v39  ;;  %v629_v53 = vadd.f32 %v565_v40, %v501_v45  ;;  %v317_v60 = vmul.f32 0.70710677, %v1324_v46  ;;  %v692_v61 = vmul.f32 0.7072136, %v628_v44  ;;  %v503_v3 = vmul.f32 %v439_v50, %v1276_v58  ;;  %v56_v41 = vld [vmem:[%s1811_s0 + $0x128] sm:$0xff] }
  0x43   :  { %v630_v62 = vadd.f32 %v566_v47, %v502_v31  ;;  %v251_v5 = vmul.f32 0.5, %v187_v12  ;;  %v858_v7 = vpop.eup %857  ;;  %v504_v52 = vmul.f32 %v440_v59, %v248_v21  ;;  %v318_v57 = vmul.f32 0.70710677, %v1327_v49  ;;  %v53_v12 = vld [vmem:[%s1811_s0 + $0x110] sm:$0xff]  ;;  %v570_v21 = vld [vmem:[%s1814_s3 + $0xd8] sm:$0xff] }
  0x44   :  { %v693_v8 = vmul.f32 0.7072136, %v629_v53  ;;  %865 = verf.f32 %v317_v60  ;;  %v860_v9 = vpop.eup %859  ;;  %756 = vst [vmem:[%s1815_s4 + $0xa8] sm:$0xff] %v692_v61  ;;  %v631_v10 = vadd.f32 %v567_v54, %v503_v3  ;;  %v441_v11 = vadd.f32 1.0, %v858_v7  ;;  %v57_v47 = vld [vmem:[%s1811_s0 + $0x130] sm:$0xff] }
  0x45   :  { %v694_v58 = vmul.f32 0.7072136, %v630_v62  ;;  %v191_v55 = vadd.f32 %v968_v1, %v121_v48  ;;  %v632_v14 = vadd.f32 %v568_v4, %v504_v52  ;;  %v442_v15 = vadd.f32 1.0, %v860_v9 }
  0x46   :  { %757 = vst [vmem:[%s1815_s4 + $0xb0] sm:$0xff] %v693_v8  ;;  %867 = verf.f32 %v318_v57  ;;  %v122_v17 = vmul.f32 %v963_v0, %v52_v6  ;;  %v695_v56 = vmul.f32 0.7072136, %v631_v10  ;;  %v505_v20 = vmul.f32 %v441_v11, %v1298_v18  ;;  %v574_v10 = vld [vmem:[%s1814_s3 + $0xf8] sm:$0xff] }
  0x47   :  { %758 = vst [vmem:[%s1815_s4 + $0xb8] sm:$0xff] %v694_v58  ;;  %v252_v22 = vmul.f32 0.5, %v1284_v16  ;;  %v319_v63 = vmul.f32 0.70710677, %v191_v55  ;;  %v862_v23 = vpop.eup %861  ;;  %v696_v26 = vmul.f32 0.7072136, %v632_v14  ;;  %v506_v27 = vmul.f32 %v442_v15, %v250_v51 }
  0x48   :  { %v192_v28 = vadd.f32 %v968_v1, %v122_v17  ;;  %v123_v30 = vmul.f32 %v963_v0, %v53_v12  ;;  %v864_v2 = vpop.eup %863  ;;  %759 = vst [vmem:[%s1815_s4 + $0xc0] sm:$0xff] %v695_v56  ;;  %v633_v18 = vadd.f32 %v569_v13, %v505_v20  ;;  %v443_v24 = vadd.f32 1.0, %v862_v23  ;;  %v55_v16 = vld [vmem:[%s1811_s0 + $0x120] sm:$0xff]  ;;  %v60_v58 = vld [vmem:[%s1811_s0 + $0x148] sm:$0xff] }
  0x49   :  { %869 = verf.f32 %v319_v63  ;;  %v124_v32 = vmul.f32 %v963_v0, %v54_v19  ;;  %760 = vst [vmem:[%s1815_s4 + $0xc8] sm:$0xff] %v696_v26  ;;  %v634_v33 = vadd.f32 %v570_v21, %v506_v27  ;;  %v444_v35 = vadd.f32 1.0, %v864_v2  ;;  %v575_v26 = vld [vmem:[%s1814_s3 + $0x100] sm:$0xff] }
  0x4a   :  { %v320_v36 = vmul.f32 0.70710677, %v192_v28  ;;  %v697_v25 = vmul.f32 0.7072136, %v633_v18  ;;  %v507_v29 = vmul.f32 %v443_v24, %v251_v5  ;;  %v193_v38 = vadd.f32 %v968_v1, %v123_v30  ;;  %v573_v5 = vld [vmem:[%s1814_s3 + $0xf0] sm:$0xff] }
  0x4b   :  { %v194_v40 = vadd.f32 %v968_v1, %v124_v32  ;;  %v698_v42 = vmul.f32 0.7072136, %v634_v33  ;;  %v508_v39 = vmul.f32 %v444_v35, %v252_v22  ;;  %v125_v45 = vmul.f32 %v963_v0, %v55_v16  ;;  %v62_v32 = vld [vmem:[%s1811_s0 + $0x158] sm:$0xff]  ;;  %v63_v16 = vld [vmem:[%s1811_s0 + $0x160] sm:$0xff] }
  0x4c   :  { %871 = verf.f32 %v320_v36  ;;  %761 = vst [vmem:[%s1815_s4 + $0xd0] sm:$0xff] %v697_v25  ;;  %v635_v43 = vadd.f32 %v571_v34, %v507_v29  ;;  %v253_v44 = vmul.f32 0.5, %v1324_v46  ;;  %v254_v31 = vmul.f32 0.5, %v1327_v49  ;;  %v58_v46 = vld [vmem:[%s1811_s0 + $0x138] sm:$0xff]  ;;  %v59_v49 = vld [vmem:[%s1811_s0 + $0x140] sm:$0xff]  ;;  %v576_v29 = vld [vmem:[%s1814_s3 + $0x108] sm:$0xff] }
  0x4d   :  { %v321_v50 = vmul.f32 0.70710677, %v193_v38  ;;  %762 = vst [vmem:[%s1815_s4 + $0xd8] sm:$0xff] %v698_v42  ;;  %v636_v53 = vadd.f32 %v572_v37, %v508_v39  ;;  %v322_v54 = vmul.f32 0.70710677, %v194_v40  ;;  %v195_v59 = vadd.f32 %v968_v1, %v125_v45  ;;  %v64_v45 = vld [vmem:[%s1811_s0 + $0x168] sm:$0xff] }
  0x4e   :  { %v866_v48 = vpop.eup %865  ;;  %v126_v51 = vmul.f32 %v963_v0, %v56_v41  ;;  %v699_v60 = vmul.f32 0.7072136, %v635_v43  ;;  %v127_v62 = vmul.f32 %v963_v0, %v57_v47  ;;  %v255_v6 = vmul.f32 0.5, %v191_v55 }
  0x4f   :  { %v445_v61 = vadd.f32 1.0, %v866_v48  ;;  %873 = verf.f32 %v321_v50  ;;  %v700_v4 = vmul.f32 0.7072136, %v636_v53  ;;  %v323_v7 = vmul.f32 0.70710677, %v195_v59  ;;  %v577_v53 = vld [vmem:[%s1814_s3 + $0x110] sm:$0xff] }
  0x50   :  { %v868_v3 = vpop.eup %867  ;;  %875 = verf.f32 %v322_v54  ;;  %763 = vst [vmem:[%s1815_s4 + $0xe0] sm:$0xff] %v699_v60  ;;  %v196_v57 = vadd.f32 %v968_v1, %v126_v51  ;;  %v1426_v9 = vadd.f32 %v968_v1, %v127_v62  ;;  %v256_v11 = vmul.f32 0.5, %v192_v28  ;;  %v61_v28 = vld [vmem:[%s1811_s0 + $0x150] sm:$0xff]  ;;  %v578_v62 = vld [vmem:[%s1814_s3 + $0x118] sm:$0xff] }
  0x51   :  { %v509_v8 = vmul.f32 %v445_v61, %v253_v44  ;;  %v446_v52 = vadd.f32 1.0, %v868_v3  ;;  %764 = vst [vmem:[%s1815_s4 + $0xe8] sm:$0xff] %v700_v4  ;;  %877 = verf.f32 %v323_v7  ;;  %v128_v55 = vmul.f32 %v963_v0, %v58_v46 }
  0x52   :  { %v129_v12 = vmul.f32 %v963_v0, %v59_v49  ;;  %v257_v17 = vmul.f32 0.5, %v193_v38  ;;  %v324_v19 = vmul.f32 0.70710677, %v196_v57  ;;  %v325_v20 = vmul.f32 0.70710677, %v1426_v9 }
  0x53   :  { %v870_v14 = vpop.eup %869  ;;  %v637_v13 = vadd.f32 %v573_v5, %v509_v8  ;;  %v510_v15 = vmul.f32 %v446_v52, %v254_v31  ;;  %v198_v21 = vadd.f32 %v968_v1, %v128_v55  ;;  %v130_v22 = vmul.f32 %v963_v0, %v60_v58  ;;  %v579_v8 = vld [vmem:[%s1814_s3 + $0x120] sm:$0xff] }
  0x54   :  { %v447_v56 = vadd.f32 1.0, %v870_v14  ;;  %879 = verf.f32 %v324_v19  ;;  %v199_v27 = vadd.f32 %v968_v1, %v129_v12  ;;  %v258_v18 = vmul.f32 0.5, %v194_v40 }
  0x55   :  { %v701_v63 = vmul.f32 0.7072136, %v637_v13  ;;  %v638_v23 = vadd.f32 %v574_v10, %v510_v15  ;;  %881 = verf.f32 %v325_v20  ;;  %v326_v24 = vmul.f32 0.70710677, %v198_v21  ;;  %v1503_v13 = vld [vmem:[%s1813_s2] ss:$0 sm:$0xff] }
  0x56   :  { %v872_v30 = vpop.eup %871  ;;  %v511_v2 = vmul.f32 %v447_v56, %v255_v6  ;;  %v259_v35 = vmul.f32 0.5, %v195_v59  ;;  %v327_v36 = vmul.f32 0.70710677, %v199_v27  ;;  %v200_v37 = vadd.f32 %v968_v1, %v130_v22  ;;  %v580_v20 = vld [vmem:[%s1814_s3 + $0x128] sm:$0xff]  ;;  %v66_v22 = vld [vmem:[%s1811_s0 + $0x178] sm:$0xff] }
  0x57   :  { %765 = vst [vmem:[%s1815_s4 + $0xf0] sm:$0xff] %v701_v63  ;;  %v702_v33 = vmul.f32 0.7072136, %v638_v23  ;;  %v448_v34 = vadd.f32 1.0, %v872_v30  ;;  %883 = verf.f32 %v326_v24  ;;  %v131_v38 = vmul.f32 %v963_v0, %v61_v28  ;;  %v67_v30 = vld [vmem:[%s1811_s0 + $0x180] sm:$0xff] }
  0x58   :  { %v639_v25 = vadd.f32 %v575_v26, %v511_v2  ;;  %885 = verf.f32 %v327_v36  ;;  %v132_v42 = vmul.f32 %v963_v0, %v62_v32  ;;  %v133_v39 = vmul.f32 %v963_v0, %v63_v16  ;;  %v581_v26 = vld [vmem:[%s1814_s3 + $0x130] sm:$0xff]  ;;  %v1533_v16 = vld [vmem:[%s1812_s1] ss:$0 sm:$0xff]  ;;  %v582_v36 = vld [vmem:[%s1814_s3 + $0x138] sm:$0xff] }
  0x59   :  { %v874_v40 = vpop.eup %873  ;;  %766 = vst [vmem:[%s1815_s4 + $0xf8] sm:$0xff] %v702_v33  ;;  %v512_v41 = vmul.f32 %v448_v34, %v256_v11  ;;  %v260_v31 = vmul.f32 0.5, %v196_v57  ;;  %v328_v50 = vmul.f32 0.70710677, %v200_v37  ;;  %v1475_v59 = vadd.f32 %v968_v1, %v131_v38  ;;  %v68_v34 = vld [vmem:[%s1811_s0 + $0x188] sm:$0xff] }
  0x5a   :  { %v876_v47 = vpop.eup %875  ;;  %v703_v43 = vmul.f32 0.7072136, %v639_v25  ;;  %v449_v44 = vadd.f32 1.0, %v874_v40  ;;  %v1478_v51 = vadd.f32 %v968_v1, %v132_v42  ;;  %v1487_v46 = vadd.f32 %v968_v1, %v133_v39  ;;  %v583_v40 = vld [vmem:[%s1814_s3 + $0x140] sm:$0xff] }
  0x5b   :  { %v640_v48 = vadd.f32 %v576_v29, %v512_v41  ;;  %v450_v54 = vadd.f32 1.0, %v876_v47  ;;  %v878_v60 = vpop.eup %877  ;;  %887 = verf.f32 %v328_v50  ;;  %v134_v49 = vmul.f32 %v963_v0, %v64_v45 }
  0x5c   :  { %767 = vst [vmem:[%s1815_s4 + $0x100] sm:$0xff] %v703_v43  ;;  %v513_v61 = vmul.f32 %v449_v44, %v257_v17  ;;  %v451_v5 = vadd.f32 1.0, %v878_v60  ;;  %v261_v6 = vmul.f32 0.5, %v1426_v9  ;;  %v262_v52 = vmul.f32 0.5, %v198_v21  ;;  %v65_v17 = vld [vmem:[%s1811_s0 + $0x170] sm:$0xff]  ;;  %v70_v60 = vld [vmem:[%s1811_s0 + $0x198] sm:$0xff] }
  0x5d   :  { %v704_v3 = vmul.f32 0.7072136, %v640_v48  ;;  %v514_v4 = vmul.f32 %v450_v54, %v258_v18  ;;  %v329_v57 = vmul.f32 0.70710677, %v1475_v59  ;;  %v330_v58 = vmul.f32 0.70710677, %v1478_v51 }
  0x5e   :  { %v641_v7 = vadd.f32 %v577_v53, %v513_v61  ;;  %v880_v10 = vpop.eup %879  ;;  %v515_v1 = vmul.f32 %v451_v5, %v259_v35  ;;  %v263_v11 = vmul.f32 0.5, %v199_v27  ;;  %v331_v9 = vmul.f32 0.70710677, %v1487_v46  ;;  %v69_v54 = vld [vmem:[%s1811_s0 + $0x190] sm:$0xff] }
  0x5f   :  { %768 = vst [vmem:[%s1815_s4 + $0x108] sm:$0xff] %v704_v3  ;;  %v642_v0 = vadd.f32 %v578_v62, %v514_v4  ;;  %v882_v55 = vpop.eup %881  ;;  %v452_v14 = vadd.f32 1.0, %v880_v10  ;;  %889 = verf.f32 %v329_v57  ;;  %v1506_v15 = vadd.f32 %v1503_v13, %v134_v49  ;;  %v584_v62 = vld [vmem:[%s1814_s3 + $0x148] sm:$0xff] }
  0x60   :  { %v705_v12 = vmul.f32 0.7072136, %v641_v7  ;;  %v643_v56 = vadd.f32 %v579_v8, %v515_v1  ;;  %v453_v21 = vadd.f32 1.0, %v882_v55  ;;  %891 = verf.f32 %v330_v58  ;;  %v585_v1 = vld [vmem:[%s1814_s3 + $0x150] sm:$0xff] }
  0x61   :  { %v706_v19 = vmul.f32 0.7072136, %v642_v0  ;;  %v884_v63 = vpop.eup %883  ;;  %v516_v23 = vmul.f32 %v452_v14, %v260_v31  ;;  %v264_v27 = vmul.f32 0.5, %v200_v37  ;;  %893 = verf.f32 %v331_v9  ;;  %v71_v9 = vld [vmem:[%s1811_s0 + $0x1a0] sm:$0xff] }
  0x62   :  { %769 = vst [vmem:[%s1815_s4 + $0x110] sm:$0xff] %v705_v12  ;;  %v332_v28 = vmul.f32 0.70710677, %v1506_v15  ;;  %v886_v2 = vpop.eup %885  ;;  %v707_v18 = vmul.f32 0.7072136, %v643_v56  ;;  %v517_v24 = vmul.f32 %v453_v21, %v261_v6  ;;  %v454_v32 = vadd.f32 1.0, %v884_v63 }
  0x63   :  { %770 = vst [vmem:[%s1815_s4 + $0x118] sm:$0xff] %v706_v19  ;;  %v135_v33 = vmul.f32 %v1533_v16, %v65_v17  ;;  %v644_v35 = vadd.f32 %v580_v20, %v516_v23  ;;  %v455_v25 = vadd.f32 1.0, %v886_v2  ;;  %v136_v29 = vmul.f32 %v1533_v16, %v66_v22 }
  0x64   :  { %895 = verf.f32 %v332_v28  ;;  %771 = vst [vmem:[%s1815_s4 + $0x120] sm:$0xff] %v707_v18  ;;  %v645_v37 = vadd.f32 %v581_v26, %v517_v24  ;;  %v518_v38 = vmul.f32 %v454_v32, %v262_v52  ;;  %v137_v42 = vmul.f32 %v1533_v16, %v67_v30  ;;  %v587_v26 = vld [vmem:[%s1814_s3 + $0x160] sm:$0xff]  ;;  %v72_v18 = vld [vmem:[%s1811_s0 + $0x1a8] sm:$0xff] }
  0x65   :  { %v205_v41 = vadd.f32 %v1503_v13, %v135_v33  ;;  %v888_v39 = vpop.eup %887  ;;  %v708_v45 = vmul.f32 0.7072136, %v644_v35  ;;  %v519_v47 = vmul.f32 %v455_v25, %v263_v11  ;;  %v206_v43 = vadd.f32 %v1503_v13, %v136_v29  ;;  %v588_v32 = vld [vmem:[%s1814_s3 + $0x168] sm:$0xff] }
  0x66   :  { %v138_v44 = vmul.f32 %v1533_v16, %v68_v34  ;;  %v709_v31 = vmul.f32 0.7072136, %v645_v37  ;;  %v646_v50 = vadd.f32 %v582_v36, %v518_v38  ;;  %v456_v48 = vadd.f32 1.0, %v888_v39  ;;  %v73_v36 = vld [vmem:[%s1811_s0 + $0x1b0] sm:$0xff] }
  0x67   :  { %v265_v53 = vmul.f32 0.5, %v1475_v59  ;;  %772 = vst [vmem:[%s1815_s4 + $0x128] sm:$0xff] %v708_v45  ;;  %v647_v61 = vadd.f32 %v583_v40, %v519_v47  ;;  %v266_v49 = vmul.f32 0.5, %v1478_v51  ;;  %v333_v59 = vmul.f32 0.70710677, %v205_v41  ;;  %v74_v40 = vld [vmem:[%s1811_s0 + $0x1b8] sm:$0xff] }
  0x68   :  { %v334_v3 = vmul.f32 0.70710677, %v206_v43  ;;  %773 = vst [vmem:[%s1815_s4 + $0x130] sm:$0xff] %v709_v31  ;;  %v710_v4 = vmul.f32 0.7072136, %v646_v50  ;;  %v520_v5 = vmul.f32 %v456_v48, %v264_v27  ;;  %v207_v6 = vadd.f32 %v1503_v13, %v137_v42  ;;  %v75_v45 = vld [vmem:[%s1811_s0 + $0x1c0] sm:$0xff] }
  0x69   :  { %v1572_v7 = vadd.f32 %v1503_v13, %v138_v44  ;;  %v890_v8 = vpop.eup %889  ;;  %v711_v52 = vmul.f32 0.7072136, %v647_v61  ;;  %897 = verf.f32 %v333_v59  ;;  %v139_v57 = vmul.f32 %v1533_v16, %v69_v54 }
  0x6a   :  { %v140_v51 = vmul.f32 %v1533_v16, %v70_v60  ;;  %v892_v58 = vpop.eup %891  ;;  %774 = vst [vmem:[%s1815_s4 + $0x138] sm:$0xff] %v710_v4  ;;  %v648_v10 = vadd.f32 %v584_v62, %v520_v5  ;;  %v457_v0 = vadd.f32 1.0, %v890_v8  ;;  %v267_v11 = vmul.f32 0.5, %v1487_v46  ;;  %v586_v46 = vld [vmem:[%s1814_s3 + $0x158] sm:$0xff]  ;;  %v589_v4 = vld [vmem:[%s1814_s3 + $0x170] sm:$0xff] }
  0x6b   :  { %899 = verf.f32 %v334_v3  ;;  %v894_v55 = vpop.eup %893  ;;  %775 = vst [vmem:[%s1815_s4 + $0x140] sm:$0xff] %v711_v52  ;;  %v458_v12 = vadd.f32 1.0, %v892_v58  ;;  %v268_v14 = vmul.f32 0.5, %v1506_v15  ;;  %v335_v17 = vmul.f32 0.70710677, %v207_v6  ;;  %v76_v3 = vld [vmem:[%s1811_s0 + $0x1c8] sm:$0xff] }
  0x6c   :  { %v336_v19 = vmul.f32 0.70710677, %v1572_v7  ;;  %v712_v56 = vmul.f32 0.7072136, %v648_v10  ;;  %v521_v20 = vmul.f32 %v457_v0, %v265_v53  ;;  %v459_v21 = vadd.f32 1.0, %v894_v55 }
  0x6d   :  { %v209_v22 = vadd.f32 %v1503_v13, %v139_v57  ;;  %v522_v23 = vmul.f32 %v458_v12, %v266_v49  ;;  %901 = verf.f32 %v335_v17  ;;  %v210_v15 = vadd.f32 %v1503_v13, %v140_v51  ;;  %v590_v57 = vld [vmem:[%s1814_s3 + $0x178] sm:$0xff]  ;;  %v77_v17 = vld [vmem:[%s1811_s0 + $0x1d0] sm:$0xff] }
  0x6e   :  { %v896_v63 = vpop.eup %895  ;;  %v141_v27 = vmul.f32 %v1533_v16, %v71_v9  ;;  %776 = vst [vmem:[%s1815_s4 + $0x148] sm:$0xff] %v712_v56  ;;  %v649_v28 = vadd.f32 %v585_v1, %v521_v20  ;;  %v523_v30 = vmul.f32 %v459_v21, %v267_v11  ;;  %903 = verf.f32 %v336_v19  ;;  %v591_v56 = vld [vmem:[%s1814_s3 + $0x180] sm:$0xff] }
  0x6f   :  { %v460_v2 = vadd.f32 1.0, %v896_v63  ;;  %v650_v24 = vadd.f32 %v586_v46, %v522_v23  ;;  %v269_v33 = vmul.f32 0.5, %v205_v41  ;;  %v270_v34 = vmul.f32 0.5, %v206_v43  ;;  %v592_v23 = vld [vmem:[%s1814_s3 + $0x188] sm:$0xff] }
  0x70   :  { %v337_v35 = vmul.f32 0.70710677, %v209_v22  ;;  %v713_v25 = vmul.f32 0.7072136, %v649_v28  ;;  %v651_v29 = vadd.f32 %v587_v26, %v523_v30  ;;  %v338_v38 = vmul.f32 0.70710677, %v210_v15 }
  0x71   :  { %v524_v37 = vmul.f32 %v460_v2, %v268_v14  ;;  %v714_v42 = vmul.f32 0.7072136, %v650_v24  ;;  %v211_v39 = vadd.f32 %v1503_v13, %v141_v27  ;;  %v142_v41 = vmul.f32 %v1533_v16, %v72_v18  ;;  %v78_v18 = vld [vmem:[%s1811_s0 + $0x1d8] sm:$0xff]  ;;  %v79_v24 = vld [vmem:[%s1811_s0 + $0x1e0] sm:$0xff] }
  0x72   :  { %905 = verf.f32 %v337_v35  ;;  %777 = vst [vmem:[%s1815_s4 + $0x150] sm:$0xff] %v713_v25  ;;  %v715_v47 = vmul.f32 0.7072136, %v651_v29  ;;  %v143_v44 = vmul.f32 %v1533_v16, %v73_v36  ;;  %v271_v50 = vmul.f32 0.5, %v207_v6  ;;  %v593_v25 = vld [vmem:[%s1814_s3 + $0x190] sm:$0xff] }
  0x73   :  { %v652_v43 = vadd.f32 %v588_v32, %v524_v37  ;;  %907 = verf.f32 %v338_v38  ;;  %v898_v31 = vpop.eup %897  ;;  %778 = vst [vmem:[%s1815_s4 + $0x158] sm:$0xff] %v714_v42  ;;  %v339_v48 = vmul.f32 0.70710677, %v211_v39  ;;  %v212_v53 = vadd.f32 %v1503_v13, %v142_v41 }
  0x74   :  { %v144_v54 = vmul.f32 %v1533_v16, %v74_v40  ;;  %779 = vst [vmem:[%s1815_s4 + $0x160] sm:$0xff] %v715_v47  ;;  %v461_v62 = vadd.f32 1.0, %v898_v31  ;;  %v1633_v49 = vadd.f32 %v1503_v13, %v143_v44  ;;  %v145_v59 = vmul.f32 %v1533_v16, %v75_v45  ;;  %v80_v47 = vld [vmem:[%s1811_s0 + $0x1e8] sm:$0xff] }
  0x75   :  { %v900_v60 = vpop.eup %899  ;;  %v716_v61 = vmul.f32 0.7072136, %v652_v43  ;;  %v272_v6 = vmul.f32 0.5, %v1572_v7  ;;  %909 = verf.f32 %v339_v48  ;;  %v340_v8 = vmul.f32 0.70710677, %v212_v53  ;;  %v81_v43 = vld [vmem:[%s1811_s0 + $0x1f0] sm:$0xff] }
  0x76   :  { %v462_v5 = vadd.f32 1.0, %v900_v60  ;;  %v525_v52 = vmul.f32 %v461_v62, %v269_v33  ;;  %v273_v51 = vmul.f32 0.5, %v209_v22  ;;  %v341_v58 = vmul.f32 0.70710677, %v1633_v49 }
  0x77   :  { %780 = vst [vmem:[%s1815_s4 + $0x168] sm:$0xff] %v716_v61  ;;  %v1651_v10 = vadd.f32 %v1503_v13, %v144_v54  ;;  %v902_v0 = vpop.eup %901  ;;  %911 = verf.f32 %v340_v8  ;;  %v1654_v7 = vadd.f32 %v1503_v13, %v145_v59  ;;  %v146_v11 = vmul.f32 %v1533_v16, %v76_v3 }
  0x78   :  { %v526_v1 = vmul.f32 %v462_v5, %v270_v34  ;;  %v904_v9 = vpop.eup %903  ;;  %v653_v55 = vadd.f32 %v589_v4, %v525_v52  ;;  %v463_v12 = vadd.f32 1.0, %v902_v0  ;;  %v274_v14 = vmul.f32 0.5, %v210_v15 }
  0x79   :  { %913 = verf.f32 %v341_v58  ;;  %v464_v20 = vadd.f32 1.0, %v904_v9  ;;  %v275_v46 = vmul.f32 0.5, %v211_v39  ;;  %v342_v21 = vmul.f32 0.70710677, %v1651_v10  ;;  %v594_v39 = vld [vmem:[%s1814_s3 + $0x198] sm:$0xff] }
  0x7a   :  { %v654_v19 = vadd.f32 %v590_v57, %v526_v1  ;;  %v717_v22 = vmul.f32 0.7072136, %v653_v55  ;;  %v527_v63 = vmul.f32 %v463_v12, %v271_v50  ;;  %v343_v26 = vmul.f32 0.70710677, %v1654_v7  ;;  %v597_v12 = vld [vmem:[%s1814_s3 + $0x1b0] sm:$0xff] }
  0x7b   :  { %v1669_v15 = vadd.f32 %v1503_v13, %v146_v11  ;;  %v528_v30 = vmul.f32 %v464_v20, %v272_v6  ;;  %915 = verf.f32 %v342_v21  ;;  %v147_v2 = vmul.f32 %v1533_v16, %v77_v17 }
  0x7c   :  { %v906_v27 = vpop.eup %905  ;;  %v718_v28 = vmul.f32 0.7072136, %v654_v19  ;;  %781 = vst [vmem:[%s1815_s4 + $0x170] sm:$0xff] %v717_v22  ;;  %v655_v33 = vadd.f32 %v591_v56, %v527_v63  ;;  %v276_v35 = vmul.f32 0.5, %v212_v53  ;;  %917 = verf.f32 %v343_v26  ;;  %v598_v26 = vld [vmem:[%s1814_s3 + $0x1b8] sm:$0xff] }
  0x7d   :  { %v908_v32 = vpop.eup %907  ;;  %v465_v34 = vadd.f32 1.0, %v906_v27  ;;  %v656_v36 = vadd.f32 %v592_v23, %v528_v30  ;;  %v344_v37 = vmul.f32 0.70710677, %v1669_v15  ;;  %v1689_v38 = vadd.f32 %v1503_v13, %v147_v2 }
  0x7e   :  { %782 = vst [vmem:[%s1815_s4 + $0x178] sm:$0xff] %v718_v28  ;;  %v466_v29 = vadd.f32 1.0, %v908_v32  ;;  %v719_v40 = vmul.f32 0.7072136, %v655_v33  ;;  %v148_v41 = vmul.f32 %v1533_v16, %v78_v18  ;;  %v149_v45 = vmul.f32 %v1533_v16, %v79_v24  ;;  %v599_v18 = vld [vmem:[%s1814_s3 + $0x1c0] sm:$0xff] }
  0x7f   :  { %v529_v42 = vmul.f32 %v465_v34, %v273_v51  ;;  %v910_v44 = vpop.eup %909  ;;  %v720_v31 = vmul.f32 0.7072136, %v656_v36  ;;  %v277_v48 = vmul.f32 0.5, %v1633_v49  ;;  %919 = verf.f32 %v344_v37  ;;  %v595_v49 = vld [vmem:[%s1814_s3 + $0x1a0] sm:$0xff]  ;;  %v596_v51 = vld [vmem:[%s1814_s3 + $0x1a8] sm:$0xff] }
  0x80   :  { %v530_v50 = vmul.f32 %v466_v29, %v274_v14  ;;  %783 = vst [vmem:[%s1815_s4 + $0x180] sm:$0xff] %v719_v40  ;;  %v467_v54 = vadd.f32 1.0, %v910_v44  ;;  %v345_v60 = vmul.f32 0.70710677, %v1689_v38  ;;  %v1708_v61 = vadd.f32 %v1503_v13, %v148_v41 }
  0x81   :  { %v657_v53 = vadd.f32 %v593_v25, %v529_v42  ;;  %v912_v62 = vpop.eup %911  ;;  %784 = vst [vmem:[%s1815_s4 + $0x188] sm:$0xff] %v720_v31  ;;  %v1717_v3 = vadd.f32 %v1503_v13, %v149_v45  ;;  %v150_v4 = vmul.f32 %v1533_v16, %v80_v47  ;;  %v151_v5 = vmul.f32 %v1533_v16, %v81_v43  ;;  %v601_v31 = vld [vmem:[%s1814_s3 + $0x1d0] sm:$0xff] }
  0x82   :  { %v658_v59 = vadd.f32 %v594_v39, %v530_v50  ;;  %v531_v52 = vmul.f32 %v467_v54, %v275_v46  ;;  %v468_v57 = vadd.f32 1.0, %v912_v62  ;;  %921 = verf.f32 %v345_v60 }
  0x83   :  { %v914_v6 = vpop.eup %913  ;;  %v721_v8 = vmul.f32 0.7072136, %v657_v53  ;;  %v278_v1 = vmul.f32 0.5, %v1651_v10  ;;  %v346_v11 = vmul.f32 0.70710677, %v1708_v61  ;;  %v279_v14 = vmul.f32 0.5, %v1654_v7 }
  0x84   :  { %v722_v58 = vmul.f32 0.7072136, %v658_v59  ;;  %v469_v0 = vadd.f32 1.0, %v914_v6  ;;  %v659_v9 = vadd.f32 %v595_v49, %v531_v52  ;;  %v532_v55 = vmul.f32 %v468_v57, %v276_v35  ;;  %v82_v7 = vld [vmem:[%s1811_s0 + $0x1f8] sm:$0xff] }
  0x85   :  { %785 = vst [vmem:[%s1815_s4 + $0x190] sm:$0xff] %v721_v8  ;;  %v347_v17 = vmul.f32 0.70710677, %v1717_v3  ;;  %v916_v19 = vpop.eup %915  ;;  %923 = verf.f32 %v346_v11  ;;  %v220_v56 = vadd.f32 %v1503_v13, %v150_v4  ;;  %v221_v20 = vadd.f32 %v1503_v13, %v151_v5  ;;  %v602_v59 = vld [vmem:[%s1814_s3 + $0x1d8] sm:$0xff]  ;;  %v603_v4 = vld [vmem:[%s1814_s3 + $0x1e0] sm:$0xff] }
  0x86   :  { %786 = vst [vmem:[%s1815_s4 + $0x198] sm:$0xff] %v722_v58  ;;  %v533_v10 = vmul.f32 %v469_v0, %v277_v48  ;;  %v918_v46 = vpop.eup %917  ;;  %v723_v21 = vmul.f32 0.7072136, %v659_v9  ;;  %v660_v22 = vadd.f32 %v596_v51, %v532_v55  ;;  %v470_v63 = vadd.f32 1.0, %v916_v19 }
  0x87   :  { %925 = verf.f32 %v347_v17  ;;  %v471_v27 = vadd.f32 1.0, %v918_v46  ;;  %v348_v28 = vmul.f32 0.70710677, %v220_v56  ;;  %v280_v24 = vmul.f32 0.5, %v1669_v15  ;;  %v600_v15 = vld [vmem:[%s1814_s3 + $0x1c8] sm:$0xff] }
  0x88   :  { %v661_v23 = vadd.f32 %v597_v12, %v533_v10  ;;  %787 = vst [vmem:[%s1815_s4 + $0x1a0] sm:$0xff] %v723_v21  ;;  %v724_v30 = vmul.f32 0.7072136, %v660_v22  ;;  %v534_v2 = vmul.f32 %v470_v63, %v278_v1  ;;  %v349_v32 = vmul.f32 0.70710677, %v221_v20  ;;  %v604_v1 = vld [vmem:[%s1814_s3 + $0x1e8] sm:$0xff] }
  0x89   :  { %v920_v33 = vpop.eup %919  ;;  %v535_v35 = vmul.f32 %v471_v27, %v279_v14  ;;  %927 = verf.f32 %v348_v28  ;;  %v152_v36 = vmul.f32 %v1533_v16, %v82_v7  ;;  %v281_v40 = vmul.f32 0.5, %v1689_v38  ;;  %v605_v12 = vld [vmem:[%s1814_s3 + $0x1f0] sm:$0xff]  ;;  %v606_v63 = vld [vmem:[%s1814_s3 + $0x1f8] sm:$0xff] }
  0x8a   :  { %v725_v34 = vmul.f32 0.7072136, %v661_v23  ;;  %788 = vst [vmem:[%s1815_s4 + $0x1a8] sm:$0xff] %v724_v30  ;;  %v662_v25 = vadd.f32 %v598_v26, %v534_v2  ;;  %v472_v29 = vadd.f32 1.0, %v920_v33  ;;  %929 = verf.f32 %v349_v32 }
  0x8b   :  { %v663_v37 = vadd.f32 %v599_v18, %v535_v35  ;;  %v222_v16 = vadd.f32 %v1503_v13, %v152_v36  ;;  %v282_v50 = vmul.f32 0.5, %v1708_v61  ;;  %v283_v48 = vmul.f32 0.5, %v1717_v3 }
  0x8c   :  { %789 = vst [vmem:[%s1815_s4 + $0x1b0] sm:$0xff] %v725_v34  ;;  %v922_v42 = vpop.eup %921  ;;  %v726_v39 = vmul.f32 0.7072136, %v662_v25  ;;  %v536_v41 = vmul.f32 %v472_v29, %v280_v24  ;;  %v284_v3 = vmul.f32 0.5, %v220_v56  ;;  %v285_v52 = vmul.f32 0.5, %v221_v20 }
  0x8d   :  { %v727_v45 = vmul.f32 0.7072136, %v663_v37  ;;  %v473_v47 = vadd.f32 1.0, %v922_v42  ;;  %v350_v43 = vmul.f32 0.70710677, %v222_v16  ;;  %v286_v10 = vmul.f32 0.5, %v222_v16 }
  0x8e   :  { %790 = vst [vmem:[%s1815_s4 + $0x1b8] sm:$0xff] %v726_v39  ;;  %v664_v44 = vadd.f32 %v600_v15, %v536_v41 }
  0x8f   :  { %v924_v38 = vpop.eup %923  ;;  %791 = vst [vmem:[%s1815_s4 + $0x1c0] sm:$0xff] %v727_v45  ;;  %v537_v13 = vmul.f32 %v473_v47, %v281_v40  ;;  %931 = verf.f32 %v350_v43 }
  0x90   :  { %v728_v54 = vmul.f32 0.7072136, %v664_v44  ;;  %v474_v60 = vadd.f32 1.0, %v924_v38 }
  0x91   :  { %v926_v53 = vpop.eup %925  ;;  %v665_v62 = vadd.f32 %v601_v31, %v537_v13 }
  0x92   :  { %v475_v49 = vadd.f32 1.0, %v926_v53  ;;  %792 = vst [vmem:[%s1815_s4 + $0x1c8] sm:$0xff] %v728_v54  ;;  %v538_v61 = vmul.f32 %v474_v60, %v282_v50 }
  0x93   :  { %v928_v5 = vpop.eup %927  ;;  %v729_v6 = vmul.f32 0.7072136, %v665_v62 }
  0x94   :  { %v539_v8 = vmul.f32 %v475_v49, %v283_v48  ;;  %v930_v57 = vpop.eup %929  ;;  %v666_v51 = vadd.f32 %v602_v59, %v538_v61  ;;  %v476_v58 = vadd.f32 1.0, %v928_v5 }
  0x95   :  { %793 = vst [vmem:[%s1815_s4 + $0x1d0] sm:$0xff] %v729_v6  ;;  %v477_v11 = vadd.f32 1.0, %v930_v57 }
  0x96   :  { %v667_v0 = vadd.f32 %v603_v4, %v539_v8  ;;  %v730_v9 = vmul.f32 0.7072136, %v666_v51  ;;  %v540_v55 = vmul.f32 %v476_v58, %v284_v3 }
  0x97   :  { %v541_v17 = vmul.f32 %v477_v11, %v285_v52 }
  0x98   :  { %v731_v14 = vmul.f32 0.7072136, %v667_v0  ;;  %794 = vst [vmem:[%s1815_s4 + $0x1d8] sm:$0xff] %v730_v9  ;;  %v668_v19 = vadd.f32 %v604_v1, %v540_v55 }
  0x99   :  { %v932_v56 = vpop.eup %931  ;;  %v669_v20 = vadd.f32 %v605_v12, %v541_v17 }
  0x9a   :  { %795 = vst [vmem:[%s1815_s4 + $0x1e0] sm:$0xff] %v731_v14  ;;  %v732_v46 = vmul.f32 0.7072136, %v668_v19  ;;  %v478_v21 = vadd.f32 1.0, %v932_v56 }
  0x9b   :  { %v733_v22 = vmul.f32 0.7072136, %v669_v20 }
  0x9c   :  { %796 = vst [vmem:[%s1815_s4 + $0x1e8] sm:$0xff] %v732_v46  ;;  %v542_v7 = vmul.f32 %v478_v21, %v286_v10 }
  0x9d   :  { %797 = vst [vmem:[%s1815_s4 + $0x1f0] sm:$0xff] %v733_v22 }
  0x9e   :  { %v670_v23 = vadd.f32 %v606_v63, %v542_v7 }
  0xa0   :  { %v734_v26 = vmul.f32 0.7072136, %v670_v23 }
  0xa2   :  { %798 = vst [vmem:[%s1815_s4 + $0x1f8] sm:$0xff] %v734_v26 }

// kernel: residual_conv_block.4
= control target key start
LH: loop header
LB: loop body
LE: loop exit
PB: predicated region body
PF: predicated region fallthrough
CT: control target
= control target key end

     0   :  { %s4301_s1 = inlined_call_operand.vmem [shape: f32[3,128,128], index: 1, kind: input, shape index: {}]   ;;  %s4302_s0 = inlined_call_operand.vmem [shape: f32[2,18,16,128], index: 0, kind: input, shape index: {}]   ;;  %s4303_s3 = inlined_call_operand.vmem [shape: f32[1,128], index: 3, kind: output, shape index: {1}]   ;;  %s4304_s4 = inlined_call_operand.vmem [shape: f32[1,128], index: 4, kind: output, shape index: {2}]   ;;  %s4305_s2 = inlined_call_operand.vmem [shape: f32[2,16,16,128], index: 2, kind: output, shape index: {0}]  }
   0x1   :  { %v2062_v0 = vld [vmem:[%s4301_s1 + $0x80] sm:$0xff]  ;;  %v2063_v1 = vld [vmem:[%s4301_s1 + $0x88] sm:$0xff]  ;;  %v2064_v2 = vld [vmem:[%s4301_s1 + $0x90] sm:$0xff] }
   0x2   :  { %v3054_v3 = vpack.c.bf16 %v2063_v1, %v2062_v0  ;;  %v2065_v4 = vld [vmem:[%s4301_s1 + $0x98] sm:$0xff]  ;;  %v2066_v6 = vld [vmem:[%s4301_s1 + $0xa0] sm:$0xff]  ;;  %v2067_v7 = vld [vmem:[%s4301_s1 + $0xa8] sm:$0xff] }
   0x3   :  { %v3058_v5 = vpack.c.bf16 %v2065_v4, %v2064_v2  ;;  %v3062_v8 = vpack.c.bf16 %v2067_v7, %v2066_v6  ;;  %v3422_v9 = vld [vmem:[%s4302_s0 + $0x10] sm:$0xff]  ;;  %v2069_v12 = vld [vmem:[%s4301_s1 + $0xb8] sm:$0xff]  ;;  %v2070_v14 = vld [vmem:[%s4301_s1 + $0xc0] sm:$0xff] }
   0x4   :  { %3055 = vmatprep.subr.bf16.mxu0 %v3054_v3  ;;  %3151 = vmatprep.subr.bf16.mxu1 %v3054_v3  ;;  %v3427_v10 = vld [vmem:[%s4302_s0 + $0x130] sm:$0xff]  ;;  %v2071_v15 = vld [vmem:[%s4301_s1 + $0xc8] sm:$0xff]  ;;  %v2073_v18 = vld [vmem:[%s4301_s1 + $0xd8] sm:$0xff] }
   0x5   :  { %3057 = vmatpush3.bf16.msra.mxu0 %v3054_v3  ;;  %3153 = vmatpush3.bf16.msra.mxu1 %v3054_v3  ;;  %v2068_v11 = vld [vmem:[%s4301_s1 + $0xb0] sm:$0xff]  ;;  %v3070_v16 = vpack.c.bf16 %v2071_v15, %v2070_v14  ;;  %v2074_v20 = vld [vmem:[%s4301_s1 + $0xe0] sm:$0xff]  ;;  %v2075_v21 = vld [vmem:[%s4301_s1 + $0xe8] sm:$0xff] }
   0x6   :  { %3059 = vmatprep.subr.bf16.mxu0 %v3058_v5  ;;  %3155 = vmatprep.subr.bf16.mxu1 %v3058_v5  ;;  %v3066_v13 = vpack.c.bf16 %v2069_v12, %v2068_v11  ;;  %v2072_v17 = vld [vmem:[%s4301_s1 + $0xd0] sm:$0xff]  ;;  %v3078_v22 = vpack.c.bf16 %v2075_v21, %v2074_v20  ;;  %v2077_v24 = vld [vmem:[%s4301_s1 + $0xf8] sm:$0xff]  ;;  %v52_v26 = vld [vmem:[%s4301_s1] sm:$0xff] }
   0x7   :  { %2606 = vmatprep.mubr.f32.mxu0 %v3422_v9  ;;  %2846 = vmatprep.mubr.f32.mxu1 %v3427_v10  ;;  %v3074_v19 = vpack.c.bf16 %v2073_v18, %v2072_v17  ;;  %v2076_v23 = vld [vmem:[%s4301_s1 + $0xf0] sm:$0xff]  ;;  %v53_v27 = vld [vmem:[%s4301_s1 + $0x8] sm:$0xff]  ;;  %v55_v30 = vld [vmem:[%s4301_s1 + $0x18] sm:$0xff] }
   0x8   :  { %v3082_v25 = vpack.c.bf16 %v2077_v24, %v2076_v23  ;;  %v3086_v28 = vpack.c.bf16 %v53_v27, %v52_v26  ;;  %v54_v29 = vld [vmem:[%s4301_s1 + $0x10] sm:$0xff]  ;;  %v3476_v31 = vld [vmem:[%s4302_s0 + $0x18] sm:$0xff]  ;;  %v3486_v33 = vld [vmem:[%s4302_s0 + $0x20] sm:$0xff] }
   0x9   :  { %3061 = vmatpush3.bf16.msra.mxu0 %v3058_v5  ;;  %3157 = vmatpush3.bf16.msra.mxu1 %v3058_v5  ;;  %v3481_v32 = vld [vmem:[%s4302_s0 + $0x138] sm:$0xff]  ;;  %v3090_v34 = vpack.c.bf16 %v55_v30, %v54_v29  ;;  %v3491_v35 = vld [vmem:[%s4302_s0 + $0x140] sm:$0xff]  ;;  %v57_v37 = vld [vmem:[%s4301_s1 + $0x28] sm:$0xff] }
   0xa   :  { %3063 = vmatprep.subr.bf16.mxu0 %v3062_v8  ;;  %3159 = vmatprep.subr.bf16.mxu1 %v3062_v8  ;;  %v56_v36 = vld [vmem:[%s4301_s1 + $0x20] sm:$0xff]  ;;  %v3505_v38 = vld [vmem:[%s4302_s0 + $0x28] sm:$0xff]  ;;  %v3516_v40 = vld [vmem:[%s4302_s0 + $0x30] sm:$0xff] }
   0xb   :  { %v3510_v39 = vld [vmem:[%s4302_s0 + $0x148] sm:$0xff]  ;;  %v3521_v41 = vld [vmem:[%s4302_s0 + $0x150] sm:$0xff]  ;;  %v3094_v42 = vpack.c.bf16 %v57_v37, %v56_v36  ;;  %v59_v44 = vld [vmem:[%s4301_s1 + $0x38] sm:$0xff] }
   0xc   :  { %v58_v43 = vld [vmem:[%s4301_s1 + $0x30] sm:$0xff]  ;;  %v3536_v45 = vld [vmem:[%s4302_s0 + $0x38] sm:$0xff]  ;;  %v3546_v47 = vld [vmem:[%s4302_s0 + $0x40] sm:$0xff] }
   0xd   :  { %3065 = vmatpush3.bf16.msra.mxu0 %v3062_v8  ;;  %3161 = vmatpush3.bf16.msra.mxu1 %v3062_v8  ;;  %v3541_v46 = vld [vmem:[%s4302_s0 + $0x158] sm:$0xff]  ;;  %v3551_v48 = vld [vmem:[%s4302_s0 + $0x160] sm:$0xff]  ;;  %v3098_v49 = vpack.c.bf16 %v59_v44, %v58_v43  ;;  %v61_v51 = vld [vmem:[%s4301_s1 + $0x48] sm:$0xff] }
   0xe   :  { %3067 = vmatprep.subr.bf16.mxu0 %v3066_v13  ;;  %3163 = vmatprep.subr.bf16.mxu1 %v3066_v13  ;;  %v60_v50 = vld [vmem:[%s4301_s1 + $0x40] sm:$0xff]  ;;  %v3566_v52 = vld [vmem:[%s4302_s0 + $0x48] sm:$0xff]  ;;  %v3576_v54 = vld [vmem:[%s4302_s0 + $0x50] sm:$0xff] }
   0xf   :  { %v3571_v53 = vld [vmem:[%s4302_s0 + $0x168] sm:$0xff]  ;;  %v3581_v55 = vld [vmem:[%s4302_s0 + $0x170] sm:$0xff]  ;;  %v3102_v56 = vpack.c.bf16 %v61_v51, %v60_v50  ;;  %v63_v58 = vld [vmem:[%s4301_s1 + $0x58] sm:$0xff] }
  0x10   :  { %v62_v57 = vld [vmem:[%s4301_s1 + $0x50] sm:$0xff]  ;;  %v3596_v59 = vld [vmem:[%s4302_s0 + $0x58] sm:$0xff]  ;;  %v3606_v61 = vld [vmem:[%s4302_s0 + $0x60] sm:$0xff] }
  0x11   :  { %3069 = vmatpush3.bf16.msra.mxu0 %v3066_v13  ;;  %3165 = vmatpush3.bf16.msra.mxu1 %v3066_v13  ;;  %v3601_v60 = vld [vmem:[%s4302_s0 + $0x178] sm:$0xff]  ;;  %v3611_v62 = vld [vmem:[%s4302_s0 + $0x180] sm:$0xff]  ;;  %v3106_v63 = vpack.c.bf16 %v63_v58, %v62_v57  ;;  %v65_v1 = vld [vmem:[%s4301_s1 + $0x68] sm:$0xff] }
  0x12   :  { %3071 = vmatprep.subr.bf16.mxu0 %v3070_v16  ;;  %3167 = vmatprep.subr.bf16.mxu1 %v3070_v16  ;;  %v64_v0 = vld [vmem:[%s4301_s1 + $0x60] sm:$0xff]  ;;  %v3626_v2 = vld [vmem:[%s4302_s0 + $0x68] sm:$0xff]  ;;  %v3636_v4 = vld [vmem:[%s4302_s0 + $0x70] sm:$0xff] }
  0x13   :  { %v3631_v3 = vld [vmem:[%s4302_s0 + $0x188] sm:$0xff]  ;;  %v3641_v5 = vld [vmem:[%s4302_s0 + $0x190] sm:$0xff]  ;;  %v3110_v6 = vpack.c.bf16 %v65_v1, %v64_v0  ;;  %v67_v8 = vld [vmem:[%s4301_s1 + $0x78] sm:$0xff] }
  0x14   :  { %v66_v7 = vld [vmem:[%s4301_s1 + $0x70] sm:$0xff]  ;;  %v3656_v11 = vld [vmem:[%s4302_s0 + $0x78] sm:$0xff]  ;;  %v3666_v13 = vld [vmem:[%s4302_s0 + $0x80] sm:$0xff] }
  0x15   :  { %3073 = vmatpush3.bf16.msra.mxu0 %v3070_v16  ;;  %3169 = vmatpush3.bf16.msra.mxu1 %v3070_v16  ;;  %v3661_v12 = vld [vmem:[%s4302_s0 + $0x198] sm:$0xff]  ;;  %v3671_v14 = vld [vmem:[%s4302_s0 + $0x1a0] sm:$0xff]  ;;  %v3114_v15 = vpack.c.bf16 %v67_v8, %v66_v7  ;;  %v2111_v17 = vld [vmem:[%s4301_s1 + $0x108] sm:$0xff] }
  0x16   :  { %3075 = vmatprep.subr.bf16.mxu0 %v3074_v19  ;;  %3171 = vmatprep.subr.bf16.mxu1 %v3074_v19  ;;  %v2110_v16 = vld [vmem:[%s4301_s1 + $0x100] sm:$0xff]  ;;  %v3686_v18 = vld [vmem:[%s4302_s0 + $0x88] sm:$0xff]  ;;  %v3696_v20 = vld [vmem:[%s4302_s0 + $0x90] sm:$0xff] }
  0x17   :  { %v3701_v21 = vld [vmem:[%s4302_s0 + $0x1b0] sm:$0xff]  ;;  %v3712_v23 = vld [vmem:[%s4302_s0 + $0x98] sm:$0xff]  ;;  %v3727_v26 = vld [vmem:[%s4302_s0 + $0x1c0] sm:$0xff] }
  0x18   :  { %v3717_v24 = vld [vmem:[%s4302_s0 + $0x1b8] sm:$0xff]  ;;  %v3737_v27 = vld [vmem:[%s4302_s0 + $0xa8] sm:$0xff]  ;;  %v3747_v29 = vld [vmem:[%s4302_s0 + $0xb0] sm:$0xff] }
  0x19   :  { %3077 = vmatpush3.bf16.msra.mxu0 %v3074_v19  ;;  %3173 = vmatpush3.bf16.msra.mxu1 %v3074_v19  ;;  %v3691_v19 = vld [vmem:[%s4302_s0 + $0x1a8] sm:$0xff]  ;;  %v3752_v30 = vld [vmem:[%s4302_s0 + $0x1d0] sm:$0xff]  ;;  %v3767_v36 = vld [vmem:[%s4302_s0 + $0x1d8] sm:$0xff] }
  0x1a   :  { %3079 = vmatprep.subr.bf16.mxu0 %v3078_v22  ;;  %3175 = vmatprep.subr.bf16.mxu1 %v3078_v22  ;;  %v3772_v37 = vld [vmem:[%s4302_s0 + $0xc0] sm:$0xff]  ;;  %v3786_v43 = vld [vmem:[%s4302_s0 + $0xc8] sm:$0xff]  ;;  %v3801_v50 = vld [vmem:[%s4302_s0 + $0x1f0] sm:$0xff] }
  0x1b   :  { %v3791_v44 = vld [vmem:[%s4302_s0 + $0x1e8] sm:$0xff]  ;;  %v3810_v51 = vld [vmem:[%s4302_s0 + $0xd8] sm:$0xff]  ;;  %v3820_v57 = vld [vmem:[%s4302_s0 + $0xe0] sm:$0xff] }
  0x1c   :  { %v3825_v58 = vld [vmem:[%s4302_s0 + $0x200] sm:$0xff]  ;;  %v3839_v0 = vld [vmem:[%s4302_s0 + $0x208] sm:$0xff]  ;;  %v3844_v1 = vld [vmem:[%s4302_s0 + $0xf0] sm:$0xff] }
  0x1d   :  { %3081 = vmatpush3.bf16.msra.mxu0 %v3078_v22  ;;  %3177 = vmatpush3.bf16.msra.mxu1 %v3078_v22  ;;  %v3703_v22 = vpack.c.bf16 %v2111_v17, %v2110_v16  ;;  %4322 = vst [vmem:[#allocation2_spill] sm:$0xff] %v3825_v58  ;;  %4324 = vst [vmem:[#allocation4_spill] sm:$0xff] %v3839_v0  ;;  %v3858_v7 = vld [vmem:[%s4302_s0 + $0xf8] sm:$0xff]  ;;  %v3873_v16 = vld [vmem:[%s4302_s0 + $0x220] sm:$0xff] }
  0x1e   :  { %3083 = vmatprep.subr.bf16.mxu0 %v3082_v25  ;;  %3179 = vmatprep.subr.bf16.mxu1 %v3082_v25  ;;  %4325 = vst [vmem:[#allocation5_spill] sm:$0xff] %v3844_v1  ;;  %4327 = vst [vmem:[#allocation7_spill] sm:$0xff] %v3858_v7  ;;  %v3863_v8 = vld [vmem:[%s4302_s0 + $0x218] sm:$0xff]  ;;  %v3882_v17 = vld [vmem:[%s4302_s0 + $0x108] sm:$0xff] }
  0x1f   :  { %4328 = vst [vmem:[#allocation8_spill] sm:$0xff] %v3863_v8  ;;  %4330 = vst [vmem:[#allocation10_spill] sm:$0xff] %v3873_v16 }
  0x21   :  { %3085 = vmatpush3.bf16.msra.mxu0 %v3082_v25  ;;  %3181 = vmatpush3.bf16.msra.mxu1 %v3082_v25  ;;  %v3722_v25 = vld [vmem:[%s4302_s0 + $0xa0] sm:$0xff] }
  0x22   :  { %3087 = vmatprep.subr.bf16.mxu0 %v3086_v28  ;;  %3183 = vmatprep.subr.bf16.mxu1 %v3086_v28 }
  0x24   :  { %2607 = vmatmul.mubr.f32.vlgmr.msra.gmra.mrb[0].mxu0 %v3476_v31  ;;  %2847 = vmatmul.mubr.f32.vlgmr.msra.gmra.mrb[0].mxu1 %v3481_v32 }
  0x25   :  { %3089 = vmatpush3.bf16.msra.mxu0 %v3086_v28  ;;  %2609 = vmatprep.mubr.f32.mxu0 %v3486_v33 }
  0x26   :  { %2849 = vmatprep.mubr.f32.mxu1 %v3491_v35  ;;  %3091 = vmatprep.subr.bf16.mxu0 %v3090_v34 }
  0x27   :  { %3185 = vmatpush3.bf16.msra.mxu1 %v3086_v28  ;;  %v3742_v28 = vld [vmem:[%s4302_s0 + $0x1c8] sm:$0xff] }
  0x28   :  { %2610 = vmatmul.mubr.f32.gmra.mrb[2].mxu0 %v3505_v38  ;;  %2850 = vmatmul.mubr.f32.gmra.mrb[2].mxu1 %v3510_v39 }
  0x29   :  { %2612 = vmatprep.mubr.f32.mxu0 %v3516_v40  ;;  %2852 = vmatprep.mubr.f32.mxu1 %v3521_v41 }
  0x2a   :  { %3093 = vmatpush3.bf16.msra.mxu0 %v3090_v34  ;;  %3187 = vmatprep.subr.bf16.mxu1 %v3090_v34 }
  0x2b   :  { %3095 = vmatprep.subr.bf16.mxu0 %v3094_v42  ;;  %3189 = vmatpush3.bf16.msra.mxu1 %v3090_v34  ;;  %v3762_v34 = vld [vmem:[%s4302_s0 + $0xb8] sm:$0xff] }
  0x2c   :  { %2613 = vmatmul.mubr.f32.gmra.mrb[4].mxu0 %v3536_v45  ;;  %2853 = vmatmul.mubr.f32.gmra.mrb[4].mxu1 %v3541_v46 }
  0x2d   :  { %2615 = vmatprep.mubr.f32.mxu0 %v3546_v47  ;;  %2855 = vmatprep.mubr.f32.mxu1 %v3551_v48 }
  0x2e   :  { %3097 = vmatpush3.bf16.msra.mxu0 %v3094_v42  ;;  %3191 = vmatprep.subr.bf16.mxu1 %v3094_v42 }
  0x2f   :  { %3099 = vmatprep.subr.bf16.mxu0 %v3098_v49  ;;  %3193 = vmatpush3.bf16.msra.mxu1 %v3094_v42  ;;  %v3777_v42 = vld [vmem:[%s4302_s0 + $0x1e0] sm:$0xff] }
  0x30   :  { %2616 = vmatmul.mubr.f32.gmra.mrb[6].mxu0 %v3566_v52  ;;  %2856 = vmatmul.mubr.f32.gmra.mrb[6].mxu1 %v3571_v53 }
  0x31   :  { %2618 = vmatprep.mubr.f32.mxu0 %v3576_v54  ;;  %2858 = vmatprep.mubr.f32.mxu1 %v3581_v55 }
  0x32   :  { %3101 = vmatpush3.bf16.msra.mxu0 %v3098_v49  ;;  %3195 = vmatprep.subr.bf16.mxu1 %v3098_v49 }
  0x33   :  { %3103 = vmatprep.subr.bf16.mxu0 %v3102_v56  ;;  %3197 = vmatpush3.bf16.msra.mxu1 %v3098_v49  ;;  %v3796_v49 = vld [vmem:[%s4302_s0 + $0xd0] sm:$0xff] }
  0x34   :  { %2619 = vmatmul.mubr.f32.gmra.mrb[8].mxu0 %v3596_v59  ;;  %2859 = vmatmul.mubr.f32.gmra.mrb[8].mxu1 %v3601_v60 }
  0x35   :  { %2621 = vmatprep.mubr.f32.mxu0 %v3606_v61  ;;  %2861 = vmatprep.mubr.f32.mxu1 %v3611_v62 }
  0x36   :  { %3105 = vmatpush3.bf16.msra.mxu0 %v3102_v56  ;;  %3199 = vmatprep.subr.bf16.mxu1 %v3102_v56 }
  0x37   :  { %3107 = vmatprep.subr.bf16.mxu0 %v3106_v63  ;;  %3201 = vmatpush3.bf16.msra.mxu1 %v3102_v56  ;;  %v3815_v56 = vld [vmem:[%s4302_s0 + $0x1f8] sm:$0xff] }
  0x38   :  { %2622 = vmatmul.mubr.f32.gmra.mrb[10].mxu0 %v3626_v2  ;;  %2862 = vmatmul.mubr.f32.gmra.mrb[10].mxu1 %v3631_v3 }
  0x39   :  { %2624 = vmatprep.mubr.f32.mxu0 %v3636_v4  ;;  %2864 = vmatprep.mubr.f32.mxu1 %v3641_v5 }
  0x3a   :  { %3109 = vmatpush3.bf16.msra.mxu0 %v3106_v63  ;;  %3203 = vmatprep.subr.bf16.mxu1 %v3106_v63 }
  0x3b   :  { %3111 = vmatprep.subr.bf16.mxu0 %v3110_v6  ;;  %3205 = vmatpush3.bf16.msra.mxu1 %v3106_v63  ;;  %v3834_v63 = vld [vmem:[%s4302_s0 + $0xe8] sm:$0xff] }
  0x3c   :  { %2625 = vmatmul.mubr.f32.gmra.mrb[12].mxu0 %v3656_v11  ;;  %2865 = vmatmul.mubr.f32.gmra.mrb[12].mxu1 %v3661_v12  ;;  %4323 = vst [vmem:[#allocation3_spill] sm:$0xff] %v3834_v63 }
  0x3d   :  { %2627 = vmatprep.mubr.f32.mxu0 %v3666_v13  ;;  %2867 = vmatprep.mubr.f32.mxu1 %v3671_v14 }
  0x3e   :  { %3113 = vmatpush3.bf16.msra.mxu0 %v3110_v6  ;;  %3207 = vmatprep.subr.bf16.mxu1 %v3110_v6 }
  0x3f   :  { %3115 = vmatprep.subr.bf16.mxu0 %v3114_v15  ;;  %3209 = vmatpush3.bf16.msra.mxu1 %v3110_v6  ;;  %v3849_v6 = vld [vmem:[%s4302_s0 + $0x210] sm:$0xff] }
  0x40   :  { %2628 = vmatmul.mubr.f32.gmra.mrb[14].mxu0 %v3686_v18  ;;  %2868 = vmatmul.mubr.f32.gmra.mrb[14].mxu1 %v3691_v19  ;;  %4326 = vst [vmem:[#allocation6_spill] sm:$0xff] %v3849_v6 }
  0x41   :  { %2630 = vmatprep.mubr.f32.mxu0 %v3696_v20  ;;  %2870 = vmatprep.mubr.f32.mxu1 %v3701_v21 }
  0x42   :  { %3117 = vmatpush3.bf16.msra.mxu0 %v3114_v15  ;;  %3211 = vmatprep.subr.bf16.mxu1 %v3114_v15 }
  0x43   :  { %3213 = vmatpush3.bf16.msra.mxu1 %v3114_v15  ;;  %3119 = vmatprep.subr.bf16.mxu0 %v3703_v22  ;;  %v3868_v15 = vld [vmem:[%s4302_s0 + $0x100] sm:$0xff] }
  0x44   :  { %2631 = vmatmul.mubr.f32.gmra.mrb[16].mxu0 %v3712_v23  ;;  %2871 = vmatmul.mubr.f32.gmra.mrb[16].mxu1 %v3717_v24  ;;  %4329 = vst [vmem:[#allocation9_spill] sm:$0xff] %v3868_v15 }
  0x45   :  { %2633 = vmatprep.mubr.f32.mxu0 %v3722_v25  ;;  %2873 = vmatprep.mubr.f32.mxu1 %v3727_v26 }
  0x46   :  { %3215 = vmatprep.subr.bf16.mxu1 %v3703_v22 }
  0x48   :  { %2634 = vmatmul.mubr.f32.gmra.mrb[18].mxu0 %v3737_v27  ;;  %2874 = vmatmul.mubr.f32.gmra.mrb[18].mxu1 %v3742_v28 }
  0x49   :  { %2636 = vmatprep.mubr.f32.mxu0 %v3747_v29  ;;  %2876 = vmatprep.mubr.f32.mxu1 %v3752_v30 }
  0x4c   :  { %2637 = vmatmul.mubr.f32.gmra.mrb[20].mxu0 %v3762_v34  ;;  %2877 = vmatmul.mubr.f32.gmra.mrb[20].mxu1 %v3767_v36 }
  0x4d   :  { %2639 = vmatprep.mubr.f32.mxu0 %v3772_v37  ;;  %2879 = vmatprep.mubr.f32.mxu1 %v3777_v42 }
  0x50   :  { %2640 = vmatmul.mubr.f32.gmra.mrb[22].mxu0 %v3786_v43  ;;  %2880 = vmatmul.mubr.f32.gmra.mrb[22].mxu1 %v3791_v44 }
  0x51   :  { %2642 = vmatprep.mubr.f32.mxu0 %v3796_v49  ;;  %2882 = vmatprep.mubr.f32.mxu1 %v3801_v50 }
  0x54   :  { %2643 = vmatmul.mubr.f32.gmra.mrb[24].mxu0 %v3810_v51  ;;  %2883 = vmatmul.mubr.f32.gmra.mrb[24].mxu1 %v3815_v56 }
  0x55   :  { %2645 = vmatprep.mubr.f32.mxu0 %v3820_v57  ;;  %2885 = vmatprep.mubr.f32.mxu1 %v3825_v58  ;;  %v2114_v58 = vld [vmem:[%s4301_s1 + $0x120] sm:$0xff] }
  0x58   :  { %2646 = vmatmul.mubr.f32.gmra.mrb[26].mxu0 %v3834_v63  ;;  %2886 = vmatmul.mubr.f32.gmra.mrb[26].mxu1 %v3839_v0  ;;  %v2127_v0 = vld [vmem:[%s4302_s0 + $0x128] sm:$0xff] }
  0x59   :  { %2648 = vmatprep.mubr.f32.mxu0 %v3844_v1  ;;  %2888 = vmatprep.mubr.f32.mxu1 %v3849_v6  ;;  %v3887_v6 = vld [vmem:[%s4302_s0 + $0x228] sm:$0xff] }
  0x5a   :  { %v21_v1 = vld [vmem:[%s4302_s0 + $0x8] sm:$0xff] }
  0x5c   :  { %2649 = vmatmul.mubr.f32.gmra.mrb[28].mxu0 %v3858_v7  ;;  %2889 = vmatmul.mubr.f32.gmra.mrb[28].mxu1 %v3863_v8  ;;  %v20_v7 = vld [vmem:[%s4302_s0] sm:$0xff]  ;;  %v2113_v8 = vld [vmem:[%s4301_s1 + $0x118] sm:$0xff] }
  0x5d   :  { %2651 = vmatprep.mubr.f32.mxu0 %v3868_v15  ;;  %2891 = vmatprep.mubr.f32.mxu1 %v3873_v16  ;;  %v2126_v15 = vld [vmem:[%s4302_s0 + $0x120] sm:$0xff]  ;;  %v2112_v16 = vld [vmem:[%s4301_s1 + $0x110] sm:$0xff] }
  0x5e   :  { %v3122_v63 = vpack.c.bf16 %v2113_v8, %v2112_v16  ;;  %v2123_v16 = vld [vmem:[%s4301_s1 + $0x168] sm:$0xff] }
  0x60   :  { %2652 = vmatmul.mubr.f32.gmra.mrb[30].mxu0 %v3882_v17  ;;  %2892 = vmatmul.mubr.f32.gmra.mrb[30].mxu1 %v3887_v6 }
  0x61   :  { %2686 = vmatprep.mubr.f32.mxu0 %v20_v7  ;;  %2926 = vmatprep.mubr.f32.mxu1 %v2126_v15  ;;  %v2115_v7 = vld [vmem:[%s4301_s1 + $0x128] sm:$0xff]  ;;  %v2122_v15 = vld [vmem:[%s4301_s1 + $0x160] sm:$0xff] }
  0x62   :  { %v3126_v8 = vpack.c.bf16 %v2115_v7, %v2114_v58  ;;  %v2121_v58 = vld [vmem:[%s4301_s1 + $0x158] sm:$0xff]  ;;  %v3142_v7 = vpack.c.bf16 %v2123_v16, %v2122_v15 }
  0x64   :  { %2687 = vmatmul.mubr.f32.vlgmr.msra.gmra.mrb[0].mxu0 %v21_v1  ;;  %2927 = vmatmul.mubr.f32.vlgmr.msra.gmra.mrb[0].mxu1 %v2127_v0  ;;  %v2116_v0 = vld [vmem:[%s4301_s1 + $0x130] sm:$0xff]  ;;  %v2117_v1 = vld [vmem:[%s4301_s1 + $0x138] sm:$0xff] }
  0x65   :  { %3121 = vmatpush3.bf16.msra.mxu0 %v3703_v22  ;;  %2689 = vmatprep.mubr.f32.mxu0 %v3422_v9  ;;  %v3130_v9 = vpack.c.bf16 %v2117_v1, %v2116_v0  ;;  %v2125_v0 = vld [vmem:[%s4301_s1 + $0x178] sm:$0xff] }
  0x66   :  { %2929 = vmatprep.mubr.f32.mxu1 %v3427_v10  ;;  %3123 = vmatprep.subr.bf16.mxu0 %v3122_v63  ;;  %v2118_v10 = vld [vmem:[%s4301_s1 + $0x140] sm:$0xff] }
  0x67   :  { %3217 = vmatpush3.bf16.msra.mxu1 %v3703_v22  ;;  %v2120_v22 = vld [vmem:[%s4301_s1 + $0x150] sm:$0xff] }
  0x68   :  { %2690 = vmatmul.mubr.f32.gmra.mrb[2].mxu0 %v3476_v31  ;;  %2930 = vmatmul.mubr.f32.gmra.mrb[2].mxu1 %v3481_v32  ;;  %v2119_v31 = vld [vmem:[%s4301_s1 + $0x148] sm:$0xff] }
  0x69   :  { %2692 = vmatprep.mubr.f32.mxu0 %v3486_v33  ;;  %2932 = vmatprep.mubr.f32.mxu1 %v3491_v35  ;;  %v3134_v32 = vpack.c.bf16 %v2119_v31, %v2118_v10  ;;  %v4332_v10 = vld [vmem:[#allocation3_spill] sm:$0xff]  ;;  %v4333_v31 = vld [vmem:[#allocation4_spill] sm:$0xff] }
  0x6a   :  { %3125 = vmatpush3.bf16.msra.mxu0 %v3122_v63  ;;  %3219 = vmatprep.subr.bf16.mxu1 %v3122_v63 }
  0x6b   :  { %3127 = vmatprep.subr.bf16.mxu0 %v3126_v8  ;;  %3221 = vmatpush3.bf16.msra.mxu1 %v3122_v63  ;;  %v3138_v63 = vpack.c.bf16 %v2121_v58, %v2120_v22  ;;  %v4335_v22 = vld [vmem:[#allocation6_spill] sm:$0xff]  ;;  %v4336_v58 = vld [vmem:[#allocation7_spill] sm:$0xff] }
  0x6c   :  { %2693 = vmatmul.mubr.f32.gmra.mrb[4].mxu0 %v3505_v38  ;;  %2933 = vmatmul.mubr.f32.gmra.mrb[4].mxu1 %v3510_v39 }
  0x6d   :  { %2695 = vmatprep.mubr.f32.mxu0 %v3516_v40  ;;  %2935 = vmatprep.mubr.f32.mxu1 %v3521_v41 }
  0x6e   :  { %3129 = vmatpush3.bf16.msra.mxu0 %v3126_v8  ;;  %3223 = vmatprep.subr.bf16.mxu1 %v3126_v8 }
  0x6f   :  { %3131 = vmatprep.subr.bf16.mxu0 %v3130_v9  ;;  %3225 = vmatpush3.bf16.msra.mxu1 %v3126_v8  ;;  %v2124_v8 = vld [vmem:[%s4301_s1 + $0x170] sm:$0xff] }
  0x70   :  { %2696 = vmatmul.mubr.f32.gmra.mrb[6].mxu0 %v3536_v45  ;;  %2936 = vmatmul.mubr.f32.gmra.mrb[6].mxu1 %v3541_v46  ;;  %v3146_v1 = vpack.c.bf16 %v2125_v0, %v2124_v8 }
  0x71   :  { %2698 = vmatprep.mubr.f32.mxu0 %v3546_v47  ;;  %2938 = vmatprep.mubr.f32.mxu1 %v3551_v48 }
  0x72   :  { %3133 = vmatpush3.bf16.msra.mxu0 %v3130_v9  ;;  %3227 = vmatprep.subr.bf16.mxu1 %v3130_v9 }
  0x73   :  { %3135 = vmatprep.subr.bf16.mxu0 %v3134_v32  ;;  %3229 = vmatpush3.bf16.msra.mxu1 %v3130_v9  ;;  %v4331_v9 = vld [vmem:[#allocation2_spill] sm:$0xff] }
  0x74   :  { %2699 = vmatmul.mubr.f32.gmra.mrb[8].mxu0 %v3566_v52  ;;  %2939 = vmatmul.mubr.f32.gmra.mrb[8].mxu1 %v3571_v53 }
  0x75   :  { %2701 = vmatprep.mubr.f32.mxu0 %v3576_v54  ;;  %2941 = vmatprep.mubr.f32.mxu1 %v3581_v55 }
  0x76   :  { %3137 = vmatpush3.bf16.msra.mxu0 %v3134_v32  ;;  %3231 = vmatprep.subr.bf16.mxu1 %v3134_v32 }
  0x77   :  { %3139 = vmatprep.subr.bf16.mxu0 %v3138_v63  ;;  %3233 = vmatpush3.bf16.msra.mxu1 %v3134_v32  ;;  %v4334_v32 = vld [vmem:[#allocation5_spill] sm:$0xff] }
  0x78   :  { %2702 = vmatmul.mubr.f32.gmra.mrb[10].mxu0 %v3596_v59  ;;  %2942 = vmatmul.mubr.f32.gmra.mrb[10].mxu1 %v3601_v60 }
  0x79   :  { %2704 = vmatprep.mubr.f32.mxu0 %v3606_v61  ;;  %2944 = vmatprep.mubr.f32.mxu1 %v3611_v62 }
  0x7a   :  { %3141 = vmatpush3.bf16.msra.mxu0 %v3138_v63  ;;  %3235 = vmatprep.subr.bf16.mxu1 %v3138_v63 }
  0x7b   :  { %3143 = vmatprep.subr.bf16.mxu0 %v3142_v7  ;;  %3237 = vmatpush3.bf16.msra.mxu1 %v3138_v63  ;;  %v4337_v63 = vld [vmem:[#allocation8_spill] sm:$0xff] }
  0x7c   :  { %2705 = vmatmul.mubr.f32.gmra.mrb[12].mxu0 %v3626_v2  ;;  %2945 = vmatmul.mubr.f32.gmra.mrb[12].mxu1 %v3631_v3 }
  0x7d   :  { %2707 = vmatprep.mubr.f32.mxu0 %v3636_v4  ;;  %2947 = vmatprep.mubr.f32.mxu1 %v3641_v5 }
  0x7e   :  { %3145 = vmatpush3.bf16.msra.mxu0 %v3142_v7  ;;  %3239 = vmatprep.subr.bf16.mxu1 %v3142_v7 }
  0x7f   :  { %3147 = vmatprep.subr.bf16.mxu0 %v3146_v1  ;;  %3241 = vmatpush3.bf16.msra.mxu1 %v3142_v7 }
  0x80   :  { %2708 = vmatmul.mubr.f32.gmra.mrb[14].mxu0 %v3656_v11  ;;  %2948 = vmatmul.mubr.f32.gmra.mrb[14].mxu1 %v3661_v12 }
  0x81   :  { %2710 = vmatprep.mubr.f32.mxu0 %v3666_v13  ;;  %2950 = vmatprep.mubr.f32.mxu1 %v3671_v14 }
  0x82   :  { %3149 = vmatpush3.bf16.msra.mxu0 %v3146_v1  ;;  %3243 = vmatprep.subr.bf16.mxu1 %v3146_v1 }
  0x83   :  { %3245 = vmatpush3.bf16.msra.mxu1 %v3146_v1 }
  0x84   :  { %2711 = vmatmul.mubr.f32.gmra.mrb[16].mxu0 %v3686_v18  ;;  %2951 = vmatmul.mubr.f32.gmra.mrb[16].mxu1 %v3691_v19 }
  0x85   :  { %2713 = vmatprep.mubr.f32.mxu0 %v3696_v20  ;;  %2953 = vmatprep.mubr.f32.mxu1 %v3701_v21 }
  0x88   :  { %2714 = vmatmul.mubr.f32.gmra.mrb[18].mxu0 %v3712_v23  ;;  %2954 = vmatmul.mubr.f32.gmra.mrb[18].mxu1 %v3717_v24 }
  0x89   :  { %2716 = vmatprep.mubr.f32.mxu0 %v3722_v25  ;;  %2956 = vmatprep.mubr.f32.mxu1 %v3727_v26 }
  0x8c   :  { %2717 = vmatmul.mubr.f32.gmra.mrb[20].mxu0 %v3737_v27  ;;  %2957 = vmatmul.mubr.f32.gmra.mrb[20].mxu1 %v3742_v28 }
  0x8d   :  { %2719 = vmatprep.mubr.f32.mxu0 %v3747_v29  ;;  %2959 = vmatprep.mubr.f32.mxu1 %v3752_v30 }
  0x90   :  { %2720 = vmatmul.mubr.f32.gmra.mrb[22].mxu0 %v3762_v34  ;;  %2960 = vmatmul.mubr.f32.gmra.mrb[22].mxu1 %v3767_v36 }
  0x91   :  { %2722 = vmatprep.mubr.f32.mxu0 %v3772_v37  ;;  %2962 = vmatprep.mubr.f32.mxu1 %v3777_v42 }
  0x94   :  { %2723 = vmatmul.mubr.f32.gmra.mrb[24].mxu0 %v3786_v43  ;;  %2963 = vmatmul.mubr.f32.gmra.mrb[24].mxu1 %v3791_v44 }
  0x95   :  { %2725 = vmatprep.mubr.f32.mxu0 %v3796_v49  ;;  %2965 = vmatprep.mubr.f32.mxu1 %v3801_v50 }
  0x98   :  { %2726 = vmatmul.mubr.f32.gmra.mrb[26].mxu0 %v3810_v51  ;;  %2966 = vmatmul.mubr.f32.gmra.mrb[26].mxu1 %v3815_v56 }
  0x99   :  { %2728 = vmatprep.mubr.f32.mxu0 %v3820_v57  ;;  %2968 = vmatprep.mubr.f32.mxu1 %v4331_v9 }
  0x9c   :  { %2729 = vmatmul.mubr.f32.gmra.mrb[28].mxu0 %v4332_v10  ;;  %2969 = vmatmul.mubr.f32.gmra.mrb[28].mxu1 %v4333_v31 }
  0x9d   :  { %2731 = vmatprep.mubr.f32.mxu0 %v4334_v32  ;;  %2971 = vmatprep.mubr.f32.mxu1 %v4335_v22 }
  0xa0   :  { %2732 = vmatmul.mubr.f32.gmra.mrb[30].mxu0 %v4336_v58  ;;  %2972 = vmatmul.mubr.f32.gmra.mrb[30].mxu1 %v4337_v63 }
  0xa1   :  { %2766 = vmatprep.mubr.f32.mxu0 %v3486_v33  ;;  %3006 = vmatprep.mubr.f32.mxu1 %v3491_v35  ;;  %v4338_v33 = vld [vmem:[#allocation9_spill] sm:$0xff]  ;;  %v4339_v35 = vld [vmem:[#allocation10_spill] sm:$0xff] }
  0xa4   :  { %2767 = vmatmul.mubr.f32.vlgmr.msra.gmra.mrb[0].mxu0 %v3505_v38  ;;  %3007 = vmatmul.mubr.f32.vlgmr.msra.gmra.mrb[0].mxu1 %v3510_v39  ;;  %v2108_v38 = vld [vmem:[%s4302_s0 + $0x110] sm:$0xff] }
  0xa5   :  { %2769 = vmatprep.mubr.f32.mxu0 %v3516_v40  ;;  %3009 = vmatprep.mubr.f32.mxu1 %v3521_v41  ;;  %v2236_v39 = vld [vmem:[%s4302_s0 + $0x230] sm:$0xff]  ;;  %v2109_v40 = vld [vmem:[%s4302_s0 + $0x118] sm:$0xff] }
  0xa6   :  { %v2237_v41 = vld [vmem:[%s4302_s0 + $0x238] sm:$0xff] }
  0xa8   :  { %2770 = vmatmul.mubr.f32.gmra.mrb[2].mxu0 %v3536_v45  ;;  %3010 = vmatmul.mubr.f32.gmra.mrb[2].mxu1 %v3541_v46  ;;  %v3375_v45 = vmov 0.0  }
  0xa9   :  { %2772 = vmatprep.mubr.f32.mxu0 %v3546_v47  ;;  %3012 = vmatprep.mubr.f32.mxu1 %v3551_v48  ;;  %18 = vst [vmem:[%s4303_s3] sm:$0x1] %v3375_v45  ;;  %19 = vst [vmem:[%s4304_s4] sm:$0x1] %v3375_v45 }
  0xac   :  { %2773 = vmatmul.mubr.f32.gmra.mrb[4].mxu0 %v3566_v52  ;;  %3013 = vmatmul.mubr.f32.gmra.mrb[4].mxu1 %v3571_v53 }
  0xad   :  { %2775 = vmatprep.mubr.f32.mxu0 %v3576_v54  ;;  %3015 = vmatprep.mubr.f32.mxu1 %v3581_v55 }
  0xb0   :  { %2776 = vmatmul.mubr.f32.gmra.mrb[6].mxu0 %v3596_v59  ;;  %3016 = vmatmul.mubr.f32.gmra.mrb[6].mxu1 %v3601_v60 }
  0xb1   :  { %2778 = vmatprep.mubr.f32.mxu0 %v3606_v61  ;;  %3018 = vmatprep.mubr.f32.mxu1 %v3611_v62 }
  0xb4   :  { %2779 = vmatmul.mubr.f32.gmra.mrb[8].mxu0 %v3626_v2  ;;  %3019 = vmatmul.mubr.f32.gmra.mrb[8].mxu1 %v3631_v3 }
  0xb5   :  { %2781 = vmatprep.mubr.f32.mxu0 %v3636_v4  ;;  %3021 = vmatprep.mubr.f32.mxu1 %v3641_v5 }
  0xb8   :  { %2782 = vmatmul.mubr.f32.gmra.mrb[10].mxu0 %v3656_v11  ;;  %3022 = vmatmul.mubr.f32.gmra.mrb[10].mxu1 %v3661_v12 }
  0xb9   :  { %2784 = vmatprep.mubr.f32.mxu0 %v3666_v13  ;;  %3024 = vmatprep.mubr.f32.mxu1 %v3671_v14 }
  0xbc   :  { %2785 = vmatmul.mubr.f32.gmra.mrb[12].mxu0 %v3686_v18  ;;  %3025 = vmatmul.mubr.f32.gmra.mrb[12].mxu1 %v3691_v19 }
  0xbd   :  { %2787 = vmatprep.mubr.f32.mxu0 %v3696_v20  ;;  %3027 = vmatprep.mubr.f32.mxu1 %v3701_v21 }
  0xc0   :  { %2788 = vmatmul.mubr.f32.gmra.mrb[14].mxu0 %v3712_v23  ;;  %3028 = vmatmul.mubr.f32.gmra.mrb[14].mxu1 %v3717_v24 }
  0xc1   :  { %2790 = vmatprep.mubr.f32.mxu0 %v3722_v25  ;;  %3030 = vmatprep.mubr.f32.mxu1 %v3727_v26 }
  0xc4   :  { %2791 = vmatmul.mubr.f32.gmra.mrb[16].mxu0 %v3737_v27  ;;  %3031 = vmatmul.mubr.f32.gmra.mrb[16].mxu1 %v3742_v28 }
  0xc5   :  { %2793 = vmatprep.mubr.f32.mxu0 %v3747_v29  ;;  %3033 = vmatprep.mubr.f32.mxu1 %v3752_v30 }
  0xc8   :  { %2794 = vmatmul.mubr.f32.gmra.mrb[18].mxu0 %v3762_v34  ;;  %3034 = vmatmul.mubr.f32.gmra.mrb[18].mxu1 %v3767_v36 }
  0xc9   :  { %2796 = vmatprep.mubr.f32.mxu0 %v3772_v37  ;;  %3036 = vmatprep.mubr.f32.mxu1 %v3777_v42 }
  0xcc   :  { %2797 = vmatmul.mubr.f32.gmra.mrb[20].mxu0 %v3786_v43  ;;  %3037 = vmatmul.mubr.f32.gmra.mrb[20].mxu1 %v3791_v44 }
  0xcd   :  { %2799 = vmatprep.mubr.f32.mxu0 %v3796_v49  ;;  %3039 = vmatprep.mubr.f32.mxu1 %v3801_v50 }
  0xd0   :  { %2800 = vmatmul.mubr.f32.gmra.mrb[22].mxu0 %v3810_v51  ;;  %3040 = vmatmul.mubr.f32.gmra.mrb[22].mxu1 %v3815_v56 }
  0xd1   :  { %2802 = vmatprep.mubr.f32.mxu0 %v3820_v57  ;;  %3042 = vmatprep.mubr.f32.mxu1 %v4331_v9 }
  0xd4   :  { %2803 = vmatmul.mubr.f32.gmra.mrb[24].mxu0 %v4332_v10  ;;  %3043 = vmatmul.mubr.f32.gmra.mrb[24].mxu1 %v4333_v31 }
  0xd5   :  { %2805 = vmatprep.mubr.f32.mxu0 %v4334_v32  ;;  %3045 = vmatprep.mubr.f32.mxu1 %v4335_v22 }
  0xd8   :  { %2806 = vmatmul.mubr.f32.gmra.mrb[26].mxu0 %v4336_v58  ;;  %3046 = vmatmul.mubr.f32.gmra.mrb[26].mxu1 %v4337_v63 }
  0xd9   :  { %2808 = vmatprep.mubr.f32.mxu0 %v4338_v33  ;;  %3048 = vmatprep.mubr.f32.mxu1 %v4339_v35 }
  0xdc   :  { %2809 = vmatmul.mubr.f32.gmra.mrb[28].mxu0 %v3882_v17  ;;  %3049 = vmatmul.mubr.f32.gmra.mrb[28].mxu1 %v3887_v6 }
  0xdd   :  { %2811 = vmatprep.mubr.f32.mxu0 %v2108_v38  ;;  %3051 = vmatprep.mubr.f32.mxu1 %v2236_v39 }
  0xe0   :  { %2812 = vmatmul.mubr.f32.gmra.mrb[30].mxu0 %v2109_v40  ;;  %3052 = vmatmul.mubr.f32.gmra.mrb[30].mxu1 %v2237_v41 }
 0x177   :  { %v2768_v46 = vpop.f32.mrb[0].mxu0  ;;  %v3008_v47 = vpop.f32.mrb[0].mxu1 }
 0x178   :  { %876 = vst [vmem:[%s4305_s2 + $0x8] sm:$0xff] %v2768_v46  ;;  %v949_v48 = vmul.f32 %v2768_v46, %v2768_v46  ;;  %2255 = vst [vmem:[%s4305_s2 + $0x108] sm:$0xff] %v3008_v47  ;;  %v1948_v52 = vmul.f32 %v3008_v47, %v3008_v47  ;;  %v684_v53 = vpop.f32.mrb[1].mxu0  ;;  %v1682_v54 = vpop.f32.mrb[1].mxu1 }
 0x179   :  { %875 = vst [vmem:[%s4305_s2] sm:$0xff] %v684_v53  ;;  %v908_v55 = vadd.f32 %v2768_v46, %v684_v53  ;;  %v948_v59 = vmul.f32 %v684_v53, %v684_v53  ;;  %2254 = vst [vmem:[%s4305_s2 + $0x100] sm:$0xff] %v1682_v54  ;;  %v1907_v60 = vadd.f32 %v3008_v47, %v1682_v54 }
 0x17a   :  { %v1947_v61 = vmul.f32 %v1682_v54, %v1682_v54 }
 0x17b   :  { %v980_v62 = vadd.f32 %v949_v48, %v948_v59  ;;  %v2771_v3 = vpop.f32.mrb[2].mxu0  ;;  %v3011_v4 = vpop.f32.mrb[2].mxu1 }
 0x17c   :  { %v1979_v2 = vadd.f32 %v1948_v52, %v1947_v61  ;;  %878 = vst [vmem:[%s4305_s2 + $0x18] sm:$0xff] %v2771_v3  ;;  %2257 = vst [vmem:[%s4305_s2 + $0x118] sm:$0xff] %v3011_v4  ;;  %v694_v5 = vpop.f32.mrb[3].mxu0  ;;  %v1692_v11 = vpop.f32.mrb[3].mxu1  ;;  %v951_v19 = vmul.f32 %v2771_v3, %v2771_v3  ;;  %v1950_v27 = vmul.f32 %v3011_v4, %v3011_v4 }
 0x17d   :  { %877 = vst [vmem:[%s4305_s2 + $0x10] sm:$0xff] %v694_v5  ;;  %v909_v12 = vadd.f32 %v908_v55, %v694_v5  ;;  %v950_v13 = vmul.f32 %v694_v5, %v694_v5  ;;  %2256 = vst [vmem:[%s4305_s2 + $0x110] sm:$0xff] %v1692_v11  ;;  %v1908_v14 = vadd.f32 %v1907_v60, %v1692_v11 }
 0x17e   :  { %v1949_v18 = vmul.f32 %v1692_v11, %v1692_v11 }
 0x17f   :  { %v981_v20 = vadd.f32 %v980_v62, %v950_v13  ;;  %v2774_v23 = vpop.f32.mrb[4].mxu0  ;;  %v3014_v24 = vpop.f32.mrb[4].mxu1  ;;  %v910_v25 = vadd.f32 %v2771_v3, %v909_v12  ;;  %v1909_v26 = vadd.f32 %v3011_v4, %v1908_v14 }
 0x180   :  { %v1980_v21 = vadd.f32 %v1979_v2, %v1949_v18  ;;  %880 = vst [vmem:[%s4305_s2 + $0x28] sm:$0xff] %v2774_v23  ;;  %2259 = vst [vmem:[%s4305_s2 + $0x128] sm:$0xff] %v3014_v24  ;;  %v704_v28 = vpop.f32.mrb[5].mxu0  ;;  %v1702_v29 = vpop.f32.mrb[5].mxu1  ;;  %v953_v44 = vmul.f32 %v2774_v23, %v2774_v23  ;;  %v1952_v6 = vmul.f32 %v3014_v24, %v3014_v24 }
 0x181   :  { %879 = vst [vmem:[%s4305_s2 + $0x20] sm:$0xff] %v704_v28  ;;  %v911_v30 = vadd.f32 %v910_v25, %v704_v28  ;;  %v952_v34 = vmul.f32 %v704_v28, %v704_v28  ;;  %v982_v36 = vadd.f32 %v981_v20, %v951_v19  ;;  %2258 = vst [vmem:[%s4305_s2 + $0x120] sm:$0xff] %v1702_v29 }
 0x182   :  { %v1910_v37 = vadd.f32 %v1909_v26, %v1702_v29  ;;  %v1951_v42 = vmul.f32 %v1702_v29, %v1702_v29  ;;  %v1981_v43 = vadd.f32 %v1980_v21, %v1950_v27 }
 0x183   :  { %v983_v49 = vadd.f32 %v982_v36, %v952_v34  ;;  %v2777_v50 = vpop.f32.mrb[6].mxu0  ;;  %v3017_v51 = vpop.f32.mrb[6].mxu1  ;;  %v912_v56 = vadd.f32 %v2774_v23, %v911_v30 }
 0x184   :  { %v1911_v57 = vadd.f32 %v3014_v24, %v1910_v37  ;;  %v1982_v17 = vadd.f32 %v1981_v43, %v1951_v42  ;;  %882 = vst [vmem:[%s4305_s2 + $0x38] sm:$0xff] %v2777_v50  ;;  %2261 = vst [vmem:[%s4305_s2 + $0x138] sm:$0xff] %v3017_v51  ;;  %v714_v15 = vpop.f32.mrb[7].mxu0  ;;  %v1712_v16 = vpop.f32.mrb[7].mxu1  ;;  %v955_v31 = vmul.f32 %v2777_v50, %v2777_v50 }
 0x185   :  { %881 = vst [vmem:[%s4305_s2 + $0x30] sm:$0xff] %v714_v15  ;;  %v913_v7 = vadd.f32 %v912_v56, %v714_v15  ;;  %v954_v8 = vmul.f32 %v714_v15, %v714_v15  ;;  %v984_v0 = vadd.f32 %v983_v49, %v953_v44  ;;  %2260 = vst [vmem:[%s4305_s2 + $0x130] sm:$0xff] %v1712_v16 }
 0x186   :  { %v1912_v1 = vadd.f32 %v1911_v57, %v1712_v16  ;;  %v1953_v9 = vmul.f32 %v1712_v16, %v1712_v16  ;;  %v1983_v10 = vadd.f32 %v1982_v17, %v1952_v6  ;;  %v1954_v35 = vmul.f32 %v3017_v51, %v3017_v51 }
 0x187   :  { %v985_v32 = vadd.f32 %v984_v0, %v954_v8  ;;  %v2780_v22 = vpop.f32.mrb[8].mxu0  ;;  %v3020_v58 = vpop.f32.mrb[8].mxu1  ;;  %v914_v63 = vadd.f32 %v2777_v50, %v913_v7 }
 0x188   :  { %v1913_v33 = vadd.f32 %v3017_v51, %v1912_v1  ;;  %v1984_v38 = vadd.f32 %v1983_v10, %v1953_v9  ;;  %884 = vst [vmem:[%s4305_s2 + $0x48] sm:$0xff] %v2780_v22  ;;  %2263 = vst [vmem:[%s4305_s2 + $0x148] sm:$0xff] %v3020_v58  ;;  %v724_v39 = vpop.f32.mrb[9].mxu0  ;;  %v1722_v40 = vpop.f32.mrb[9].mxu1  ;;  %v957_v53 = vmul.f32 %v2780_v22, %v2780_v22 }
 0x189   :  { %883 = vst [vmem:[%s4305_s2 + $0x40] sm:$0xff] %v724_v39  ;;  %v915_v41 = vadd.f32 %v914_v63, %v724_v39  ;;  %v956_v45 = vmul.f32 %v724_v39, %v724_v39  ;;  %v986_v46 = vadd.f32 %v985_v32, %v955_v31  ;;  %2262 = vst [vmem:[%s4305_s2 + $0x140] sm:$0xff] %v1722_v40 }
 0x18a   :  { %v1914_v47 = vadd.f32 %v1913_v33, %v1722_v40  ;;  %v1955_v48 = vmul.f32 %v1722_v40, %v1722_v40  ;;  %v1985_v52 = vadd.f32 %v1984_v38, %v1954_v35  ;;  %v1956_v62 = vmul.f32 %v3020_v58, %v3020_v58 }
 0x18b   :  { %v987_v54 = vadd.f32 %v986_v46, %v956_v45  ;;  %v2783_v55 = vpop.f32.mrb[10].mxu0  ;;  %v3023_v59 = vpop.f32.mrb[10].mxu1  ;;  %v916_v60 = vadd.f32 %v2780_v22, %v915_v41 }
 0x18c   :  { %v1915_v61 = vadd.f32 %v3020_v58, %v1914_v47  ;;  %v1986_v2 = vadd.f32 %v1985_v52, %v1955_v48  ;;  %886 = vst [vmem:[%s4305_s2 + $0x58] sm:$0xff] %v2783_v55  ;;  %2265 = vst [vmem:[%s4305_s2 + $0x158] sm:$0xff] %v3023_v59  ;;  %v734_v3 = vpop.f32.mrb[11].mxu0  ;;  %v1732_v4 = vpop.f32.mrb[11].mxu1  ;;  %v959_v19 = vmul.f32 %v2783_v55, %v2783_v55 }
 0x18d   :  { %885 = vst [vmem:[%s4305_s2 + $0x50] sm:$0xff] %v734_v3  ;;  %v917_v5 = vadd.f32 %v916_v60, %v734_v3  ;;  %v958_v11 = vmul.f32 %v734_v3, %v734_v3  ;;  %v988_v12 = vadd.f32 %v987_v54, %v957_v53  ;;  %2264 = vst [vmem:[%s4305_s2 + $0x150] sm:$0xff] %v1732_v4 }
 0x18e   :  { %v1916_v13 = vadd.f32 %v1915_v61, %v1732_v4  ;;  %v1957_v14 = vmul.f32 %v1732_v4, %v1732_v4  ;;  %v1987_v18 = vadd.f32 %v1986_v2, %v1956_v62  ;;  %v1958_v26 = vmul.f32 %v3023_v59, %v3023_v59 }
 0x18f   :  { %v989_v20 = vadd.f32 %v988_v12, %v958_v11  ;;  %v2786_v21 = vpop.f32.mrb[12].mxu0  ;;  %v3026_v23 = vpop.f32.mrb[12].mxu1  ;;  %v918_v24 = vadd.f32 %v2783_v55, %v917_v5 }
 0x190   :  { %v1917_v25 = vadd.f32 %v3023_v59, %v1916_v13  ;;  %v1988_v27 = vadd.f32 %v1987_v18, %v1957_v14  ;;  %888 = vst [vmem:[%s4305_s2 + $0x68] sm:$0xff] %v2786_v21  ;;  %2267 = vst [vmem:[%s4305_s2 + $0x168] sm:$0xff] %v3026_v23  ;;  %v744_v28 = vpop.f32.mrb[13].mxu0  ;;  %v1742_v29 = vpop.f32.mrb[13].mxu1  ;;  %v961_v44 = vmul.f32 %v2786_v21, %v2786_v21 }
 0x191   :  { %887 = vst [vmem:[%s4305_s2 + $0x60] sm:$0xff] %v744_v28  ;;  %v919_v30 = vadd.f32 %v918_v24, %v744_v28  ;;  %v960_v34 = vmul.f32 %v744_v28, %v744_v28  ;;  %v990_v36 = vadd.f32 %v989_v20, %v959_v19  ;;  %2266 = vst [vmem:[%s4305_s2 + $0x160] sm:$0xff] %v1742_v29 }
 0x192   :  { %v1918_v37 = vadd.f32 %v1917_v25, %v1742_v29  ;;  %v1959_v42 = vmul.f32 %v1742_v29, %v1742_v29  ;;  %v1989_v43 = vadd.f32 %v1988_v27, %v1958_v26  ;;  %v1960_v6 = vmul.f32 %v3026_v23, %v3026_v23 }
 0x193   :  { %v991_v49 = vadd.f32 %v990_v36, %v960_v34  ;;  %v2789_v50 = vpop.f32.mrb[14].mxu0  ;;  %v3029_v51 = vpop.f32.mrb[14].mxu1  ;;  %v920_v56 = vadd.f32 %v2786_v21, %v919_v30 }
 0x194   :  { %v1919_v57 = vadd.f32 %v3026_v23, %v1918_v37  ;;  %v1990_v17 = vadd.f32 %v1989_v43, %v1959_v42  ;;  %890 = vst [vmem:[%s4305_s2 + $0x78] sm:$0xff] %v2789_v50  ;;  %2269 = vst [vmem:[%s4305_s2 + $0x178] sm:$0xff] %v3029_v51  ;;  %v754_v15 = vpop.f32.mrb[15].mxu0  ;;  %v1752_v16 = vpop.f32.mrb[15].mxu1  ;;  %v963_v31 = vmul.f32 %v2789_v50, %v2789_v50 }
 0x195   :  { %889 = vst [vmem:[%s4305_s2 + $0x70] sm:$0xff] %v754_v15  ;;  %v921_v7 = vadd.f32 %v920_v56, %v754_v15  ;;  %v962_v8 = vmul.f32 %v754_v15, %v754_v15  ;;  %v992_v0 = vadd.f32 %v991_v49, %v961_v44  ;;  %2268 = vst [vmem:[%s4305_s2 + $0x170] sm:$0xff] %v1752_v16 }
 0x196   :  { %v1920_v1 = vadd.f32 %v1919_v57, %v1752_v16  ;;  %v1961_v9 = vmul.f32 %v1752_v16, %v1752_v16  ;;  %v1991_v10 = vadd.f32 %v1990_v17, %v1960_v6  ;;  %v1962_v35 = vmul.f32 %v3029_v51, %v3029_v51 }
 0x197   :  { %v993_v32 = vadd.f32 %v992_v0, %v962_v8  ;;  %v2792_v22 = vpop.f32.mrb[16].mxu0  ;;  %v3032_v58 = vpop.f32.mrb[16].mxu1  ;;  %v922_v63 = vadd.f32 %v2789_v50, %v921_v7 }
 0x198   :  { %v1921_v33 = vadd.f32 %v3029_v51, %v1920_v1  ;;  %v1992_v38 = vadd.f32 %v1991_v10, %v1961_v9  ;;  %892 = vst [vmem:[%s4305_s2 + $0x88] sm:$0xff] %v2792_v22  ;;  %2271 = vst [vmem:[%s4305_s2 + $0x188] sm:$0xff] %v3032_v58  ;;  %v764_v39 = vpop.f32.mrb[17].mxu0  ;;  %v1762_v40 = vpop.f32.mrb[17].mxu1  ;;  %v965_v53 = vmul.f32 %v2792_v22, %v2792_v22 }
 0x199   :  { %891 = vst [vmem:[%s4305_s2 + $0x80] sm:$0xff] %v764_v39  ;;  %v923_v41 = vadd.f32 %v922_v63, %v764_v39  ;;  %v964_v45 = vmul.f32 %v764_v39, %v764_v39  ;;  %v994_v46 = vadd.f32 %v993_v32, %v963_v31  ;;  %2270 = vst [vmem:[%s4305_s2 + $0x180] sm:$0xff] %v1762_v40 }
 0x19a   :  { %v1922_v47 = vadd.f32 %v1921_v33, %v1762_v40  ;;  %v1963_v48 = vmul.f32 %v1762_v40, %v1762_v40  ;;  %v1993_v52 = vadd.f32 %v1992_v38, %v1962_v35  ;;  %v1964_v62 = vmul.f32 %v3032_v58, %v3032_v58 }
 0x19b   :  { %v995_v54 = vadd.f32 %v994_v46, %v964_v45  ;;  %v2795_v55 = vpop.f32.mrb[18].mxu0  ;;  %v3035_v59 = vpop.f32.mrb[18].mxu1  ;;  %v924_v60 = vadd.f32 %v2792_v22, %v923_v41 }
 0x19c   :  { %v1923_v61 = vadd.f32 %v3032_v58, %v1922_v47  ;;  %v1994_v2 = vadd.f32 %v1993_v52, %v1963_v48  ;;  %894 = vst [vmem:[%s4305_s2 + $0x98] sm:$0xff] %v2795_v55  ;;  %2273 = vst [vmem:[%s4305_s2 + $0x198] sm:$0xff] %v3035_v59  ;;  %v774_v3 = vpop.f32.mrb[19].mxu0  ;;  %v1772_v4 = vpop.f32.mrb[19].mxu1  ;;  %v967_v19 = vmul.f32 %v2795_v55, %v2795_v55 }
 0x19d   :  { %893 = vst [vmem:[%s4305_s2 + $0x90] sm:$0xff] %v774_v3  ;;  %v925_v5 = vadd.f32 %v924_v60, %v774_v3  ;;  %v966_v11 = vmul.f32 %v774_v3, %v774_v3  ;;  %v996_v12 = vadd.f32 %v995_v54, %v965_v53  ;;  %2272 = vst [vmem:[%s4305_s2 + $0x190] sm:$0xff] %v1772_v4 }
 0x19e   :  { %v1924_v13 = vadd.f32 %v1923_v61, %v1772_v4  ;;  %v1965_v14 = vmul.f32 %v1772_v4, %v1772_v4  ;;  %v1995_v18 = vadd.f32 %v1994_v2, %v1964_v62  ;;  %v1966_v26 = vmul.f32 %v3035_v59, %v3035_v59 }
 0x19f   :  { %v997_v20 = vadd.f32 %v996_v12, %v966_v11  ;;  %v2798_v21 = vpop.f32.mrb[20].mxu0  ;;  %v3038_v23 = vpop.f32.mrb[20].mxu1  ;;  %v926_v24 = vadd.f32 %v2795_v55, %v925_v5 }
 0x1a0   :  { %v1925_v25 = vadd.f32 %v3035_v59, %v1924_v13  ;;  %v1996_v27 = vadd.f32 %v1995_v18, %v1965_v14  ;;  %896 = vst [vmem:[%s4305_s2 + $0xa8] sm:$0xff] %v2798_v21  ;;  %2275 = vst [vmem:[%s4305_s2 + $0x1a8] sm:$0xff] %v3038_v23  ;;  %v784_v28 = vpop.f32.mrb[21].mxu0  ;;  %v1782_v29 = vpop.f32.mrb[21].mxu1  ;;  %v969_v44 = vmul.f32 %v2798_v21, %v2798_v21 }
 0x1a1   :  { %895 = vst [vmem:[%s4305_s2 + $0xa0] sm:$0xff] %v784_v28  ;;  %v927_v30 = vadd.f32 %v926_v24, %v784_v28  ;;  %v968_v34 = vmul.f32 %v784_v28, %v784_v28  ;;  %v998_v36 = vadd.f32 %v997_v20, %v967_v19  ;;  %2274 = vst [vmem:[%s4305_s2 + $0x1a0] sm:$0xff] %v1782_v29 }
 0x1a2   :  { %v1926_v37 = vadd.f32 %v1925_v25, %v1782_v29  ;;  %v1967_v42 = vmul.f32 %v1782_v29, %v1782_v29  ;;  %v1997_v43 = vadd.f32 %v1996_v27, %v1966_v26  ;;  %v1968_v6 = vmul.f32 %v3038_v23, %v3038_v23 }
 0x1a3   :  { %v999_v49 = vadd.f32 %v998_v36, %v968_v34  ;;  %v2801_v50 = vpop.f32.mrb[22].mxu0  ;;  %v3041_v51 = vpop.f32.mrb[22].mxu1  ;;  %v928_v56 = vadd.f32 %v2798_v21, %v927_v30 }
 0x1a4   :  { %v1927_v57 = vadd.f32 %v3038_v23, %v1926_v37  ;;  %v1998_v17 = vadd.f32 %v1997_v43, %v1967_v42  ;;  %898 = vst [vmem:[%s4305_s2 + $0xb8] sm:$0xff] %v2801_v50  ;;  %2277 = vst [vmem:[%s4305_s2 + $0x1b8] sm:$0xff] %v3041_v51  ;;  %v794_v15 = vpop.f32.mrb[23].mxu0  ;;  %v1792_v16 = vpop.f32.mrb[23].mxu1  ;;  %v971_v31 = vmul.f32 %v2801_v50, %v2801_v50 }
 0x1a5   :  { %897 = vst [vmem:[%s4305_s2 + $0xb0] sm:$0xff] %v794_v15  ;;  %v929_v7 = vadd.f32 %v928_v56, %v794_v15  ;;  %v970_v8 = vmul.f32 %v794_v15, %v794_v15  ;;  %v1000_v0 = vadd.f32 %v999_v49, %v969_v44  ;;  %2276 = vst [vmem:[%s4305_s2 + $0x1b0] sm:$0xff] %v1792_v16 }
 0x1a6   :  { %v1928_v1 = vadd.f32 %v1927_v57, %v1792_v16  ;;  %v1969_v9 = vmul.f32 %v1792_v16, %v1792_v16  ;;  %v1999_v10 = vadd.f32 %v1998_v17, %v1968_v6  ;;  %v1970_v35 = vmul.f32 %v3041_v51, %v3041_v51 }
 0x1a7   :  { %v1001_v32 = vadd.f32 %v1000_v0, %v970_v8  ;;  %v2804_v22 = vpop.f32.mrb[24].mxu0  ;;  %v3044_v58 = vpop.f32.mrb[24].mxu1  ;;  %v930_v63 = vadd.f32 %v2801_v50, %v929_v7 }
 0x1a8   :  { %v1929_v33 = vadd.f32 %v3041_v51, %v1928_v1  ;;  %v2000_v38 = vadd.f32 %v1999_v10, %v1969_v9  ;;  %900 = vst [vmem:[%s4305_s2 + $0xc8] sm:$0xff] %v2804_v22  ;;  %2279 = vst [vmem:[%s4305_s2 + $0x1c8] sm:$0xff] %v3044_v58  ;;  %v804_v39 = vpop.f32.mrb[25].mxu0  ;;  %v1802_v40 = vpop.f32.mrb[25].mxu1  ;;  %v973_v53 = vmul.f32 %v2804_v22, %v2804_v22 }
 0x1a9   :  { %899 = vst [vmem:[%s4305_s2 + $0xc0] sm:$0xff] %v804_v39  ;;  %v931_v41 = vadd.f32 %v930_v63, %v804_v39  ;;  %v972_v45 = vmul.f32 %v804_v39, %v804_v39  ;;  %v1002_v46 = vadd.f32 %v1001_v32, %v971_v31  ;;  %2278 = vst [vmem:[%s4305_s2 + $0x1c0] sm:$0xff] %v1802_v40 }
 0x1aa   :  { %v1930_v47 = vadd.f32 %v1929_v33, %v1802_v40  ;;  %v1971_v48 = vmul.f32 %v1802_v40, %v1802_v40  ;;  %v2001_v52 = vadd.f32 %v2000_v38, %v1970_v35  ;;  %v1972_v62 = vmul.f32 %v3044_v58, %v3044_v58 }
 0x1ab   :  { %v1003_v54 = vadd.f32 %v1002_v46, %v972_v45  ;;  %v2807_v55 = vpop.f32.mrb[26].mxu0  ;;  %v3047_v59 = vpop.f32.mrb[26].mxu1  ;;  %v932_v60 = vadd.f32 %v2804_v22, %v931_v41 }
 0x1ac   :  { %v1931_v61 = vadd.f32 %v3044_v58, %v1930_v47  ;;  %v2002_v2 = vadd.f32 %v2001_v52, %v1971_v48  ;;  %902 = vst [vmem:[%s4305_s2 + $0xd8] sm:$0xff] %v2807_v55  ;;  %2281 = vst [vmem:[%s4305_s2 + $0x1d8] sm:$0xff] %v3047_v59  ;;  %v814_v3 = vpop.f32.mrb[27].mxu0  ;;  %v1812_v4 = vpop.f32.mrb[27].mxu1  ;;  %v975_v19 = vmul.f32 %v2807_v55, %v2807_v55 }
 0x1ad   :  { %901 = vst [vmem:[%s4305_s2 + $0xd0] sm:$0xff] %v814_v3  ;;  %v933_v5 = vadd.f32 %v932_v60, %v814_v3  ;;  %v974_v11 = vmul.f32 %v814_v3, %v814_v3  ;;  %v1004_v12 = vadd.f32 %v1003_v54, %v973_v53  ;;  %2280 = vst [vmem:[%s4305_s2 + $0x1d0] sm:$0xff] %v1812_v4 }
 0x1ae   :  { %v1932_v13 = vadd.f32 %v1931_v61, %v1812_v4  ;;  %v1973_v14 = vmul.f32 %v1812_v4, %v1812_v4  ;;  %v2003_v18 = vadd.f32 %v2002_v2, %v1972_v62  ;;  %v1974_v26 = vmul.f32 %v3047_v59, %v3047_v59  ;;  %v907_v62 = vld [vmem:[%s4303_s3] sm:$0x1] }
 0x1af   :  { %v1005_v20 = vadd.f32 %v1004_v12, %v974_v11  ;;  %v2810_v21 = vpop.f32.mrb[28].mxu0  ;;  %v3050_v23 = vpop.f32.mrb[28].mxu1  ;;  %v934_v24 = vadd.f32 %v2807_v55, %v933_v5  ;;  %v947_v5 = vld [vmem:[%s4304_s4] sm:$0x1] }
 0x1b0   :  { %v1933_v25 = vadd.f32 %v3047_v59, %v1932_v13  ;;  %v2004_v27 = vadd.f32 %v2003_v18, %v1973_v14  ;;  %904 = vst [vmem:[%s4305_s2 + $0xe8] sm:$0xff] %v2810_v21  ;;  %2283 = vst [vmem:[%s4305_s2 + $0x1e8] sm:$0xff] %v3050_v23  ;;  %v824_v28 = vpop.f32.mrb[29].mxu0  ;;  %v1822_v29 = vpop.f32.mrb[29].mxu1  ;;  %v977_v44 = vmul.f32 %v2810_v21, %v2810_v21 }
 0x1b1   :  { %903 = vst [vmem:[%s4305_s2 + $0xe0] sm:$0xff] %v824_v28  ;;  %v935_v30 = vadd.f32 %v934_v24, %v824_v28  ;;  %v976_v34 = vmul.f32 %v824_v28, %v824_v28  ;;  %v1006_v36 = vadd.f32 %v1005_v20, %v975_v19  ;;  %2282 = vst [vmem:[%s4305_s2 + $0x1e0] sm:$0xff] %v1822_v29 }
 0x1b2   :  { %v1934_v37 = vadd.f32 %v1933_v25, %v1822_v29  ;;  %v1975_v42 = vmul.f32 %v1822_v29, %v1822_v29  ;;  %v2005_v43 = vadd.f32 %v2004_v27, %v1974_v26  ;;  %v1976_v6 = vmul.f32 %v3050_v23, %v3050_v23 }
 0x1b3   :  { %v1007_v49 = vadd.f32 %v1006_v36, %v976_v34  ;;  %v2813_v50 = vpop.f32.mrb[30].mxu0  ;;  %v3053_v51 = vpop.f32.mrb[30].mxu1  ;;  %v936_v56 = vadd.f32 %v2810_v21, %v935_v30 }
 0x1b4   :  { %v1935_v57 = vadd.f32 %v3050_v23, %v1934_v37  ;;  %v2006_v17 = vadd.f32 %v2005_v43, %v1975_v42  ;;  %906 = vst [vmem:[%s4305_s2 + $0xf8] sm:$0xff] %v2813_v50  ;;  %2285 = vst [vmem:[%s4305_s2 + $0x1f8] sm:$0xff] %v3053_v51  ;;  %v834_v15 = vpop.f32.mrb[31].mxu0  ;;  %v1832_v16 = vpop.f32.mrb[31].mxu1  ;;  %v979_v31 = vmul.f32 %v2813_v50, %v2813_v50 }
 0x1b5   :  { %905 = vst [vmem:[%s4305_s2 + $0xf0] sm:$0xff] %v834_v15  ;;  %v937_v7 = vadd.f32 %v936_v56, %v834_v15  ;;  %v978_v8 = vmul.f32 %v834_v15, %v834_v15  ;;  %v1008_v0 = vadd.f32 %v1007_v49, %v977_v44  ;;  %2284 = vst [vmem:[%s4305_s2 + $0x1f0] sm:$0xff] %v1832_v16 }
 0x1b6   :  { %v1936_v1 = vadd.f32 %v1935_v57, %v1832_v16  ;;  %v1977_v9 = vmul.f32 %v1832_v16, %v1832_v16  ;;  %v2007_v10 = vadd.f32 %v2006_v17, %v1976_v6  ;;  %v1978_v63 = vmul.f32 %v3053_v51, %v3053_v51 }
 0x1b7   :  { %v938_v32 = vadd.f32 %v2813_v50, %v937_v7  ;;  %v1009_v22 = vadd.f32 %v1008_v0, %v978_v8 }
 0x1b8   :  { %v1937_v58 = vadd.f32 %v3053_v51, %v1936_v1  ;;  %v2008_v33 = vadd.f32 %v2007_v10, %v1977_v9 }
 0x1b9   :  { %v939_v35 = vrot.slane %v938_v32, 4  ;;  %v1010_v38 = vadd.f32 %v1009_v22, %v979_v31 }
 0x1ba   :  { %v1938_v39 = vrot.slane %v1937_v58, 4  ;;  %v2009_v40 = vadd.f32 %v2008_v33, %v1978_v63 }
 0x1bb   :  { %v940_v41 = vadd.f32 %v939_v35, %v938_v32  ;;  %v1011_v45 = vrot.slane %v1010_v38, 4 }
 0x1bc   :  { %v2010_v46 = vrot.slane %v2009_v40, 4  ;;  %v1939_v52 = vadd.f32 %v1938_v39, %v1937_v58 }
 0x1bd   :  { %v941_v47 = vrot.slane %v940_v41, 2  ;;  %v1012_v48 = vadd.f32 %v1011_v45, %v1010_v38 }
 0x1be   :  { %v2011_v55 = vadd.f32 %v2010_v46, %v2009_v40  ;;  %v1940_v61 = vrot.slane %v1939_v52, 2 }
 0x1bf   :  { %v942_v53 = vadd.f32 %v941_v47, %v940_v41  ;;  %v1013_v54 = vrot.slane %v1012_v48, 2 }
 0x1c0   :  { %v2012_v4 = vrot.slane %v2011_v55, 2  ;;  %v1941_v13 = vadd.f32 %v1940_v61, %v1939_v52 }
 0x1c1   :  { %v943_v59 = vrot.slane %v942_v53, 1  ;;  %v1014_v60 = vadd.f32 %v1013_v54, %v1012_v48 }
 0x1c2   :  { %v2013_v18 = vadd.f32 %v2012_v4, %v2011_v55  ;;  %v1942_v19 = vrot.slane %v1941_v13, 1 }
 0x1c3   :  { %v944_v2 = vadd.f32 %v943_v59, %v942_v53  ;;  %v1015_v3 = vrot.slane %v1014_v60, 1 }
 0x1c4   :  { %v2014_v20 = vrot.slane %v2013_v18, 1  ;;  %v1943_v21 = vadd.f32 %v1942_v19, %v1941_v13 }
 0x1c5   :  { %v945_v11 = vadd.f32 %v944_v2, %v907_v62  ;;  %v1016_v12 = vadd.f32 %v1015_v3, %v1014_v60 }
 0x1c6   :  { %v2015_v25 = vadd.f32 %v2014_v20, %v2013_v18 }
 0x1c7   :  { %946 = vst [vmem:[%s4303_s3] sm:$0x1] %v945_v11  ;;  %v1017_v14 = vadd.f32 %v1016_v12, %v947_v5 }
 0x1c9   :  { %1018 = vst [vmem:[%s4304_s4] sm:$0x1] %v1017_v14 }
 0x1ce   :  { %v1906_v23 = vld [vmem:[%s4303_s3] sm:$0x1] }
 0x1cf   :  { %v1944_v24 = vadd.f32 %v1943_v21, %v1906_v23 }
 0x1d0   :  { %v1946_v26 = vld [vmem:[%s4304_s4] sm:$0x1] }
 0x1d1   :  { %1945 = vst [vmem:[%s4303_s3] sm:$0x1] %v1944_v24  ;;  %v2016_v27 = vadd.f32 %v2015_v25, %v1946_v26 }
 0x1d3   :  { %2017 = vst [vmem:[%s4304_s4] sm:$0x1] %v2016_v27 }

</bundles_post_ra>
